<compile_context>
chip_gen: v5e
topology: v5e:2x2
jax: 0.10.0
libtpu: 0.0.40
codegen_flags: <defaults>
</compile_context>

<pallas_src>
import functools

import jax
import jax.numpy as jnp
from jax.experimental import pallas as pl
from jax.experimental.pallas import tpu as pltpu


def _layer_norm(x, g, b, eps):
    mu = jnp.mean(x, axis=-1, keepdims=True)
    var = jnp.mean(jnp.square(x - mu), axis=-1, keepdims=True)
    return (x - mu) * jax.lax.rsqrt(var + eps) * g + b


def _crn_kernel(frames_ref, bias_ref, enc_w_ref, enc_b_ref,
                in_w_ref, in_b_ref, out_w_ref, out_b_ref,
                ln1_g_ref, ln1_b_ref,
                ff1_w_ref, ff1_b_ref, ff2_w_ref, ff2_b_ref,
                ln2_g_ref, ln2_b_ref,
                cls_w_ref, cls_b_ref,
                o_ref, h_scr,
                *, heads, seq, batch, eps):
    layer = pl.program_id(0)
    M, E = h_scr.shape
    dh = E // heads
    scale = 1.0 / (dh ** 0.5)

    # ---- layer-0 prologue: ShotEncoder stand-in projection ------------------
    @pl.when(layer == 0)
    def _():
        f = frames_ref[...].astype(jnp.bfloat16)
        h0 = jnp.dot(f, enc_w_ref[...], preferred_element_type=jnp.float32)
        h_scr[...] = h0 + enc_b_ref[...]

    h = h_scr[...]                                   # (M, E) f32 residual stream
    bias = bias_ref[...]                             # (M, M) block-diag mask bias

    # ---- multi-head self-attention (post-norm) ------------------------------
    qkv = jnp.dot(h.astype(jnp.bfloat16), in_w_ref[0],
                  preferred_element_type=jnp.float32) + in_b_ref[0]   # (M, 3E)

    out_w = out_w_ref[0]                             # (E, E) bf16
    attn = jnp.zeros((M, E), jnp.float32)
    for hd in range(heads):
        # Fold the 1/sqrt(dh) scale into q once per head (one tiny VPU mul).
        q = qkv[:, hd * dh:(hd + 1) * dh] * scale
        k = qkv[:, E + hd * dh:E + (hd + 1) * dh]
        v = qkv[:, 2 * E + hd * dh:2 * E + (hd + 1) * dh]
        # q @ k^T without materializing a transpose of k.
        s = jax.lax.dot_general(q, k, (((1,), (1,)), ((), ())),
                                preferred_element_type=jnp.float32)
        s = s + bias                                 # mask out cross-batch rows
        s = s - jnp.max(s, axis=-1, keepdims=True)
        p = jnp.exp(s)
        p = p * pl.reciprocal(jnp.sum(p, axis=-1, keepdims=True), approx=True)
        o_h = jnp.dot(p, v, preferred_element_type=jnp.float32)       # (M, dh)
        # Fold the output projection per head: == concat(heads) @ out_proj_w.
        attn = attn + jnp.dot(o_h.astype(jnp.bfloat16),
                              out_w[hd * dh:(hd + 1) * dh, :],
                              preferred_element_type=jnp.float32)
    attn = attn + out_b_ref[0]

    h1 = _layer_norm(h + attn, ln1_g_ref[0], ln1_b_ref[0], eps)

    # ---- feed-forward (E -> ffn -> E, ReLU); dropout = identity -------------
    ff = jnp.dot(h1.astype(jnp.bfloat16), ff1_w_ref[0],
                 preferred_element_type=jnp.float32) + ff1_b_ref[0]
    ff = jnp.maximum(ff, 0.0)
    ff = jnp.dot(ff.astype(jnp.bfloat16), ff2_w_ref[0],
                 preferred_element_type=jnp.float32) + ff2_b_ref[0]
    h2 = _layer_norm(h1 + ff, ln2_g_ref[0], ln2_b_ref[0], eps)

    h_scr[...] = h2

    # ---- last-layer epilogue: mean over F (dim=1) + classifier (VPU only) ---
    @pl.when(layer == pl.num_programs(0) - 1)
    def _():
        rows = [jnp.mean(h2[b * batch:(b + 1) * batch, :], axis=0, keepdims=True)
                for b in range(seq)]
        hm = jnp.concatenate(rows, axis=0)                      # (B, E)
        logits = jnp.sum(hm * cls_w_ref[...], axis=-1, keepdims=True)
        o_ref[...] = logits + cls_b_ref[...]


def crn_forward(x, params, heads):
    B, F, C, H, W = x.shape
    M = B * F
    Kin = C * H * W
    frames = x.reshape(M, Kin).astype(jnp.float32)

    L, E, _ = params["in_w"].shape
    FFN = params["ff1_w"].shape[2]

    # Static block-diagonal attention mask: with batch_first=False the (B, F, E)
    # tensor is attended over B (seq=B, batch=F).  Rows of the flattened (M, E)
    # tensor are ordered (b, f); two rows may attend iff they share the same f.
    idx = jnp.arange(M, dtype=jnp.int32)
    same = (idx[:, None] % F) == (idx[None, :] % F)
    attn_bias = jnp.where(same, 0.0, -1e30).astype(jnp.float32)

    const2 = lambda l: (0, 0)
    per_layer = lambda l: (l, 0, 0)

    out = pl.pallas_call(
        functools.partial(_crn_kernel, heads=heads, seq=B, batch=F, eps=1e-5),
        out_shape=jax.ShapeDtypeStruct((B, 1), jnp.float32),
        grid=(L,),
        in_specs=[
            pl.BlockSpec((M, Kin), const2),          # frames (resident, fetched once)
            pl.BlockSpec((M, M), const2),            # attn_bias (resident)
            pl.BlockSpec((Kin, E), const2),          # enc_w (resident)
            pl.BlockSpec((1, E), const2),            # enc_b
            pl.BlockSpec((1, E, 3 * E), per_layer),  # in_proj_w  (pipelined per layer)
            pl.BlockSpec((1, 1, 3 * E), per_layer),  # in_proj_b
            pl.BlockSpec((1, E, E), per_layer),      # out_proj_w
            pl.BlockSpec((1, 1, E), per_layer),      # out_proj_b
            pl.BlockSpec((1, 1, E), per_layer),      # ln1_g
            pl.BlockSpec((1, 1, E), per_layer),      # ln1_b
            pl.BlockSpec((1, E, FFN), per_layer),    # ff1_w
            pl.BlockSpec((1, 1, FFN), per_layer),    # ff1_b
            pl.BlockSpec((1, FFN, E), per_layer),    # ff2_w
            pl.BlockSpec((1, 1, E), per_layer),      # ff2_b
            pl.BlockSpec((1, 1, E), per_layer),      # ln2_g
            pl.BlockSpec((1, 1, E), per_layer),      # ln2_b
            pl.BlockSpec((1, E), const2),            # cls_w
            pl.BlockSpec((1, 1), const2),            # cls_b
        ],
        out_specs=pl.BlockSpec((B, 1), const2),
        scratch_shapes=[pltpu.VMEM((M, E), jnp.float32)],
        compiler_params=pltpu.CompilerParams(
            dimension_semantics=("arbitrary",)),
    )(frames, attn_bias, params["enc_w"], params["enc_b"],
      params["in_w"], params["in_b"], params["out_w"], params["out_b"],
      params["ln1_g"], params["ln1_b"],
      params["ff1_w"], params["ff1_b"], params["ff2_w"], params["ff2_b"],
      params["ln2_g"], params["ln2_b"],
      params["cls_w"], params["cls_b"])
    return out[:, 0]  # squeeze(1) -> (B,)


def init_params(key, in_feats, dim, heads, layers, ffn):
    del heads
    ks = jax.random.split(key, 2 + layers)
    s = 0.02

    def normal(k, shape, dtype=jnp.bfloat16):
        # MXU weights stored in bf16 (halves weight DMA); math stays f32 in-kernel.
        return (s * jax.random.normal(k, shape, dtype=jnp.float32)).astype(dtype)

    p = {
        "enc_w": normal(ks[0], (in_feats, dim)),
        "enc_b": jnp.zeros((1, dim), jnp.float32),
        "cls_w": normal(ks[1], (1, dim), jnp.float32),
        "cls_b": jnp.zeros((1, 1), jnp.float32),
        "in_b": jnp.zeros((layers, 1, 3 * dim), jnp.float32),
        "out_b": jnp.zeros((layers, 1, dim), jnp.float32),
        "ln1_g": jnp.ones((layers, 1, dim), jnp.float32),
        "ln1_b": jnp.zeros((layers, 1, dim), jnp.float32),
        "ff1_b": jnp.zeros((layers, 1, ffn), jnp.float32),
        "ff2_b": jnp.zeros((layers, 1, dim), jnp.float32),
        "ln2_g": jnp.ones((layers, 1, dim), jnp.float32),
        "ln2_b": jnp.zeros((layers, 1, dim), jnp.float32),
    }
    in_w, out_w, ff1_w, ff2_w = [], [], [], []
    for li in range(layers):
        lk = jax.random.split(ks[2 + li], 4)
        in_w.append(normal(lk[0], (dim, 3 * dim)))
        out_w.append(normal(lk[1], (dim, dim)))
        ff1_w.append(normal(lk[2], (dim, ffn)))
        ff2_w.append(normal(lk[3], (ffn, dim)))
    p["in_w"] = jnp.stack(in_w)
    p["out_w"] = jnp.stack(out_w)
    p["ff1_w"] = jnp.stack(ff1_w)
    p["ff2_w"] = jnp.stack(ff2_w)
    return p


if __name__ == "__main__":
    # Small shapes consistent with the module: x is [B, F, C, H, W].
    B, F, C, H, W = 2, 8, 3, 16, 16
    DIM, HEADS, LAYERS, FFN = 128, 4, 2, 2048  # dim_feedforward keeps its nn default 2048

    key = jax.random.PRNGKey(0)
    kx, kp = jax.random.split(key)
    x = jax.random.normal(kx, (B, F, C, H, W), dtype=jnp.float32)
    params = init_params(kp, C * H * W, DIM, HEADS, LAYERS, FFN)

    fwd = jax.jit(lambda xx, pp: crn_forward(xx, pp, HEADS))
    out = jax.block_until_ready(fwd(x, params))
    assert out.shape == (B,) and out.dtype == jnp.float32
    print("KERNEL_OK")
</pallas_src>

<mosaic_0001>
module attributes {stable_mosaic.version = 11 : i64} {
  func.func @_crn_kernel(%arg0: i32, %arg1: memref<16x768xf32, #tpu.memory_space<vmem>>, %arg2: memref<16x16xf32, #tpu.memory_space<vmem>>, %arg3: memref<768x128xbf16, #tpu.memory_space<vmem>>, %arg4: memref<1x128xf32, #tpu.memory_space<vmem>>, %arg5: memref<1x128x384xbf16, #tpu.memory_space<vmem>>, %arg6: memref<1x1x384xf32, #tpu.memory_space<vmem>>, %arg7: memref<1x128x128xbf16, #tpu.memory_space<vmem>>, %arg8: memref<1x1x128xf32, #tpu.memory_space<vmem>>, %arg9: memref<1x1x128xf32, #tpu.memory_space<vmem>>, %arg10: memref<1x1x128xf32, #tpu.memory_space<vmem>>, %arg11: memref<1x128x2048xbf16, #tpu.memory_space<vmem>>, %arg12: memref<1x1x2048xf32, #tpu.memory_space<vmem>>, %arg13: memref<1x2048x128xbf16, #tpu.memory_space<vmem>>, %arg14: memref<1x1x128xf32, #tpu.memory_space<vmem>>, %arg15: memref<1x1x128xf32, #tpu.memory_space<vmem>>, %arg16: memref<1x1x128xf32, #tpu.memory_space<vmem>>, %arg17: memref<1x128xf32, #tpu.memory_space<vmem>>, %arg18: memref<1x1xf32, #tpu.memory_space<vmem>>, %arg19: memref<2x1xf32, #tpu.memory_space<vmem>>, %arg20: memref<16x128xf32, #tpu.memory_space<vmem>>) attributes {dimension_semantics = [#tpu.dimension_semantics<arbitrary>], iteration_bounds = array<i64: 2>, scalar_prefetch = 0 : i64, scratch_operands = 1 : i64, tpu.core_type = #tpu.core_type<tc>, window_params = [{pipeline_mode = #tpu.pipeline_mode<synchronous>, transform_indices = @transform_0, window_bounds = array<i64: 16, 768>}, {pipeline_mode = #tpu.pipeline_mode<synchronous>, transform_indices = @transform_1, window_bounds = array<i64: 16, 16>}, {pipeline_mode = #tpu.pipeline_mode<synchronous>, transform_indices = @transform_2, window_bounds = array<i64: 768, 128>}, {pipeline_mode = #tpu.pipeline_mode<synchronous>, transform_indices = @transform_3, window_bounds = array<i64: 1, 128>}, {transform_indices = @transform_4, window_bounds = array<i64: 1, 128, 384>}, {transform_indices = @transform_5, window_bounds = array<i64: 1, 1, 384>}, {transform_indices = @transform_6, window_bounds = array<i64: 1, 128, 128>}, {transform_indices = @transform_7, window_bounds = array<i64: 1, 1, 128>}, {transform_indices = @transform_8, window_bounds = array<i64: 1, 1, 128>}, {transform_indices = @transform_9, window_bounds = array<i64: 1, 1, 128>}, {transform_indices = @transform_10, window_bounds = array<i64: 1, 128, 2048>}, {transform_indices = @transform_11, window_bounds = array<i64: 1, 1, 2048>}, {transform_indices = @transform_12, window_bounds = array<i64: 1, 2048, 128>}, {transform_indices = @transform_13, window_bounds = array<i64: 1, 1, 128>}, {transform_indices = @transform_14, window_bounds = array<i64: 1, 1, 128>}, {transform_indices = @transform_15, window_bounds = array<i64: 1, 1, 128>}, {pipeline_mode = #tpu.pipeline_mode<synchronous>, transform_indices = @transform_16, window_bounds = array<i64: 1, 128>}, {pipeline_mode = #tpu.pipeline_mode<synchronous>, transform_indices = @transform_17, window_bounds = array<i64: 1, 1>}, {pipeline_mode = #tpu.pipeline_mode<synchronous>, transform_indices = @transform_18, window_bounds = array<i64: 2, 1>}]} {
    %c0_i32 = arith.constant 0 : i32
    %0 = arith.cmpi eq, %arg0, %c0_i32 : i32
    %1 = arith.extui %0 : i1 to i32
    %c0_i32_0 = arith.constant 0 : i32
    %2 = arith.cmpi ne, %1, %c0_i32_0 : i32
    scf.if %2 {
      %c0_81 = arith.constant 0 : index
      %c0_82 = arith.constant 0 : index
      %184 = vector.load %arg1[%c0_81, %c0_82] : memref<16x768xf32, #tpu.memory_space<vmem>>, vector<16x768xf32>
      %185 = arith.truncf %184 : vector<16x768xf32> to vector<16x768xbf16>
      %c0_83 = arith.constant 0 : index
      %c0_84 = arith.constant 0 : index
      %186 = vector.load %arg3[%c0_83, %c0_84] : memref<768x128xbf16, #tpu.memory_space<vmem>>, vector<768x128xbf16>
      %cst_85 = arith.constant dense<0.000000e+00> : vector<16x128xf32>
      %187 = tpu.matmul %185, %186, %cst_85 {dimension_numbers = #tpu.dot_dimension_numbers<[1], [0], [0], [1], [0, 0, 1, 1], [], []>} : vector<16x768xbf16>, vector<768x128xbf16>, vector<16x128xf32> -> vector<16x128xf32>
      %c0_86 = arith.constant 0 : index
      %c0_87 = arith.constant 0 : index
      %188 = vector.load %arg4[%c0_86, %c0_87] : memref<1x128xf32, #tpu.memory_space<vmem>>, vector<1x128xf32>
      %189 = vector.broadcast %188 : vector<1x128xf32> to vector<16x128xf32>
      %190 = arith.addf %187, %189 : vector<16x128xf32>
      %c0_88 = arith.constant 0 : index
      %c0_89 = arith.constant 0 : index
      %191 = vector.load %arg20[%c0_88, %c0_89] : memref<16x128xf32, #tpu.memory_space<vmem>>, vector<16x128xf32>
      tpu.vector_store %arg20[%c0_88, %c0_89], %190 {strides = array<i32>} : memref<16x128xf32, #tpu.memory_space<vmem>>, vector<16x128xf32>,
    } else {
    }
    %c0 = arith.constant 0 : index
    %c0_1 = arith.constant 0 : index
    %3 = vector.load %arg20[%c0, %c0_1] : memref<16x128xf32, #tpu.memory_space<vmem>>, vector<16x128xf32>
    %c0_2 = arith.constant 0 : index
    %c0_3 = arith.constant 0 : index
    %4 = vector.load %arg2[%c0_2, %c0_3] : memref<16x16xf32, #tpu.memory_space<vmem>>, vector<16x16xf32>
    %5 = arith.truncf %3 : vector<16x128xf32> to vector<16x128xbf16>
    %c0_4 = arith.constant 0 : index
    %c0_5 = arith.constant 0 : index
    %c0_6 = arith.constant 0 : index
    %6 = vector.load %arg5[%c0_4, %c0_5, %c0_6] : memref<1x128x384xbf16, #tpu.memory_space<vmem>>, vector<1x128x384xbf16>
    %7 = vector.shape_cast %6 : vector<1x128x384xbf16> to vector<128x384xbf16>
    %cst = arith.constant dense<0.000000e+00> : vector<16x384xf32>
    %8 = tpu.matmul %5, %7, %cst {dimension_numbers = #tpu.dot_dimension_numbers<[1], [0], [0], [1], [0, 0, 1, 1], [], []>} : vector<16x128xbf16>, vector<128x384xbf16>, vector<16x384xf32> -> vector<16x384xf32>
    %c0_7 = arith.constant 0 : index
    %c0_8 = arith.constant 0 : index
    %c0_9 = arith.constant 0 : index
    %9 = vector.load %arg6[%c0_7, %c0_8, %c0_9] : memref<1x1x384xf32, #tpu.memory_space<vmem>>, vector<1x1x384xf32>
    %10 = vector.shape_cast %9 : vector<1x1x384xf32> to vector<1x384xf32>
    %11 = vector.broadcast %10 : vector<1x384xf32> to vector<16x384xf32>
    %12 = arith.addf %8, %11 : vector<16x384xf32>
    %c0_10 = arith.constant 0 : index
    %c0_11 = arith.constant 0 : index
    %c0_12 = arith.constant 0 : index
    %13 = vector.load %arg7[%c0_10, %c0_11, %c0_12] : memref<1x128x128xbf16, #tpu.memory_space<vmem>>, vector<1x128x128xbf16>
    %14 = vector.shape_cast %13 : vector<1x128x128xbf16> to vector<128x128xbf16>
    %cst_13 = arith.constant 0.000000e+00 : f32
    %15 = vector.broadcast %cst_13 : f32 to vector<16x128xf32>
    %16 = vector.extract_strided_slice %12 {offsets = [0, 0], sizes = [16, 32], strides = [1, 1]} : vector<16x384xf32> to vector<16x32xf32>
    %cst_14 = arith.constant 0.176776692 : f32
    %17 = vector.broadcast %cst_14 : f32 to vector<16x32xf32>
    %18 = arith.mulf %16, %17 : vector<16x32xf32>
    %19 = vector.extract_strided_slice %12 {offsets = [0, 128], sizes = [16, 32], strides = [1, 1]} : vector<16x384xf32> to vector<16x32xf32>
    %20 = vector.extract_strided_slice %12 {offsets = [0, 256], sizes = [16, 32], strides = [1, 1]} : vector<16x384xf32> to vector<16x32xf32>
    %cst_15 = arith.constant dense<0.000000e+00> : vector<16x16xf32>
    %21 = tpu.matmul %18, %19, %cst_15 {dimension_numbers = #tpu.dot_dimension_numbers<[1], [1], [0], [0], [0, 0, 1, 0], [], []>} : vector<16x32xf32>, vector<16x32xf32>, vector<16x16xf32> -> vector<16x16xf32>
    %22 = arith.addf %21, %4 : vector<16x16xf32>
    %cst_16 = arith.constant dense<0xFF800000> : vector<16xf32>
    %23 = vector.multi_reduction <maximumf>, %22, %cst_16 [1] : vector<16x16xf32> to vector<16xf32>
    %24 = vector.shape_cast %23 : vector<16xf32> to vector<16x1xf32>
    %25 = vector.broadcast %24 : vector<16x1xf32> to vector<16x16xf32>
    %26 = arith.subf %22, %25 : vector<16x16xf32>
    %27 = math.exp %26 : vector<16x16xf32>
    %cst_17 = arith.constant dense<0.000000e+00> : vector<16xf32>
    %28 = vector.multi_reduction <add>, %27, %cst_17 [1] : vector<16x16xf32> to vector<16xf32>
    %29 = vector.shape_cast %28 : vector<16xf32> to vector<16x1xf32>
    %30 = tpu.reciprocal %29 {approx = true} : vector<16x1xf32> -> vector<16x1xf32>
    %31 = vector.broadcast %30 : vector<16x1xf32> to vector<16x16xf32>
    %32 = arith.mulf %27, %31 : vector<16x16xf32>
    %cst_18 = arith.constant dense<0.000000e+00> : vector<16x32xf32>
    %33 = tpu.matmul %32, %20, %cst_18 {dimension_numbers = #tpu.dot_dimension_numbers<[1], [0], [0], [1], [0, 0, 1, 1], [], []>} : vector<16x16xf32>, vector<16x32xf32>, vector<16x32xf32> -> vector<16x32xf32>
    %34 = arith.truncf %33 : vector<16x32xf32> to vector<16x32xbf16>
    %35 = vector.extract_strided_slice %14 {offsets = [0, 0], sizes = [32, 128], strides = [1, 1]} : vector<128x128xbf16> to vector<32x128xbf16>
    %cst_19 = arith.constant dense<0.000000e+00> : vector<16x128xf32>
    %36 = tpu.matmul %34, %35, %cst_19 {dimension_numbers = #tpu.dot_dimension_numbers<[1], [0], [0], [1], [0, 0, 1, 1], [], []>} : vector<16x32xbf16>, vector<32x128xbf16>, vector<16x128xf32> -> vector<16x128xf32>
    %37 = arith.addf %15, %36 : vector<16x128xf32>
    %38 = vector.extract_strided_slice %12 {offsets = [0, 32], sizes = [16, 32], strides = [1, 1]} : vector<16x384xf32> to vector<16x32xf32>
    %cst_20 = arith.constant 0.176776692 : f32
    %39 = vector.broadcast %cst_20 : f32 to vector<16x32xf32>
    %40 = arith.mulf %38, %39 : vector<16x32xf32>
    %41 = vector.extract_strided_slice %12 {offsets = [0, 160], sizes = [16, 32], strides = [1, 1]} : vector<16x384xf32> to vector<16x32xf32>
    %42 = vector.extract_strided_slice %12 {offsets = [0, 288], sizes = [16, 32], strides = [1, 1]} : vector<16x384xf32> to vector<16x32xf32>
    %cst_21 = arith.constant dense<0.000000e+00> : vector<16x16xf32>
    %43 = tpu.matmul %40, %41, %cst_21 {dimension_numbers = #tpu.dot_dimension_numbers<[1], [1], [0], [0], [0, 0, 1, 0], [], []>} : vector<16x32xf32>, vector<16x32xf32>, vector<16x16xf32> -> vector<16x16xf32>
    %44 = arith.addf %43, %4 : vector<16x16xf32>
    %cst_22 = arith.constant dense<0xFF800000> : vector<16xf32>
    %45 = vector.multi_reduction <maximumf>, %44, %cst_22 [1] : vector<16x16xf32> to vector<16xf32>
    %46 = vector.shape_cast %45 : vector<16xf32> to vector<16x1xf32>
    %47 = vector.broadcast %46 : vector<16x1xf32> to vector<16x16xf32>
    %48 = arith.subf %44, %47 : vector<16x16xf32>
    %49 = math.exp %48 : vector<16x16xf32>
    %cst_23 = arith.constant dense<0.000000e+00> : vector<16xf32>
    %50 = vector.multi_reduction <add>, %49, %cst_23 [1] : vector<16x16xf32> to vector<16xf32>
    %51 = vector.shape_cast %50 : vector<16xf32> to vector<16x1xf32>
    %52 = tpu.reciprocal %51 {approx = true} : vector<16x1xf32> -> vector<16x1xf32>
    %53 = vector.broadcast %52 : vector<16x1xf32> to vector<16x16xf32>
    %54 = arith.mulf %49, %53 : vector<16x16xf32>
    %cst_24 = arith.constant dense<0.000000e+00> : vector<16x32xf32>
    %55 = tpu.matmul %54, %42, %cst_24 {dimension_numbers = #tpu.dot_dimension_numbers<[1], [0], [0], [1], [0, 0, 1, 1], [], []>} : vector<16x16xf32>, vector<16x32xf32>, vector<16x32xf32> -> vector<16x32xf32>
    %56 = arith.truncf %55 : vector<16x32xf32> to vector<16x32xbf16>
    %57 = vector.extract_strided_slice %14 {offsets = [32, 0], sizes = [32, 128], strides = [1, 1]} : vector<128x128xbf16> to vector<32x128xbf16>
    %cst_25 = arith.constant dense<0.000000e+00> : vector<16x128xf32>
    %58 = tpu.matmul %56, %57, %cst_25 {dimension_numbers = #tpu.dot_dimension_numbers<[1], [0], [0], [1], [0, 0, 1, 1], [], []>} : vector<16x32xbf16>, vector<32x128xbf16>, vector<16x128xf32> -> vector<16x128xf32>
    %59 = arith.addf %37, %58 : vector<16x128xf32>
    %60 = vector.extract_strided_slice %12 {offsets = [0, 64], sizes = [16, 32], strides = [1, 1]} : vector<16x384xf32> to vector<16x32xf32>
    %cst_26 = arith.constant 0.176776692 : f32
    %61 = vector.broadcast %cst_26 : f32 to vector<16x32xf32>
    %62 = arith.mulf %60, %61 : vector<16x32xf32>
    %63 = vector.extract_strided_slice %12 {offsets = [0, 192], sizes = [16, 32], strides = [1, 1]} : vector<16x384xf32> to vector<16x32xf32>
    %64 = vector.extract_strided_slice %12 {offsets = [0, 320], sizes = [16, 32], strides = [1, 1]} : vector<16x384xf32> to vector<16x32xf32>
    %cst_27 = arith.constant dense<0.000000e+00> : vector<16x16xf32>
    %65 = tpu.matmul %62, %63, %cst_27 {dimension_numbers = #tpu.dot_dimension_numbers<[1], [1], [0], [0], [0, 0, 1, 0], [], []>} : vector<16x32xf32>, vector<16x32xf32>, vector<16x16xf32> -> vector<16x16xf32>
    %66 = arith.addf %65, %4 : vector<16x16xf32>
    %cst_28 = arith.constant dense<0xFF800000> : vector<16xf32>
    %67 = vector.multi_reduction <maximumf>, %66, %cst_28 [1] : vector<16x16xf32> to vector<16xf32>
    %68 = vector.shape_cast %67 : vector<16xf32> to vector<16x1xf32>
    %69 = vector.broadcast %68 : vector<16x1xf32> to vector<16x16xf32>
    %70 = arith.subf %66, %69 : vector<16x16xf32>
    %71 = math.exp %70 : vector<16x16xf32>
    %cst_29 = arith.constant dense<0.000000e+00> : vector<16xf32>
    %72 = vector.multi_reduction <add>, %71, %cst_29 [1] : vector<16x16xf32> to vector<16xf32>
    %73 = vector.shape_cast %72 : vector<16xf32> to vector<16x1xf32>
    %74 = tpu.reciprocal %73 {approx = true} : vector<16x1xf32> -> vector<16x1xf32>
    %75 = vector.broadcast %74 : vector<16x1xf32> to vector<16x16xf32>
    %76 = arith.mulf %71, %75 : vector<16x16xf32>
    %cst_30 = arith.constant dense<0.000000e+00> : vector<16x32xf32>
    %77 = tpu.matmul %76, %64, %cst_30 {dimension_numbers = #tpu.dot_dimension_numbers<[1], [0], [0], [1], [0, 0, 1, 1], [], []>} : vector<16x16xf32>, vector<16x32xf32>, vector<16x32xf32> -> vector<16x32xf32>
    %78 = arith.truncf %77 : vector<16x32xf32> to vector<16x32xbf16>
    %79 = vector.extract_strided_slice %14 {offsets = [64, 0], sizes = [32, 128], strides = [1, 1]} : vector<128x128xbf16> to vector<32x128xbf16>
    %cst_31 = arith.constant dense<0.000000e+00> : vector<16x128xf32>
    %80 = tpu.matmul %78, %79, %cst_31 {dimension_numbers = #tpu.dot_dimension_numbers<[1], [0], [0], [1], [0, 0, 1, 1], [], []>} : vector<16x32xbf16>, vector<32x128xbf16>, vector<16x128xf32> -> vector<16x128xf32>
    %81 = arith.addf %59, %80 : vector<16x128xf32>
    %82 = vector.extract_strided_slice %12 {offsets = [0, 96], sizes = [16, 32], strides = [1, 1]} : vector<16x384xf32> to vector<16x32xf32>
    %cst_32 = arith.constant 0.176776692 : f32
    %83 = vector.broadcast %cst_32 : f32 to vector<16x32xf32>
    %84 = arith.mulf %82, %83 : vector<16x32xf32>
    %85 = vector.extract_strided_slice %12 {offsets = [0, 224], sizes = [16, 32], strides = [1, 1]} : vector<16x384xf32> to vector<16x32xf32>
    %86 = vector.extract_strided_slice %12 {offsets = [0, 352], sizes = [16, 32], strides = [1, 1]} : vector<16x384xf32> to vector<16x32xf32>
    %cst_33 = arith.constant dense<0.000000e+00> : vector<16x16xf32>
    %87 = tpu.matmul %84, %85, %cst_33 {dimension_numbers = #tpu.dot_dimension_numbers<[1], [1], [0], [0], [0, 0, 1, 0], [], []>} : vector<16x32xf32>, vector<16x32xf32>, vector<16x16xf32> -> vector<16x16xf32>
    %88 = arith.addf %87, %4 : vector<16x16xf32>
    %cst_34 = arith.constant dense<0xFF800000> : vector<16xf32>
    %89 = vector.multi_reduction <maximumf>, %88, %cst_34 [1] : vector<16x16xf32> to vector<16xf32>
    %90 = vector.shape_cast %89 : vector<16xf32> to vector<16x1xf32>
    %91 = vector.broadcast %90 : vector<16x1xf32> to vector<16x16xf32>
    %92 = arith.subf %88, %91 : vector<16x16xf32>
    %93 = math.exp %92 : vector<16x16xf32>
    %cst_35 = arith.constant dense<0.000000e+00> : vector<16xf32>
    %94 = vector.multi_reduction <add>, %93, %cst_35 [1] : vector<16x16xf32> to vector<16xf32>
    %95 = vector.shape_cast %94 : vector<16xf32> to vector<16x1xf32>
    %96 = tpu.reciprocal %95 {approx = true} : vector<16x1xf32> -> vector<16x1xf32>
    %97 = vector.broadcast %96 : vector<16x1xf32> to vector<16x16xf32>
    %98 = arith.mulf %93, %97 : vector<16x16xf32>
    %cst_36 = arith.constant dense<0.000000e+00> : vector<16x32xf32>
    %99 = tpu.matmul %98, %86, %cst_36 {dimension_numbers = #tpu.dot_dimension_numbers<[1], [0], [0], [1], [0, 0, 1, 1], [], []>} : vector<16x16xf32>, vector<16x32xf32>, vector<16x32xf32> -> vector<16x32xf32>
    %100 = arith.truncf %99 : vector<16x32xf32> to vector<16x32xbf16>
    %101 = vector.extract_strided_slice %14 {offsets = [96, 0], sizes = [32, 128], strides = [1, 1]} : vector<128x128xbf16> to vector<32x128xbf16>
    %cst_37 = arith.constant dense<0.000000e+00> : vector<16x128xf32>
    %102 = tpu.matmul %100, %101, %cst_37 {dimension_numbers = #tpu.dot_dimension_numbers<[1], [0], [0], [1], [0, 0, 1, 1], [], []>} : vector<16x32xbf16>, vector<32x128xbf16>, vector<16x128xf32> -> vector<16x128xf32>
    %103 = arith.addf %81, %102 : vector<16x128xf32>
    %c0_38 = arith.constant 0 : index
    %c0_39 = arith.constant 0 : index
    %c0_40 = arith.constant 0 : index
    %104 = vector.load %arg8[%c0_38, %c0_39, %c0_40] : memref<1x1x128xf32, #tpu.memory_space<vmem>>, vector<1x1x128xf32>
    %105 = vector.shape_cast %104 : vector<1x1x128xf32> to vector<1x128xf32>
    %106 = vector.broadcast %105 : vector<1x128xf32> to vector<16x128xf32>
    %107 = arith.addf %103, %106 : vector<16x128xf32>
    %108 = arith.addf %3, %107 : vector<16x128xf32>
    %c0_41 = arith.constant 0 : index
    %c0_42 = arith.constant 0 : index
    %c0_43 = arith.constant 0 : index
    %109 = vector.load %arg9[%c0_41, %c0_42, %c0_43] : memref<1x1x128xf32, #tpu.memory_space<vmem>>, vector<1x1x128xf32>
    %110 = vector.shape_cast %109 : vector<1x1x128xf32> to vector<1x128xf32>
    %c0_44 = arith.constant 0 : index
    %c0_45 = arith.constant 0 : index
    %c0_46 = arith.constant 0 : index
    %111 = vector.load %arg10[%c0_44, %c0_45, %c0_46] : memref<1x1x128xf32, #tpu.memory_space<vmem>>, vector<1x1x128xf32>
    %112 = vector.shape_cast %111 : vector<1x1x128xf32> to vector<1x128xf32>
    %cst_47 = arith.constant dense<0.000000e+00> : vector<16xf32>
    %113 = vector.multi_reduction <add>, %108, %cst_47 [1] : vector<16x128xf32> to vector<16xf32>
    %114 = vector.shape_cast %113 : vector<16xf32> to vector<16x1xf32>
    %cst_48 = arith.constant 1.280000e+02 : f32
    %115 = vector.broadcast %cst_48 : f32 to vector<16x1xf32>
    %116 = arith.divf %114, %115 : vector<16x1xf32>
    %117 = vector.broadcast %116 : vector<16x1xf32> to vector<16x128xf32>
    %118 = arith.subf %108, %117 : vector<16x128xf32>
    %119 = arith.mulf %118, %118 : vector<16x128xf32>
    %cst_49 = arith.constant dense<0.000000e+00> : vector<16xf32>
    %120 = vector.multi_reduction <add>, %119, %cst_49 [1] : vector<16x128xf32> to vector<16xf32>
    %121 = vector.shape_cast %120 : vector<16xf32> to vector<16x1xf32>
    %cst_50 = arith.constant 1.280000e+02 : f32
    %122 = vector.broadcast %cst_50 : f32 to vector<16x1xf32>
    %123 = arith.divf %121, %122 : vector<16x1xf32>
    %124 = vector.broadcast %116 : vector<16x1xf32> to vector<16x128xf32>
    %125 = arith.subf %108, %124 : vector<16x128xf32>
    %cst_51 = arith.constant 9.99999974E-6 : f32
    %126 = vector.broadcast %cst_51 : f32 to vector<16x1xf32>
    %127 = arith.addf %123, %126 : vector<16x1xf32>
    %128 = math.rsqrt %127 : vector<16x1xf32>
    %129 = vector.broadcast %128 : vector<16x1xf32> to vector<16x128xf32>
    %130 = arith.mulf %125, %129 : vector<16x128xf32>
    %131 = vector.broadcast %110 : vector<1x128xf32> to vector<16x128xf32>
    %132 = arith.mulf %130, %131 : vector<16x128xf32>
    %133 = vector.broadcast %112 : vector<1x128xf32> to vector<16x128xf32>
    %134 = arith.addf %132, %133 : vector<16x128xf32>
    %135 = arith.truncf %134 : vector<16x128xf32> to vector<16x128xbf16>
    %c0_52 = arith.constant 0 : index
    %c0_53 = arith.constant 0 : index
    %c0_54 = arith.constant 0 : index
    %136 = vector.load %arg11[%c0_52, %c0_53, %c0_54] : memref<1x128x2048xbf16, #tpu.memory_space<vmem>>, vector<1x128x2048xbf16>
    %137 = vector.shape_cast %136 : vector<1x128x2048xbf16> to vector<128x2048xbf16>
    %cst_55 = arith.constant dense<0.000000e+00> : vector<16x2048xf32>
    %138 = tpu.matmul %135, %137, %cst_55 {dimension_numbers = #tpu.dot_dimension_numbers<[1], [0], [0], [1], [0, 0, 1, 1], [], []>} : vector<16x128xbf16>, vector<128x2048xbf16>, vector<16x2048xf32> -> vector<16x2048xf32>
    %c0_56 = arith.constant 0 : index
    %c0_57 = arith.constant 0 : index
    %c0_58 = arith.constant 0 : index
    %139 = vector.load %arg12[%c0_56, %c0_57, %c0_58] : memref<1x1x2048xf32, #tpu.memory_space<vmem>>, vector<1x1x2048xf32>
    %140 = vector.shape_cast %139 : vector<1x1x2048xf32> to vector<1x2048xf32>
    %141 = vector.broadcast %140 : vector<1x2048xf32> to vector<16x2048xf32>
    %142 = arith.addf %138, %141 : vector<16x2048xf32>
    %cst_59 = arith.constant 0.000000e+00 : f32
    %143 = vector.broadcast %cst_59 : f32 to vector<16x2048xf32>
    %144 = arith.maximumf %142, %143 : vector<16x2048xf32>
    %145 = arith.truncf %144 : vector<16x2048xf32> to vector<16x2048xbf16>
    %c0_60 = arith.constant 0 : index
    %c0_61 = arith.constant 0 : index
    %c0_62 = arith.constant 0 : index
    %146 = vector.load %arg13[%c0_60, %c0_61, %c0_62] : memref<1x2048x128xbf16, #tpu.memory_space<vmem>>, vector<1x2048x128xbf16>
    %147 = vector.shape_cast %146 : vector<1x2048x128xbf16> to vector<2048x128xbf16>
    %cst_63 = arith.constant dense<0.000000e+00> : vector<16x128xf32>
    %148 = tpu.matmul %145, %147, %cst_63 {dimension_numbers = #tpu.dot_dimension_numbers<[1], [0], [0], [1], [0, 0, 1, 1], [], []>} : vector<16x2048xbf16>, vector<2048x128xbf16>, vector<16x128xf32> -> vector<16x128xf32>
    %c0_64 = arith.constant 0 : index
    %c0_65 = arith.constant 0 : index
    %c0_66 = arith.constant 0 : index
    %149 = vector.load %arg14[%c0_64, %c0_65, %c0_66] : memref<1x1x128xf32, #tpu.memory_space<vmem>>, vector<1x1x128xf32>
    %150 = vector.shape_cast %149 : vector<1x1x128xf32> to vector<1x128xf32>
    %151 = vector.broadcast %150 : vector<1x128xf32> to vector<16x128xf32>
    %152 = arith.addf %148, %151 : vector<16x128xf32>
    %153 = arith.addf %134, %152 : vector<16x128xf32>
    %c0_67 = arith.constant 0 : index
    %c0_68 = arith.constant 0 : index
    %c0_69 = arith.constant 0 : index
    %154 = vector.load %arg15[%c0_67, %c0_68, %c0_69] : memref<1x1x128xf32, #tpu.memory_space<vmem>>, vector<1x1x128xf32>
    %155 = vector.shape_cast %154 : vector<1x1x128xf32> to vector<1x128xf32>
    %c0_70 = arith.constant 0 : index
    %c0_71 = arith.constant 0 : index
    %c0_72 = arith.constant 0 : index
    %156 = vector.load %arg16[%c0_70, %c0_71, %c0_72] : memref<1x1x128xf32, #tpu.memory_space<vmem>>, vector<1x1x128xf32>
    %157 = vector.shape_cast %156 : vector<1x1x128xf32> to vector<1x128xf32>
    %cst_73 = arith.constant dense<0.000000e+00> : vector<16xf32>
    %158 = vector.multi_reduction <add>, %153, %cst_73 [1] : vector<16x128xf32> to vector<16xf32>
    %159 = vector.shape_cast %158 : vector<16xf32> to vector<16x1xf32>
    %cst_74 = arith.constant 1.280000e+02 : f32
    %160 = vector.broadcast %cst_74 : f32 to vector<16x1xf32>
    %161 = arith.divf %159, %160 : vector<16x1xf32>
    %162 = vector.broadcast %161 : vector<16x1xf32> to vector<16x128xf32>
    %163 = arith.subf %153, %162 : vector<16x128xf32>
    %164 = arith.mulf %163, %163 : vector<16x128xf32>
    %cst_75 = arith.constant dense<0.000000e+00> : vector<16xf32>
    %165 = vector.multi_reduction <add>, %164, %cst_75 [1] : vector<16x128xf32> to vector<16xf32>
    %166 = vector.shape_cast %165 : vector<16xf32> to vector<16x1xf32>
    %cst_76 = arith.constant 1.280000e+02 : f32
    %167 = vector.broadcast %cst_76 : f32 to vector<16x1xf32>
    %168 = arith.divf %166, %167 : vector<16x1xf32>
    %169 = vector.broadcast %161 : vector<16x1xf32> to vector<16x128xf32>
    %170 = arith.subf %153, %169 : vector<16x128xf32>
    %cst_77 = arith.constant 9.99999974E-6 : f32
    %171 = vector.broadcast %cst_77 : f32 to vector<16x1xf32>
    %172 = arith.addf %168, %171 : vector<16x1xf32>
    %173 = math.rsqrt %172 : vector<16x1xf32>
    %174 = vector.broadcast %173 : vector<16x1xf32> to vector<16x128xf32>
    %175 = arith.mulf %170, %174 : vector<16x128xf32>
    %176 = vector.broadcast %155 : vector<1x128xf32> to vector<16x128xf32>
    %177 = arith.mulf %175, %176 : vector<16x128xf32>
    %178 = vector.broadcast %157 : vector<1x128xf32> to vector<16x128xf32>
    %179 = arith.addf %177, %178 : vector<16x128xf32>
    %c0_78 = arith.constant 0 : index
    %c0_79 = arith.constant 0 : index
    %180 = vector.load %arg20[%c0_78, %c0_79] : memref<16x128xf32, #tpu.memory_space<vmem>>, vector<16x128xf32>
    tpu.vector_store %arg20[%c0_78, %c0_79], %179 {strides = array<i32>} : memref<16x128xf32, #tpu.memory_space<vmem>>, vector<16x128xf32>,
    %c1_i32 = arith.constant 1 : i32
    %181 = arith.cmpi eq, %arg0, %c1_i32 : i32
    %182 = arith.extui %181 : i1 to i32
    %c0_i32_80 = arith.constant 0 : i32
    %183 = arith.cmpi ne, %182, %c0_i32_80 : i32
    scf.if %183 {
      %184 = vector.extract_strided_slice %179 {offsets = [0, 0], sizes = [8, 128], strides = [1, 1]} : vector<16x128xf32> to vector<8x128xf32>
      %cst_81 = arith.constant dense<0.000000e+00> : vector<128xf32>
      %185 = vector.multi_reduction <add>, %184, %cst_81 [0] : vector<8x128xf32> to vector<128xf32>
      %186 = vector.shape_cast %185 : vector<128xf32> to vector<1x128xf32>
      %cst_82 = arith.constant 8.000000e+00 : f32
      %187 = vector.broadcast %cst_82 : f32 to vector<1x128xf32>
      %188 = arith.divf %186, %187 : vector<1x128xf32>
      %189 = vector.extract_strided_slice %179 {offsets = [8, 0], sizes = [8, 128], strides = [1, 1]} : vector<16x128xf32> to vector<8x128xf32>
      %cst_83 = arith.constant dense<0.000000e+00> : vector<128xf32>
      %190 = vector.multi_reduction <add>, %189, %cst_83 [0] : vector<8x128xf32> to vector<128xf32>
      %191 = vector.shape_cast %190 : vector<128xf32> to vector<1x128xf32>
      %cst_84 = arith.constant 8.000000e+00 : f32
      %192 = vector.broadcast %cst_84 : f32 to vector<1x128xf32>
      %193 = arith.divf %191, %192 : vector<1x128xf32>
      %194 = tpu.concatenate %188, %193 in 0 : vector<1x128xf32>, vector<1x128xf32> -> vector<2x128xf32>
      %c0_85 = arith.constant 0 : index
      %c0_86 = arith.constant 0 : index
      %195 = vector.load %arg17[%c0_85, %c0_86] : memref<1x128xf32, #tpu.memory_space<vmem>>, vector<1x128xf32>
      %196 = vector.broadcast %195 : vector<1x128xf32> to vector<2x128xf32>
      %197 = arith.mulf %194, %196 : vector<2x128xf32>
      %cst_87 = arith.constant dense<0.000000e+00> : vector<2xf32>
      %198 = vector.multi_reduction <add>, %197, %cst_87 [1] : vector<2x128xf32> to vector<2xf32>
      %199 = vector.shape_cast %198 : vector<2xf32> to vector<2x1xf32>
      %c0_88 = arith.constant 0 : index
      %c0_89 = arith.constant 0 : index
      %200 = vector.load %arg18[%c0_88, %c0_89] : memref<1x1xf32, #tpu.memory_space<vmem>>, vector<1x1xf32>
      %201 = vector.broadcast %200 : vector<1x1xf32> to vector<2x1xf32>
      %202 = arith.addf %199, %201 : vector<2x1xf32>
      %c0_90 = arith.constant 0 : index
      %c0_91 = arith.constant 0 : index
      %203 = vector.load %arg19[%c0_90, %c0_91] : memref<2x1xf32, #tpu.memory_space<vmem>>, vector<2x1xf32>
      tpu.vector_store %arg19[%c0_90, %c0_91], %202 {strides = array<i32>} : memref<2x1xf32, #tpu.memory_space<vmem>>, vector<2x1xf32>,
    } else {
    }
    return
  }
  func.func @transform_0(%arg0: i32) -> (i32, i32) {
    %c0_i32 = arith.constant 0 : i32
    %c0_i32_0 = arith.constant 0 : i32
    %c0_i32_1 = arith.constant 0 : i32
    return %c0_i32, %c0_i32_0 : i32, i32
  }
  func.func @transform_1(%arg0: i32) -> (i32, i32) {
    %c0_i32 = arith.constant 0 : i32
    %c0_i32_0 = arith.constant 0 : i32
    %c0_i32_1 = arith.constant 0 : i32
    return %c0_i32, %c0_i32_0 : i32, i32
  }
  func.func @transform_2(%arg0: i32) -> (i32, i32) {
    %c0_i32 = arith.constant 0 : i32
    %c0_i32_0 = arith.constant 0 : i32
    %c0_i32_1 = arith.constant 0 : i32
    return %c0_i32, %c0_i32_0 : i32, i32
  }
  func.func @transform_3(%arg0: i32) -> (i32, i32) {
    %c0_i32 = arith.constant 0 : i32
    %c0_i32_0 = arith.constant 0 : i32
    %c0_i32_1 = arith.constant 0 : i32
    return %c0_i32, %c0_i32_0 : i32, i32
  }
  func.func @transform_4(%arg0: i32) -> (i32, i32, i32) {
    %c0_i32 = arith.constant 0 : i32
    %c0_i32_0 = arith.constant 0 : i32
    %c0_i32_1 = arith.constant 0 : i32
    return %arg0, %c0_i32, %c0_i32_0 : i32, i32, i32
  }
  func.func @transform_5(%arg0: i32) -> (i32, i32, i32) {
    %c0_i32 = arith.constant 0 : i32
    %c0_i32_0 = arith.constant 0 : i32
    %c0_i32_1 = arith.constant 0 : i32
    return %arg0, %c0_i32, %c0_i32_0 : i32, i32, i32
  }
  func.func @transform_6(%arg0: i32) -> (i32, i32, i32) {
    %c0_i32 = arith.constant 0 : i32
    %c0_i32_0 = arith.constant 0 : i32
    %c0_i32_1 = arith.constant 0 : i32
    return %arg0, %c0_i32, %c0_i32_0 : i32, i32, i32
  }
  func.func @transform_7(%arg0: i32) -> (i32, i32, i32) {
    %c0_i32 = arith.constant 0 : i32
    %c0_i32_0 = arith.constant 0 : i32
    %c0_i32_1 = arith.constant 0 : i32
    return %arg0, %c0_i32, %c0_i32_0 : i32, i32, i32
  }
  func.func @transform_8(%arg0: i32) -> (i32, i32, i32) {
    %c0_i32 = arith.constant 0 : i32
    %c0_i32_0 = arith.constant 0 : i32
    %c0_i32_1 = arith.constant 0 : i32
    return %arg0, %c0_i32, %c0_i32_0 : i32, i32, i32
  }
  func.func @transform_9(%arg0: i32) -> (i32, i32, i32) {
    %c0_i32 = arith.constant 0 : i32
    %c0_i32_0 = arith.constant 0 : i32
    %c0_i32_1 = arith.constant 0 : i32
    return %arg0, %c0_i32, %c0_i32_0 : i32, i32, i32
  }
  func.func @transform_10(%arg0: i32) -> (i32, i32, i32) {
    %c0_i32 = arith.constant 0 : i32
    %c0_i32_0 = arith.constant 0 : i32
    %c0_i32_1 = arith.constant 0 : i32
    return %arg0, %c0_i32, %c0_i32_0 : i32, i32, i32
  }
  func.func @transform_11(%arg0: i32) -> (i32, i32, i32) {
    %c0_i32 = arith.constant 0 : i32
    %c0_i32_0 = arith.constant 0 : i32
    %c0_i32_1 = arith.constant 0 : i32
    return %arg0, %c0_i32, %c0_i32_0 : i32, i32, i32
  }
  func.func @transform_12(%arg0: i32) -> (i32, i32, i32) {
    %c0_i32 = arith.constant 0 : i32
    %c0_i32_0 = arith.constant 0 : i32
    %c0_i32_1 = arith.constant 0 : i32
    return %arg0, %c0_i32, %c0_i32_0 : i32, i32, i32
  }
  func.func @transform_13(%arg0: i32) -> (i32, i32, i32) {
    %c0_i32 = arith.constant 0 : i32
    %c0_i32_0 = arith.constant 0 : i32
    %c0_i32_1 = arith.constant 0 : i32
    return %arg0, %c0_i32, %c0_i32_0 : i32, i32, i32
  }
  func.func @transform_14(%arg0: i32) -> (i32, i32, i32) {
    %c0_i32 = arith.constant 0 : i32
    %c0_i32_0 = arith.constant 0 : i32
    %c0_i32_1 = arith.constant 0 : i32
    return %arg0, %c0_i32, %c0_i32_0 : i32, i32, i32
  }
  func.func @transform_15(%arg0: i32) -> (i32, i32, i32) {
    %c0_i32 = arith.constant 0 : i32
    %c0_i32_0 = arith.constant 0 : i32
    %c0_i32_1 = arith.constant 0 : i32
    return %arg0, %c0_i32, %c0_i32_0 : i32, i32, i32
  }
  func.func @transform_16(%arg0: i32) -> (i32, i32) {
    %c0_i32 = arith.constant 0 : i32
    %c0_i32_0 = arith.constant 0 : i32
    %c0_i32_1 = arith.constant 0 : i32
    return %c0_i32, %c0_i32_0 : i32, i32
  }
  func.func @transform_17(%arg0: i32) -> (i32, i32) {
    %c0_i32 = arith.constant 0 : i32
    %c0_i32_0 = arith.constant 0 : i32
    %c0_i32_1 = arith.constant 0 : i32
    return %c0_i32, %c0_i32_0 : i32, i32
  }
  func.func @transform_18(%arg0: i32) -> (i32, i32) {
    %c0_i32 = arith.constant 0 : i32
    %c0_i32_0 = arith.constant 0 : i32
    %c0_i32_1 = arith.constant 0 : i32
    return %c0_i32, %c0_i32_0 : i32, i32
  }
}

</mosaic_0001>

<bundles_post_ra>
// kernel: _lambda_.1
= control target key start
LH: loop header
LB: loop body
LE: loop exit
PB: predicated region body
PF: predicated region fallthrough
CT: control target
= control target key end

     0   :  { %s7849_s0 = inlined_call_operand.vmem [shape: f32[16,768], index: 0, kind: input, shape index: {}]   ;;  %s7850_s1 = inlined_call_operand.vmem [shape: f32[16,16], index: 1, kind: input, shape index: {}]   ;;  %s7851_s2 = inlined_call_operand.vmem [shape: bf16[768,128], index: 2, kind: input, shape index: {}]   ;;  %s7852_s3 = inlined_call_operand.vmem [shape: f32[1,128], index: 3, kind: input, shape index: {}]   ;;  %s7853_s4 = inlined_call_operand.vmem [shape: bf16[2,128,384], index: 4, kind: input, shape index: {}]   ;;  %s7854_s5 = inlined_call_operand.vmem [shape: f32[2,1,384], index: 5, kind: input, shape index: {}]   ;;  %s7855_s6 = inlined_call_operand.hbm [shape: bf16[2,128,128], index: 6, kind: input, shape index: {}]   ;;  %s7856_s7 = inlined_call_operand.vmem [shape: f32[2,1,128], index: 7, kind: input, shape index: {}]   ;;  %s7857_s8 = inlined_call_operand.vmem [shape: f32[2,1,128], index: 8, kind: input, shape index: {}]   ;;  %s7858_s9 = inlined_call_operand.vmem [shape: f32[2,1,128], index: 9, kind: input, shape index: {}]   ;;  %s7859_s10 = inlined_call_operand.hbm [shape: bf16[2,128,2048], index: 10, kind: input, shape index: {}]   ;;  %s7860_s11 = inlined_call_operand.vmem [shape: f32[2,1,2048], index: 11, kind: input, shape index: {}]   ;;  %s7861_s12 = inlined_call_operand.hbm [shape: bf16[2,2048,128], index: 12, kind: input, shape index: {}]   ;;  %s7862_s13 = inlined_call_operand.vmem [shape: f32[2,1,128], index: 13, kind: input, shape index: {}]   ;;  %s7863_s14 = inlined_call_operand.vmem [shape: f32[2,1,128], index: 14, kind: input, shape index: {}]   ;;  %s7864_s15 = inlined_call_operand.vmem [shape: f32[2,1,128], index: 15, kind: input, shape index: {}]   ;;  %s7865_s16 = inlined_call_operand.vmem [shape: f32[1,128], index: 16, kind: input, shape index: {}]   ;;  %s7866_s17 = inlined_call_operand.<no memory space> [shape: f32[1,1], index: 17, kind: input, shape index: {}]   ;;  %s7867_s18 = inlined_call_operand.vmem [shape: f32[2,1], index: 18, kind: output, shape index: {}]  }
   0x1   :  { %7877 = sst [smem:[#allocation14_spill]] %s7849_s0  ;;  %v23_v0 = vstv %s7866_s17 }
   0x2   :  { %7878 = sst [smem:[#allocation15_spill]] %s7850_s1  ;;  %24 = vst [vmem:[#allocation3] sm:$0x1] %v23_v0 }
   0x3   :  { %7879 = sst [smem:[#allocation16_spill]] %s7851_s2 }
   0x4   :  { %7880 = sst [smem:[#allocation17_spill]] %s7852_s3 }
   0x5   :  { %7881 = sst [smem:[#allocation18_spill]] %s7853_s4 }
   0x6   :  { %7882 = sst [smem:[#allocation19_spill]] %s7855_s6 }
   0x7   :  { %7883 = sst [smem:[#allocation20_spill]] %s7859_s10 }
   0x8   :  { %7884 = sst [smem:[#allocation21_spill]] %s7861_s12 }
   0x9   :  { %7885 = sst [smem:[#allocation22_spill]] %s7862_s13 }
   0xa   :  { %7886 = sst [smem:[#allocation23_spill]] %s7863_s14 }
   0xb   :  { %7887 = sst [smem:[#allocation24_spill]] %s7864_s15 }
   0xc   :  { %7888 = sst [smem:[#allocation25_spill]] %s7865_s16 }
   0xd   :  { %7889 = sst [smem:[#allocation26_spill]] %s7867_s18 }
   0xe   :  { %25 = vsyncpa [#allocation5], 0 }
   0xf   :  { %27 = vsyncpa [#allocation5 + $0x1], 0 }
  0x10   :  { %28 = vsyncpa [#allocation7], 0 }
  0x11   :  { %30 = vsyncpa [#allocation7 + $0x1], 0  ;;  %s6801_s29 = smov 0   ;;  %s6803_s30 = smov 0  }
  0x12   :  { %s6805_s0 = smov 0   ;;  %s6807_s19 = smov 0  }
  0x13 LB: > { %7890 = sst [smem:[#allocation11_spill]] %s6689_s0  ;;  %s6820_s17 = sadd.s32 4294967295, %s6693_s19   ;;  %s6693_s19 = sphi %s6807_s19, %s7917_s19   ;;  %s6689_s0 = sphi %s6805_s0, %s7919_s0   ;;  %s6685_s30 = sphi %s6803_s30, %s7921_s30   ;;  %s6681_s29 = sphi %s6801_s29, %s7920_s29  }
  0x14   : > { %s6823_s1 = sadd.s32 1, %s6693_s19   ;;  %s179_s21 = sadd.s32 1, %s6689_s0 }
  0x15   : > { %7891 = sst [smem:[#allocation12_spill]] %s6823_s1  ;;  %s176_s20 = ssub.s32 %s6693_s19, %s6823_s1 }
  0x16   : > { %p177_p0 = scmp.eq.s32.totalorder %s176_s20, 0  ;;  %p186_p1 = scmp.ne.s32.totalorder %s6689_s0, %s6685_s30 }
  0x17   : > { %p187_p2 = scmp.eq.s32.totalorder %s6693_s19, 0  ;;  %p192_p3 = scmp.ne.s32.totalorder %s6685_s30, %s6681_s29 }
  0x18   : > { %s6833_s22 = scalar_select %p177_p0, %s6689_s0, %s179_s21  }
  0x19   : > { %p188_p4 = por %p187_p2, %p186_p1  ;;  %p193_p5 = scmp.eq.s32.totalorder %s6820_s17, 0 }
  0x1a   : > { %7892 = sst [smem:[#allocation13_spill]] %s6833_s22  ;;  %p6456_p6 = scmp.lt.s32.totalorder %s6693_s19, 2 }
  0x1b   : > { %p6837_p7 = por %p193_p5, %p192_p3  ;;  %s6842_s23 = sand.u32 1, %s6689_s0  }
  0x1c   : > { %p6844_p8 = pnand %p6456_p6, %p188_p4  ;;  %s586_s25 = sand.u32 1, %s6693_s19  }
  0x1d   : > { %s7874_s26 = sshll.u32 %s6842_s23, 10  ;;  %s6098_s27 = sshll.u32 %s6693_s19, 10 }
  0x1e   : > { %s7895_s10 = sld [smem:[#allocation20_spill]]  ;;  %s590_s21 = scalar_lea.vmem [#allocation6], %s7874_s26 }
  0x1f   : > { %s598_s22 = sshll.u32 %s590_s21, 4  ;;  %s6856_s1 = scalar_lea.sflag [#allocation7], %s586_s25  ;;  %s599_s22 = int_to_ptr.vmem [resolvable:$true] %s598_s22 }
  0x20   : > { %p6569_p10 = pneg %p6844_p8 }
  0x24   : > { %s595_s20 = scalar_lea.hbm %s7895_s10, %s6098_s27  ;;  %s6572_s26 = scalar_lea.hbm %s7895_s10, 2048 }
  0x25   : > { %s596_s0 = sshll.u32 %s595_s20, 4  ;;  %s597_s0 = int_to_ptr.hbm [resolvable:$true] %s596_s0 }
  0x26   : > { %s6565_s18 = sshra.s32 %s597_s0, 4  ;;  %s6566_s18 = int_to_ptr.hbm [resolvable:$true] %s6565_s18 }
  0x27   : > { %s6567_s16 = scalar_lea.hbm %s6566_s18, 1024  ;;  %p6573_p13 = scmp.lt.s32.totalorder %s6566_s18, %s7895_s10 }
  0x28   : > { %p6568_p9 = scmp.ne.s32.totalorder %s6566_s18, %s6567_s16  ;;  %p6574_p0 = scmp.lt.s32.totalorder %s6572_s26, %s6567_s16 }
  0x2a   : > { %p6570_p11 = pnand %p6569_p10, %p6568_p9  ;;  %p6575_p1 = por %p6574_p0, %p6573_p13 }
  0x2c   : > { %p6571_p12 = pneg %p6570_p11 }
  0x2e   : > { %p6576_p2 = pnand %p6575_p1, %p6571_p12 }
  0x30   : > { %6579 = shalt.err (!%p6576_p2)
}
  0x31   : > { %s6695_s25 = smov 1024   ;;  %s7875_s3 = smov 64  }
  0x32   : > { %6452 = dma.hbm_to_vmem [thread:$0]  (!%p6844_p8), %s597_s0, 16384, %s599_s22, %s6856_s1, %s6695_s25, %s6695_s25, %s7875_s3  }
  0x33   : > { %s7896_s12 = sld [smem:[#allocation21_spill]]  ;;  %s7897_s26 = sshll.u32 %s6842_s23, 10 }
  0x34   : > { %s619_s21 = scalar_lea.vmem [#allocation8], %s7897_s26  ;;  %p4715_p3 = scmp.ge.s32.totalorder %s6693_s19, 1 }
  0x35   : > { %s627_s20 = sshll.u32 %s619_s21, 4  ;;  %p653_p4 = scmp.lt.s32.totalorder %s6693_s19, 3  ;;  %s6880_s20 = int_to_ptr.vmem [resolvable:$true] %s627_s20 }
  0x36   : > { %s4706_s10 = sshll.u32 %s6842_s23, 6  ;;  %s6097_s0 = sshll.u32 %s6693_s19, 6 }
  0x37   : > { %p6885_p5 = pnand %p4715_p3, %p653_p4  ;;  %s550_s22 = scalar_lea.vmem [#allocation4], %s4706_s10 }
  0x38   : > { %s7899_s6 = sld [smem:[#allocation19_spill]]  ;;  %s547_s26 = scalar_lea.sflag [#allocation5], %s6842_s23 }
  0x39   : > { %s624_s18 = scalar_lea.hbm %s7896_s12, %s6098_s27  ;;  %s558_s27 = sshll.u32 %s550_s22, 4  ;;  %s559_s27 = int_to_ptr.vmem [resolvable:$true] %s558_s27 }
  0x3a   : > { %s625_s16 = sshll.u32 %s624_s18, 4  ;;  %s6878_s16 = int_to_ptr.hbm [resolvable:$true] %s625_s16 }
  0x3e   : > { %s555_s29 = scalar_lea.hbm %s7899_s6, %s6097_s0  ;;  %s6602_s10 = scalar_lea.hbm %s7899_s6, 128 }
  0x3f   : > { %s556_s18 = sshll.u32 %s555_s29, 4  ;;  %s557_s18 = int_to_ptr.hbm [resolvable:$true] %s556_s18 }
  0x40   : > { %s6595_s21 = sshra.s32 %s557_s18, 4  ;;  %s6596_s21 = int_to_ptr.hbm [resolvable:$true] %s6595_s21 }
  0x41   : > { %s6597_s3 = scalar_lea.hbm %s6596_s21, 64  ;;  %p6603_p12 = scmp.lt.s32.totalorder %s6596_s21, %s7899_s6 }
  0x42   : > { %p6598_p6 = scmp.ne.s32.totalorder %s6596_s21, %s6597_s3  ;;  %p6604_p13 = scmp.lt.s32.totalorder %s6602_s10, %s6597_s3 }
  0x44   : > { %p6600_p9 = pnand %p6598_p6, %p6569_p10  ;;  %p6605_p0 = por %p6604_p13, %p6603_p12 }
  0x46   : > { %p6601_p11 = pneg %p6600_p9 }
  0x48   : > { %p6606_p1 = pnand %p6605_p0, %p6601_p11 }
  0x4a   : > { %6609 = shalt.err (!%p6606_p1)
}
  0x4b   : > { %s6697_s23 = smov 4   ;;  %s7900_s0 = smov 64  }
  0x4c   : > { %6449 = dma.hbm_to_vmem [thread:$0]  (!%p6844_p8), %s557_s18, 1024, %s559_s27, %s547_s26, %s7900_s0, %s7900_s0, %s6697_s23  }
  0x4d   : > { %s6625_s25 = sshra.s32 %s6878_s16, 4  ;;  %s6632_s28 = scalar_lea.hbm %s7896_s12, 2048  ;;  %s6626_s25 = int_to_ptr.hbm [resolvable:$true] %s6625_s25 }
  0x4e   : > { %s6627_s14 = scalar_lea.hbm %s6626_s25, 1024  ;;  %p6633_p6 = scmp.lt.s32.totalorder %s6626_s25, %s7896_s12 }
  0x4f   : > { %p6628_p2 = scmp.ne.s32.totalorder %s6626_s25, %s6627_s14  ;;  %p6634_p9 = scmp.lt.s32.totalorder %s6632_s28, %s6627_s14 }
  0x51   : > { %p6630_p3 = pnand %p6628_p2, %p6569_p10  ;;  %p6635_p11 = por %p6634_p9, %p6633_p6 }
  0x53   : > { %p6631_p4 = pneg %p6630_p3 }
  0x55   : > { %p6636_p12 = pnand %p6635_p11, %p6631_p4 }
  0x57   : > { %6639 = shalt.err (!%p6636_p12)
}
  0x58   : > { %6455 = dma.hbm_to_vmem [thread:$0]  (!%p6844_p8), %s6878_s16, 16384, %s6880_s20, %s6856_s1, %s7900_s0, %s7900_s0, %s6697_s23  }
  0x59   : > { %657 = sbr.rel (%p6885_p5) target bundleno = 2765 (0xacd), region = 92  ;;  %s659_s27 = sand.u32 (!%p6885_p5), 1, %s6685_s30  }
  0x5a   : > { %s4716_s18 = sshll.u32 (!%p6885_p5), %s659_s27, 6  ;;  %s660_s26 = scalar_lea.sflag (!%p6885_p5), [#allocation5], %s659_s27 }
  0x5b   : > { %s6927_s19 = scalar_lea.vmem (!%p6885_p5), [#allocation4], %s4716_s18 }
  0x5e   : > { %6672 = dma.done.wait (%p6837_p7), %s660_s26, 1024  }
  0x5f   : > { %6674 = vsyncadd (%p6837_p7), %s660_s26, 4294966272  ;;  %s669_s24 = sand.u32 1, %s6820_s17   ;;  %s4717_s10 = sshll.u32 %s659_s27, 10 }
  0x60   : > { %s670_s1 = scalar_lea.sflag [#allocation7], %s669_s24  ;;  %s6934_s16 = scalar_lea.vmem [#allocation6], %s4717_s10 }
  0x61   : > { %6676 = dma.done.wait (%p6837_p7), %s670_s1, 32768  }
  0x62   : > { %6678 = vsyncadd (%p6837_p7), %s670_s1, 4294934528  ;;  %p773_p8 = scmp.lt.s32.totalorder %s6820_s17, 1  ;;  %s7901_s4 = sld [smem:[#allocation18_spill]] }
  0x63   : > { %s7902_s13 = sld [smem:[#allocation22_spill]]  ;;  %p4721_p7 = scmp.ne.s32.totalorder %s6820_s17, 0 }
  0x64   : > { %s6942_s15 = scalar_select %p773_p8, %s6820_s17, 1 }
  0x65   : > { %s7903_s6 = sld [smem:[#allocation23_spill]] }
  0x66   : > { %s6438_s20 = smul.u32 192, %s6942_s15  ;;  %s4720_s22 = sshll.u32 %s6942_s15, 4 }
  0x67   : > { %s6439_s0 = smul.u32 3, %s6942_s15  ;;  %s6972_s25 = scalar_lea.vmem %s7860_s11, %s4720_s22 }
  0x68   : > { %s6957_s29 = scalar_lea.vmem %s7901_s4, %s6438_s20  ;;  %s7904_s12 = sld [smem:[#allocation24_spill]] }
  0x69   : > { %s6966_s1 = scalar_lea.vmem %s7854_s5, %s6439_s0  ;;  %s797_s20 = scalar_lea.vmem %s7902_s13, %s6942_s15 }
  0x6a   : > { %s6986_s0 = scalar_lea.vmem [#allocation8], %s4717_s10  ;;  %808 = sbr.rel (%p4721_p7) target bundleno = 316 (0x13c), region = 108 }
  0x6b   : > { %s800_s21 = scalar_lea.vmem %s7903_s6, %s6942_s15  ;;  %s7905_s22 = sld [smem:[#allocation16_spill]] (!%p4721_p7) }
  0x6c   : > { %s7906_s13 = sld [smem:[#allocation14_spill]] (!%p4721_p7) }
  0x6d   : > { %s7907_s28 = sld [smem:[#allocation17_spill]] (!%p4721_p7) }
  0x6e   : > { %s803_s26 = scalar_lea.vmem %s7904_s12, %s6942_s15 }
  0x71   : > { %v6107_v1 = vld [vmem:[%s7905_s22 + $0x38] sm:$0xff]  ;;  %v6106_v5 = vld [vmem:[%s7905_s22 + $0x30] sm:$0xff]  ;;  %v6105_v9 = vld [vmem:[%s7905_s22 + $0x28] sm:$0xff] }
  0x72   : > { %v6115_v2 = vld [vmem:[%s7905_s22 + $0x78] sm:$0xff]  ;;  %1215 = vmatpush.bf16.msra.mxu0 %v6107_v1  ;;  %v6114_v6 = vld [vmem:[%s7905_s22 + $0x70] sm:$0xff]  ;;  %v6113_v10 = vld [vmem:[%s7905_s22 + $0x68] sm:$0xff] }
  0x73   : > { %v6123_v3 = vld [vmem:[%s7905_s22 + $0xb8] sm:$0xff]  ;;  %1229 = vmatpush.bf16.msra.mxu1 %v6115_v2  ;;  %v6122_v7 = vld [vmem:[%s7905_s22 + $0xb0] sm:$0xff]  ;;  %v6121_v11 = vld [vmem:[%s7905_s22 + $0xa8] sm:$0xff] }
  0x74   : > { %v6131_v4 = vld [vmem:[%s7905_s22 + $0xf8] sm:$0xff]  ;;  %1243 = vmatpush.bf16.msra.mxu2 %v6123_v3  ;;  %v6130_v8 = vld [vmem:[%s7905_s22 + $0xf0] sm:$0xff]  ;;  %v6129_v12 = vld [vmem:[%s7905_s22 + $0xe8] sm:$0xff] }
  0x75   : > { %1257 = vmatpush.bf16.msra.mxu3 %v6131_v4  ;;  %v6104_v13 = vld [vmem:[%s7905_s22 + $0x20] sm:$0xff]  ;;  %v6103_v17 = vld [vmem:[%s7905_s22 + $0x18] sm:$0xff]  ;;  %v6102_v21 = vld [vmem:[%s7905_s22 + $0x10] sm:$0xff] }
  0x76   : > { %1216 = vmatpush.bf16.msra.mxu0 %v6106_v5  ;;  %v6112_v14 = vld [vmem:[%s7905_s22 + $0x60] sm:$0xff]  ;;  %v6111_v18 = vld [vmem:[%s7905_s22 + $0x58] sm:$0xff]  ;;  %v6110_v22 = vld [vmem:[%s7905_s22 + $0x50] sm:$0xff] }
  0x77   : > { %1230 = vmatpush.bf16.msra.mxu1 %v6114_v6  ;;  %v6120_v15 = vld [vmem:[%s7905_s22 + $0xa0] sm:$0xff]  ;;  %v6119_v19 = vld [vmem:[%s7905_s22 + $0x98] sm:$0xff]  ;;  %v6118_v23 = vld [vmem:[%s7905_s22 + $0x90] sm:$0xff] }
  0x78   : > { %1244 = vmatpush.bf16.msra.mxu2 %v6122_v7  ;;  %v6128_v16 = vld [vmem:[%s7905_s22 + $0xe0] sm:$0xff]  ;;  %v6127_v20 = vld [vmem:[%s7905_s22 + $0xd8] sm:$0xff]  ;;  %v6126_v24 = vld [vmem:[%s7905_s22 + $0xd0] sm:$0xff] }
  0x79   : > { %1258 = vmatpush.bf16.msra.mxu3 %v6130_v8  ;;  %v6101_v25 = vld [vmem:[%s7905_s22 + $0x8] sm:$0xff]  ;;  %v6100_v29 = vld [vmem:[%s7905_s22] sm:$0xff]  ;;  %v815_v32 = vld [vmem:[%s7906_s13 + $0x30] sm:$0xff] }
  0x7a   : > { %1217 = vmatpush.bf16.msra.mxu0 %v6105_v9  ;;  %v6109_v26 = vld [vmem:[%s7905_s22 + $0x48] sm:$0xff]  ;;  %v6108_v30 = vld [vmem:[%s7905_s22 + $0x40] sm:$0xff]  ;;  %v816_v34 = vld [vmem:[%s7906_s13 + $0x38] sm:$0xff] }
  0x7b   : > { %1231 = vmatpush.bf16.msra.mxu1 %v6113_v10  ;;  %v6117_v27 = vld [vmem:[%s7905_s22 + $0x88] sm:$0xff]  ;;  %v809_v31 = vld [vmem:[%s7906_s13] sm:$0xff]  ;;  %v6139_v35 = vld [vmem:[%s7905_s22 + $0x138] sm:$0xff] }
  0x7c   : > { %1245 = vmatpush.bf16.msra.mxu2 %v6121_v11  ;;  %v6125_v28 = vld [vmem:[%s7905_s22 + $0xc8] sm:$0xff]  ;;  %v6147_v36 = vld [vmem:[%s7905_s22 + $0x178] sm:$0xff]  ;;  %v6116_v37 = vld [vmem:[%s7905_s22 + $0x80] sm:$0xff]  ;;  %v821_v41 = vpack.c.bf16 %v815_v32, %v809_v31 }
  0x7d   : > { %1259 = vmatpush.bf16.msra.mxu3 %v6129_v12  ;;  %v810_v33 = vld [vmem:[%s7906_s13 + $0x8] sm:$0xff]  ;;  %v6124_v38 = vld [vmem:[%s7905_s22 + $0xc0] sm:$0xff]  ;;  %v811_v39 = vld [vmem:[%s7906_s13 + $0x10] sm:$0xff] }
  0x7e   : > { %1218 = vmatpush.bf16.msra.mxu0 %v6104_v13  ;;  %v817_v40 = vld [vmem:[%s7906_s13 + $0x40] sm:$0xff]  ;;  %v812_v42 = vld [vmem:[%s7906_s13 + $0x18] sm:$0xff]  ;;  %v818_v43 = vld [vmem:[%s7906_s13 + $0x48] sm:$0xff]  ;;  %v822_v44 = vpack.c.bf16 %v816_v34, %v810_v33 }
  0x7f   : > { %1232 = vmatpush.bf16.msra.mxu1 %v6112_v14  ;;  %v6138_v45 = vld [vmem:[%s7905_s22 + $0x130] sm:$0xff]  ;;  %v823_v47 = vpack.c.bf16 %v817_v40, %v811_v39  ;;  %v824_v48 = vpack.c.bf16 %v818_v43, %v812_v42  ;;  %v6137_v49 = vld [vmem:[%s7905_s22 + $0x128] sm:$0xff]  ;;  %v6136_v51 = vld [vmem:[%s7905_s22 + $0x120] sm:$0xff] }
  0x80   : > { %1246 = vmatpush.bf16.msra.mxu2 %v6120_v15  ;;  %v6146_v46 = vld [vmem:[%s7905_s22 + $0x170] sm:$0xff]  ;;  %v6145_v50 = vld [vmem:[%s7905_s22 + $0x168] sm:$0xff]  ;;  %v6144_v52 = vld [vmem:[%s7905_s22 + $0x160] sm:$0xff] }
  0x81   : > { %1260 = vmatpush.bf16.msra.mxu3 %v6128_v16  ;;  %v6135_v53 = vld [vmem:[%s7905_s22 + $0x118] sm:$0xff]  ;;  %v6134_v55 = vld [vmem:[%s7905_s22 + $0x110] sm:$0xff]  ;;  %v6133_v57 = vld [vmem:[%s7905_s22 + $0x108] sm:$0xff] }
  0x82   : > { %1219 = vmatpush.bf16.msra.mxu0 %v6103_v17  ;;  %v6143_v54 = vld [vmem:[%s7905_s22 + $0x158] sm:$0xff]  ;;  %v6142_v56 = vld [vmem:[%s7905_s22 + $0x150] sm:$0xff]  ;;  %v6141_v58 = vld [vmem:[%s7905_s22 + $0x148] sm:$0xff] }
  0x83   : > { %1233 = vmatpush.bf16.msra.mxu1 %v6111_v18  ;;  %v6132_v59 = vld [vmem:[%s7905_s22 + $0x100] sm:$0xff]  ;;  %v819_v62 = vld [vmem:[%s7906_s13 + $0x50] sm:$0xff]  ;;  %v814_v63 = vld [vmem:[%s7906_s13 + $0x28] sm:$0xff] }
  0x84   : > { %1247 = vmatpush.bf16.msra.mxu2 %v6119_v19  ;;  %v6140_v60 = vld [vmem:[%s7905_s22 + $0x140] sm:$0xff]  ;;  %v820_v0 = vld [vmem:[%s7906_s13 + $0x58] sm:$0xff] }
  0x85   : > { %1261 = vmatpush.bf16.msra.mxu3 %v6127_v20  ;;  %v813_v61 = vld [vmem:[%s7906_s13 + $0x20] sm:$0xff]  ;;  %v826_v2 = vpack.c.bf16 %v820_v0, %v814_v63 }
  0x86   : > { %1220 = vmatpush.bf16.msra.mxu0 %v6102_v21  ;;  %v825_v1 = vpack.c.bf16 %v819_v62, %v813_v61  ;;  %v6497_v5 = vld [vmem:[%s7907_s28] ss:$0 sm:$0xff] }
  0x87   : > { %1234 = vmatpush.bf16.msra.mxu1 %v6110_v22 }
  0x88   : > { %1248 = vmatpush.bf16.msra.mxu2 %v6118_v23 }
  0x89   : > { %1262 = vmatpush.bf16.msra.mxu3 %v6126_v24 }
  0x8a   : > { %1221 = vmatpush.bf16.msra.mxu0 %v6101_v25 }
  0x8b   : > { %1235 = vmatpush.bf16.msra.mxu1 %v6109_v26 }
  0x8c   : > { %1249 = vmatpush.bf16.msra.mxu2 %v6117_v27 }
  0x8d   : > { %1263 = vmatpush.bf16.msra.mxu3 %v6125_v28 }
  0x8e   : > { %1222 = vmatpush.bf16.msra.mxu0 %v6100_v29 }
  0x8f   : > { %1236 = vmatpush.bf16.msra.mxu1 %v6108_v30 }
  0x90   : > { %1250 = vmatpush.bf16.msra.mxu2 %v6116_v37 }
  0x91   : > { %1264 = vmatpush.bf16.msra.mxu3 %v6124_v38  ;;  %1223 = vmatmul.bf16.vlgmr.msra.gmra.mxu0 %v821_v41 }
  0x92   : > { %1271 = vmatpush.bf16.msrb.mxu0 %v6139_v35  ;;  %1237 = vmatmul.bf16.vlgmr.msra.gmra.mxu1 %v822_v44 }
  0x93   : > { %1285 = vmatpush.bf16.msrb.mxu1 %v6147_v36  ;;  %1251 = vmatmul.bf16.vlgmr.msra.gmra.mxu2 %v823_v47 }
  0x94   : > { %1265 = vmatmul.bf16.vlgmr.msra.gmra.mxu3 %v824_v48 }
  0x96   : > { %1272 = vmatpush.bf16.msrb.mxu0 %v6138_v45 }
  0x97   : > { %1286 = vmatpush.bf16.msrb.mxu1 %v6146_v46 }
  0x9a   : > { %1273 = vmatpush.bf16.msrb.mxu0 %v6137_v49 }
  0x9b   : > { %1287 = vmatpush.bf16.msrb.mxu1 %v6145_v50 }
  0x9e   : > { %1274 = vmatpush.bf16.msrb.mxu0 %v6136_v51 }
  0x9f   : > { %1288 = vmatpush.bf16.msrb.mxu1 %v6144_v52 }
  0xa2   : > { %1275 = vmatpush.bf16.msrb.mxu0 %v6135_v53 }
  0xa3   : > { %1289 = vmatpush.bf16.msrb.mxu1 %v6143_v54 }
  0xa6   : > { %1276 = vmatpush.bf16.msrb.mxu0 %v6134_v55 }
  0xa7   : > { %1290 = vmatpush.bf16.msrb.mxu1 %v6142_v56 }
  0xaa   : > { %1277 = vmatpush.bf16.msrb.mxu0 %v6133_v57 }
  0xab   : > { %1291 = vmatpush.bf16.msrb.mxu1 %v6141_v58 }
  0xae   : > { %1278 = vmatpush.bf16.msrb.mxu0 %v6132_v59 }
  0xaf   : > { %1292 = vmatpush.bf16.msrb.mxu1 %v6140_v60 }
  0xb1   : > { %1279 = vmatmul.bf16.vlgmr.msrb.gmra.mxu0 %v825_v1 }
  0xb2   : > { %1293 = vmatmul.bf16.vlgmr.msrb.gmra.mxu1 %v826_v2 }
 0x10e   : > { %v1224_v3 = vpop.f32.mrf.mxu0 }
 0x10f   : > { %v1238_v4 = vpop.f32.mrf.mxu1  ;;  %v1225_v6 = vadd.f32 %v6497_v5, %v1224_v3 }
 0x111   : > { %v1239_v8 = vadd.f32 %v1238_v4, %v1225_v6 }
 0x116   : > { %v1252_v7 = vpop.f32.mrf.mxu2  ;;  %v1226_v9 = vpop.f32.mrf.mxu0 }
 0x117   : > { %v1240_v10 = vpop.f32.mrf.mxu1  ;;  %v1266_v11 = vpop.f32.mrf.mxu3  ;;  %v1253_v12 = vadd.f32 %v1252_v7, %v1239_v8  ;;  %v1227_v13 = vadd.f32 %v6497_v5, %v1226_v9 }
 0x119   : > { %v1267_v14 = vadd.f32 %v1266_v11, %v1253_v12  ;;  %v1241_v15 = vadd.f32 %v1240_v10, %v1227_v13 }
 0x11e   : > { %v1254_v16 = vpop.f32.mrf.mxu2 }
 0x11f   : > { %v1255_v20 = vadd.f32 %v1254_v16, %v1241_v15  ;;  %v1268_v22 = vpop.f32.mrf.mxu3 }
 0x121   : > { %v1269_v23 = vadd.f32 %v1268_v22, %v1255_v20 }
 0x12e   : > { %v1280_v17 = vpop.f32.mrf.mxu0 }
 0x12f   : > { %v1294_v18 = vpop.f32.mrf.mxu1  ;;  %v1281_v19 = vadd.f32 %v1280_v17, %v1267_v14 }
 0x131   : > { %v1295_v21 = vadd.f32 %v1294_v18, %v1281_v19 }
 0x133   : > { %1299 = vst [vmem:[#allocation2] sm:$0xff] %v1295_v21 }
 0x136   : > { %v1282_v24 = vpop.f32.mrf.mxu0 }
 0x137   : > { %v1283_v25 = vadd.f32 %v1282_v24, %v1269_v23  ;;  %v1296_v26 = vpop.f32.mrf.mxu1 }
 0x139   : > { %v1297_v27 = vadd.f32 %v1296_v26, %v1283_v25 }
 0x13b   : > { %1300 = vst [vmem:[#allocation2 + $0x8] sm:$0xff] %v1297_v27 }
 0x13c PF: > { %v6169_v28 = vld [vmem:[%s6957_s29 + $0xac] sm:$0xf]  ;;  %v5002_v29 = vld [vmem:[%s6957_s29 + $0xb4] sm:$0xf0]  ;;  %v6166_v30 = vld [vmem:[%s6957_s29 + $0x94] sm:$0xf]  ;;  %s7909_s6 = scalar_lea.vmem %s7856_s7, %s6942_s15  ;;  %s7910_s10 = scalar_lea.vmem %s7857_s8, %s6942_s15 }
 0x13d   : > { %v5005_v31 = vor.u32 %v6169_v28, %v5002_v29  ;;  %v4990_v32 = vld [vmem:[%s6957_s29 + $0x9c] sm:$0xf0]  ;;  %v5000_v33 = vld [vmem:[%s6957_s29 + $0xa8] sm:$0xf]  ;;  %v6170_v34 = vld [vmem:[%s6957_s29 + $0xb0] sm:$0xf0] }
 0x13e   : > { %v5001_v35 = vor.u32 %v6170_v34, %v5000_v33  ;;  %v4988_v36 = vld [vmem:[%s6957_s29 + $0x90] sm:$0xf]  ;;  %v4993_v37 = vor.u32 %v6166_v30, %v4990_v32  ;;  %v6167_v38 = vld [vmem:[%s6957_s29 + $0x98] sm:$0xf0]  ;;  %v4978_v40 = vld [vmem:[%s6957_s29 + $0x84] sm:$0xf0] }
 0x13f   : > { %1488 = vmatpush.bf16.msra.mxu1 %v5005_v31  ;;  %v6163_v39 = vld [vmem:[%s6957_s29 + $0x7c] sm:$0xf]  ;;  %v4989_v41 = vor.u32 %v6167_v38, %v4988_v36  ;;  %v4976_v42 = vld [vmem:[%s6957_s29 + $0x78] sm:$0xf]  ;;  %v6164_v43 = vld [vmem:[%s6957_s29 + $0x80] sm:$0xf0] }
 0x140   : > { %1474 = vmatpush.bf16.msra.mxu0 %v5001_v35  ;;  %v4981_v44 = vor.u32 %v6163_v39, %v4978_v40  ;;  %v6160_v45 = vld [vmem:[%s6957_s29 + $0x64] sm:$0xf]  ;;  %v4966_v46 = vld [vmem:[%s6957_s29 + $0x6c] sm:$0xf0]  ;;  %v4977_v47 = vor.u32 %v6164_v43, %v4976_v42  ;;  %v4964_v48 = vld [vmem:[%s6957_s29 + $0x60] sm:$0xf] }
 0x141   : > { %v6161_v49 = vld [vmem:[%s6957_s29 + $0x68] sm:$0xf0]  ;;  %v4969_v50 = vor.u32 %v6160_v45, %v4966_v46  ;;  %v5008_v52 = vld [vmem:[%s6957_s29 + $0xb0] sm:$0xf]  ;;  %v6171_v53 = vld [vmem:[%s6957_s29 + $0xb8] sm:$0xf0] }
 0x142   : > { %v6157_v51 = vld [vmem:[%s6957_s29 + $0x4c] sm:$0xf]  ;;  %v4954_v54 = vld [vmem:[%s6957_s29 + $0x54] sm:$0xf0]  ;;  %v4965_v55 = vor.u32 %v6161_v49, %v4964_v48  ;;  %v5009_v56 = vor.u32 %v6171_v53, %v5008_v52  ;;  %v6168_v58 = vld [vmem:[%s6957_s29 + $0xa0] sm:$0xf0] }
 0x143   : > { %1489 = vmatpush.bf16.msra.mxu1 %v4993_v37  ;;  %v4996_v57 = vld [vmem:[%s6957_s29 + $0x98] sm:$0xf]  ;;  %v4952_v59 = vld [vmem:[%s6957_s29 + $0x48] sm:$0xf]  ;;  %v6158_v60 = vld [vmem:[%s6957_s29 + $0x50] sm:$0xf0]  ;;  %v4957_v62 = vor.u32 %v6157_v51, %v4954_v54 }
 0x144   : > { %1475 = vmatpush.bf16.msra.mxu0 %v4989_v41  ;;  %1502 = vmatpush.bf16.msra.mxu2 %v5009_v56  ;;  %v4997_v61 = vor.u32 %v6168_v58, %v4996_v57  ;;  %v4984_v63 = vld [vmem:[%s6957_s29 + $0x80] sm:$0xf]  ;;  %v6165_v0 = vld [vmem:[%s6957_s29 + $0x88] sm:$0xf0]  ;;  %v6154_v1 = vld [vmem:[%s6957_s29 + $0x34] sm:$0xf]  ;;  %v4953_v3 = vor.u32 %v6158_v60, %v4952_v59 }
 0x145   : > { %v4942_v2 = vld [vmem:[%s6957_s29 + $0x3c] sm:$0xf0]  ;;  %v4940_v4 = vld [vmem:[%s6957_s29 + $0x30] sm:$0xf]  ;;  %v6155_v5 = vld [vmem:[%s6957_s29 + $0x38] sm:$0xf0]  ;;  %v4985_v6 = vor.u32 %v6165_v0, %v4984_v63 }
 0x146   : > { %v4945_v7 = vor.u32 %v6154_v1, %v4942_v2  ;;  %v4972_v8 = vld [vmem:[%s6957_s29 + $0x68] sm:$0xf]  ;;  %v6162_v9 = vld [vmem:[%s6957_s29 + $0x70] sm:$0xf0]  ;;  %v6151_v10 = vld [vmem:[%s6957_s29 + $0x1c] sm:$0xf]  ;;  %v4941_v12 = vor.u32 %v6155_v5, %v4940_v4 }
 0x147   : > { %1490 = vmatpush.bf16.msra.mxu1 %v4981_v44  ;;  %v4930_v11 = vld [vmem:[%s6957_s29 + $0x24] sm:$0xf0]  ;;  %v4928_v13 = vld [vmem:[%s6957_s29 + $0x18] sm:$0xf]  ;;  %v6152_v14 = vld [vmem:[%s6957_s29 + $0x20] sm:$0xf0]  ;;  %v4973_v15 = vor.u32 %v6162_v9, %v4972_v8 }
 0x148   : > { %1476 = vmatpush.bf16.msra.mxu0 %v4977_v47  ;;  %1503 = vmatpush.bf16.msra.mxu2 %v4997_v61  ;;  %v4933_v16 = vor.u32 %v6151_v10, %v4930_v11  ;;  %v4960_v17 = vld [vmem:[%s6957_s29 + $0x50] sm:$0xf]  ;;  %v6159_v18 = vld [vmem:[%s6957_s29 + $0x58] sm:$0xf0]  ;;  %v6148_v19 = vld [vmem:[%s6957_s29 + $0x4] sm:$0xf]  ;;  %v4929_v21 = vor.u32 %v6152_v14, %v4928_v13 }
 0x149   : > { %v4918_v20 = vld [vmem:[%s6957_s29 + $0xc] sm:$0xf0]  ;;  %v4916_v22 = vld [vmem:[%s6957_s29] sm:$0xf]  ;;  %v6149_v23 = vld [vmem:[%s6957_s29 + $0x8] sm:$0xf0]  ;;  %v4961_v25 = vor.u32 %v6159_v18, %v4960_v17 }
 0x14a   : > { %v7214_v24 = vld [vmem:[#allocation2] sm:$0xff]  ;;  %v4921_v26 = vor.u32 %v6148_v19, %v4918_v20  ;;  %v7216_v27 = vld [vmem:[#allocation2 + $0x8] sm:$0xff]  ;;  %v4948_v28 = vld [vmem:[%s6957_s29 + $0x38] sm:$0xf]  ;;  %v4917_v30 = vor.u32 %v6149_v23, %v4916_v22  ;;  %vm1534_vm0 = vcmask 261120   ;;  %s6698_s27 = smov 96  }
 0x14b   : > { %1491 = vmatpush.bf16.msra.mxu1 %v4969_v50  ;;  %v6156_v29 = vld [vmem:[%s6957_s29 + $0x40] sm:$0xf0]  ;;  %v1305_v31 = vpack.c.bf16 %v7216_v27, %v7214_v24  ;;  %v4936_v33 = vld [vmem:[%s6957_s29 + $0x20] sm:$0xf]  ;;  %v6153_v34 = vld [vmem:[%s6957_s29 + $0x28] sm:$0xf0] }
 0x14c   : > { %1477 = vmatpush.bf16.msra.mxu0 %v4965_v55  ;;  %1504 = vmatpush.bf16.msra.mxu2 %v4985_v6  ;;  %v4949_v32 = vor.u32 %v6156_v29, %v4948_v28  ;;  %v4937_v35 = vor.u32 %v6153_v34, %v4936_v33  ;;  %v4924_v36 = vld [vmem:[%s6957_s29 + $0x8] sm:$0xf]  ;;  %v6150_v37 = vld [vmem:[%s6957_s29 + $0x10] sm:$0xf0]  ;;  %v1338_v40 = vld [vmem:[%s6966_s1] sm:$0x7] }
 0x14d   : > { %v4925_v38 = vor.u32 %v6150_v37, %v4924_v36  ;;  %v1340_v41 = vperm.slane %v1338_v40, 0  ;;  %v1341_v42 = vperm.slane %v1338_v40, 1  ;;  %v1342_v53 = vperm.slane %v1338_v40, 2  ;;  %s6699_s29 = smov 64   ;;  %s6700_s1 = smov 32  }
 0x14e   : > { %s7908_s23 = sld [smem:[#allocation15_spill]]  ;;  %vm1570_vm1 = vcmask 130048   ;;  %p6094_p10 = scmp.ne.s32.totalorder %s6820_s17, 1 }
 0x14f   : > { %1492 = vmatpush.bf16.msra.mxu1 %v4957_v62  ;;  %s7916_s4 = sld [smem:[#allocation26_spill]] (!%p6094_p10) }
 0x150   : > { %1478 = vmatpush.bf16.msra.mxu0 %v4953_v3  ;;  %1505 = vmatpush.bf16.msra.mxu2 %v4973_v15  ;;  %v6173_v15 = vld [vmem:[%s6927_s19 + $0x8] sm:$0xff] }
 0x153   : > { %1493 = vmatpush.bf16.msra.mxu1 %v4945_v7 }
 0x154   : > { %1479 = vmatpush.bf16.msra.mxu0 %v4941_v12  ;;  %1506 = vmatpush.bf16.msra.mxu2 %v4961_v25  ;;  %v7249_v59 = vld [vmem:[%s7908_s23] sm:$0xff]  ;;  %v7256_v63 = vld [vmem:[%s7908_s23 + $0x8] sm:$0xff] }
 0x157   : > { %1494 = vmatpush.bf16.msra.mxu1 %v4933_v16  ;;  %v6172_v16 = vld [vmem:[%s6927_s19] sm:$0xff] }
 0x158   : > { %1480 = vmatpush.bf16.msra.mxu0 %v4929_v21  ;;  %1507 = vmatpush.bf16.msra.mxu2 %v4949_v32 }
 0x15b   : > { %1495 = vmatpush.bf16.msra.mxu1 %v4921_v26 }
 0x15c   : > { %1481 = vmatpush.bf16.msra.mxu0 %v4917_v30  ;;  %1508 = vmatpush.bf16.msra.mxu2 %v4937_v35 }
 0x15e   : > { %1496 = vmatmul.bf16.vlgmr.msra.gmra.mxu1 %v1305_v31 }
 0x15f   : > { %1482 = vmatmul.bf16.vlgmr.msra.gmra.mxu0 %v1305_v31 }
 0x160   : > { %1509 = vmatpush.bf16.msra.mxu2 %v4925_v38 }
 0x163   : > { %1510 = vmatmul.bf16.vlgmr.msra.gmra.mxu2 %v1305_v31 }
 0x164   : > { %1772 = vmatpush.bf16.msrb.mxu2 %v6173_v15 }
 0x168   : > { %1773 = vmatpush.bf16.msrb.mxu2 %v6172_v16 }
 0x1db   : > { %v1497_v39 = vpop.f32.mrf.mxu1 }
 0x1dc   : > { %v1483_v43 = vpop.f32.mrf.mxu0  ;;  %v1498_v47 = vadd.f32 %v1497_v39, %v1341_v42 }
 0x1dd   : > { %v1484_v46 = vadd.f32 %v1483_v43, %v1340_v41 }
 0x1df   : > { %v1532_v48 = vmul.f32 0.17677669, %v1484_v46 }
 0x1e3   : > { %v1499_v44 = vpop.f32.mrf.mxu1 }
 0x1e4   : > { %v1500_v45 = vadd.f32 %v1499_v44, %v1341_v42  ;;  %v1485_v49 = vpop.f32.mrf.mxu0 }
 0x1e5   : > { %v1486_v50 = vadd.f32 %v1485_v49, %v1340_v41 }
 0x1e6   : > { %1629 = vrot.lane.b32.xlu2 %v1500_v45, %s6698_s27  ;;  %5010 = vmatpush.xpose.msk.msra.mxu3 %vm1534_vm0, %v1500_v45  ;;  %v1511_v52 = vpop.f32.mrf.mxu2 }
 0x1e7   : > { %v1533_v51 = vmul.f32 0.17677669, %v1486_v50  ;;  %v7235_v55 = vadd.f32 %v1511_v52, %v1342_v53 }
 0x1ea   : > { %5011 = vmatpush.xpose.msk.msra.mxu3 %vm1534_vm0, %v1498_v47 }
 0x1ed   : > { %5012 = vmatmul.msk.f32.vlgmr.msra.gmra.mxu3 %vm1534_vm0, %v1532_v48 }
 0x1ee   : > { %1627 = vrot.lane.b32.xlu2 %v1498_v47, %s6698_s27  ;;  %v1513_v54 = vpop.f32.mrf.mxu2 }
 0x1ef   : > { %v7237_v56 = vadd.f32 %v1513_v54, %v1342_v53 }
 0x1f1   : > { %1613 = vmatpush.msrb.mxu3 %v7237_v56 }
 0x1f3   : > { %1614 = vmatpush.msrb.mxu3 %v7235_v55 }
 0x1f5   : > { %5013 = vmatmul.msk.f32.gmra.mxu3 %vm1534_vm0, %v1533_v51 }
 0x1f6   : > { %1625 = vrot.lane.b32.xlu2 %v1533_v51, %s6698_s27 }
 0x1fe   : > { %1786 = vrot.lane.b32.xlu2 %v1500_v45, %s6699_s29 }
 0x206   : > { %1912 = vrot.lane.b32.xlu2 %v1498_v47, %s6700_s1 }
 0x20e   : > { %1784 = vrot.lane.b32.xlu2 %v1498_v47, %s6699_s29 }
 0x216   : > { %1782 = vrot.lane.b32.xlu2 %v1533_v51, %s6699_s29 }
 0x240   : > { %v1630_v57 = vpop.permute.xlu2 %1629 }
 0x241   : > { %5016 = vmatpush.xpose.msk.msra.mxu3 %vm1534_vm0, %v1630_v57 }
 0x248   : > { %v1628_v58 = vpop.permute.xlu2 %1627 }
 0x249   : > { %5017 = vmatpush.xpose.msk.msra.mxu3 %vm1534_vm0, %v1628_v58 }
 0x250   : > { %v1626_v13 = vpop.permute.xlu2 %1625 }
 0x258   : > { %v1787_v14 = vpop.permute.xlu2 %1786 }
 0x260   : > { %v1913_v18 = vpop.permute.xlu2 %1912 }
 0x268   : > { %v1785_v22 = vpop.permute.xlu2 %1784 }
 0x270   : > { %v1564_v60 = vpop.f32.mrf.mxu3  ;;  %v1783_v30 = vpop.permute.xlu2 %1782 }
 0x271   : > { %v1565_v61 = vadd.f32 %v1564_v60, %v7249_v59 }
 0x273   : > { %v1571_v62 = vsel %vm1570_vm1, %v1565_v61, -inf }
 0x274   : > { %1572 = vmax.xlane.f32.xlu0 %v1571_v62 }
 0x278   : > { %v1567_v0 = vpop.f32.mrf.mxu3 }
 0x279   : > { %v1568_v1 = vadd.f32 %v1567_v0, %v7256_v63 }
 0x27b   : > { %v1574_v2 = vsel %vm1570_vm1, %v1568_v1, -inf }
 0x27c   : > { %1575 = vmax.xlane.f32.xlu0 %v1574_v2 }
 0x290   : > { %1623 = vrot.lane.b32.xlu0 %v1532_v48, %s6698_s27 }
 0x298   : > { %1908 = vrot.lane.b32.xlu0 %v1532_v48, %s6700_s1 }
 0x2a0   : > { %1910 = vrot.lane.b32.xlu0 %v1533_v51, %s6700_s1 }
 0x2e7   : > { %v1573_v3 = vpop.xlane.xlu0 %1572 }
 0x2e8   : > { %v1577_v4 = vsub.f32 %v1565_v61, %v1573_v3 }
 0x2ea   : > { %v1579_v5 = vmul.f32 1.442695, %v1577_v4 }
 0x2ec   : > { %6519 = vpow2.f32 %v1579_v5 }
 0x2ef   : > { %v1576_v6 = vpop.xlane.xlu0 %1575 }
 0x2f0   : > { %v1578_v7 = vsub.f32 %v1568_v1, %v1576_v6 }
 0x2f2   : > { %v6520_v8 = vpop.eup %6519  ;;  %v1581_v9 = vmul.f32 1.442695, %v1578_v7 }
 0x2f3   : > { %v1583_v10 = vsel %vm1570_vm1, %v6520_v8, 0.0 }
 0x2f4   : > { %6521 = vpow2.f32 %v1581_v9  ;;  %1584 = vadd.xlane.f32.xlu1 %v1583_v10 }
 0x2fa   : > { %v6522_v11 = vpop.eup %6521 }
 0x2fb   : > { %v1586_v12 = vsel %vm1570_vm1, %v6522_v11, 0.0 }
 0x2fc   : > { %1587 = vadd.xlane.f32.xlu1 %v1586_v12 }
 0x302   : > { %v1624_v26 = vpop.permute.xlu0 %1623 }
 0x30a   : > { %v1909_v37 = vpop.permute.xlu0 %1908 }
 0x312   : > { %v1911_v43 = vpop.permute.xlu0 %1910 }
 0x315   : > { %1914 = vrot.lane.b32.xlu1 %v1500_v45, %s6700_s1 }
 0x31d   : > { %1780 = vrot.lane.b32.xlu1 %v1532_v48, %s6699_s29 }
 0x367   : > { %v1585_v17 = vpop.xlane.xlu1 %1584 }
 0x368   : > { %6523 = vrcp.f32 %v1585_v17 }
 0x36e   : > { %v6524_v19 = vpop.eup %6523 }
 0x36f   : > { %v1588_v20 = vpop.xlane.xlu1 %1587  ;;  %v1591_v21 = vmul.f32 %v6524_v19, %v6520_v8 }
 0x370   : > { %6525 = vrcp.f32 %v1588_v20 }
 0x371   : > { %5014 = vmatmul.msk.f32.vlgmr.msrb.gmra.mxu3 %vm1570_vm1, %v1591_v21 }
 0x372   : > { %5040 = vmatpush.xpose.msk.msrb.mxu3 %vm1534_vm0, %v1787_v14 }
 0x376   : > { %v6526_v23 = vpop.eup %6525  ;;  %5041 = vmatpush.xpose.msk.msrb.mxu3 %vm1534_vm0, %v1785_v22 }
 0x377   : > { %v1592_v25 = vmul.f32 %v6526_v23, %v6522_v11 }
 0x379   : > { %5015 = vmatmul.msk.f32.gmra.mxu3 %vm1570_vm1, %v1592_v25 }
 0x381   : > { %5018 = vmatmul.msk.f32.vlgmr.msra.gmra.mxu3 %vm1534_vm0, %v1624_v26 }
 0x387   : > { %v1915_v28 = vpop.permute.xlu1 %1914 }
 0x388   : > { %5055 = vmatpush.xpose.msk.msra.mxu2 %vm1534_vm0, %v1915_v28 }
 0x389   : > { %5019 = vmatmul.msk.f32.gmra.mxu3 %vm1534_vm0, %v1626_v13 }
 0x38c   : > { %5056 = vmatpush.xpose.msk.msra.mxu2 %vm1534_vm0, %v1913_v18 }
 0x38f   : > { %v1781_v29 = vpop.permute.xlu1 %1780 }
 0x391   : > { %5042 = vmatmul.msk.f32.vlgmr.msrb.gmra.mxu3 %vm1534_vm0, %v1781_v29 }
 0x399   : > { %5043 = vmatmul.msk.f32.gmra.mxu3 %vm1534_vm0, %v1783_v30 }
 0x3f4   : > { %v1616_v31 = vpop.f32.mrf.mxu3 }
 0x3fc   : > { %v1619_v32 = vpop.f32.mrf.mxu3 }
 0x3fd   : > { %v1622_v33 = vpack.c.bf16 %v1619_v32, %v1616_v31 }
 0x3ff   : > { %5039 = vmatmul.msk.bf16.vlgmr.msrb.gmra.mxu2 %vm1534_vm0, %v1622_v33 }
 0x404   : > { %v1656_v34 = vpop.f32.mrf.mxu3 }
 0x405   : > { %v1657_v35 = vadd.f32 %v1656_v34, %v7249_v59  ;;  %v6175_v34 = vld [vmem:[%s6927_s19 + $0x18] sm:$0xff] }
 0x407   : > { %v1662_v36 = vsel %vm1570_vm1, %v1657_v35, -inf }
 0x408   : > { %1663 = vmax.xlane.f32.xlu1 %v1662_v36 }
 0x40c   : > { %v1659_v38 = vpop.f32.mrf.mxu3 }
 0x40d   : > { %v1660_v39 = vadd.f32 %v1659_v38, %v7256_v63 }
 0x40f   : > { %5057 = vmatmul.msk.f32.vlgmr.msra.gmra.mxu2 %vm1534_vm0, %v1909_v37  ;;  %v1665_v40 = vsel %vm1570_vm1, %v1660_v39, -inf }
 0x410   : > { %1666 = vmax.xlane.f32.xlu0 %v1665_v40 }
 0x414   : > { %v1813_v41 = vpop.f32.mrf.mxu3 }
 0x415   : > { %v1814_v42 = vadd.f32 %v1813_v41, %v7249_v59 }
 0x417   : > { %5058 = vmatmul.msk.f32.gmra.mxu2 %vm1534_vm0, %v1911_v43  ;;  %v1819_v44 = vsel %vm1570_vm1, %v1814_v42, -inf }
 0x418   : > { %1820 = vmax.xlane.f32.xlu1 %v1819_v44 }
 0x41c   : > { %v1816_v2 = vpop.f32.mrf.mxu3 }
 0x41d   : > { %v1817_v4 = vadd.f32 %v1816_v2, %v7256_v63  ;;  %v6176_v2 = vld [vmem:[%s6927_s19 + $0x20] sm:$0xff] }
 0x41f   : > { %v1822_v7 = vsel %vm1570_vm1, %v1817_v4, -inf }
 0x47b   : > { %v1664_v45 = vpop.xlane.xlu1 %1663 }
 0x47c   : > { %v1668_v46 = vsub.f32 %v1657_v35, %v1664_v45  ;;  %v6174_v35 = vld [vmem:[%s6927_s19 + $0x10] sm:$0xff] }
 0x47e   : > { %v1670_v47 = vmul.f32 1.442695, %v1668_v46 }
 0x480   : > { %6527 = vpow2.f32 %v1670_v47 }
 0x482   : > { %v7288_v48 = vpop.f32.mrf.mxu2 }
 0x483   : > { %v1667_v49 = vpop.xlane.xlu0 %1666 }
 0x484   : > { %v1669_v50 = vsub.f32 %v1660_v39, %v1667_v49 }
 0x486   : > { %v6528_v51 = vpop.eup %6527  ;;  %v1672_v52 = vmul.f32 1.442695, %v1669_v50 }
 0x487   : > { %v1674_v53 = vsel %vm1570_vm1, %v6528_v51, 0.0 }
 0x488   : > { %6529 = vpow2.f32 %v1672_v52  ;;  %1675 = vadd.xlane.f32.xlu1 %v1674_v53 }
 0x48a   : > { %v7291_v54 = vpop.f32.mrf.mxu2 }
 0x48b   : > { %v1821_v60 = vpop.xlane.xlu1 %1820 }
 0x48c   : > { %v1825_v0 = vsub.f32 %v1814_v42, %v1821_v60 }
 0x48e   : > { %v6530_v57 = vpop.eup %6529  ;;  %v1827_v3 = vmul.f32 1.442695, %v1825_v0  ;;  %v6178_v0 = vld [vmem:[%s6927_s19 + $0x30] sm:$0xff] }
 0x48f   : > { %v1677_v58 = vsel %vm1570_vm1, %v6530_v57, 0.0 }
 0x490   : > { %1678 = vadd.xlane.f32.xlu0 %v1677_v58  ;;  %6531 = vpow2.f32 %v1827_v3 }
 0x492   : > { %v1941_v61 = vpop.f32.mrf.mxu2 }
 0x493   : > { %v1942_v62 = vadd.f32 %v1941_v61, %v7249_v59  ;;  %v6498_v59 = vpack.i.bf16 %v7235_v55, %v7237_v56 }
 0x495   : > { %v1947_v1 = vsel %vm1570_vm1, %v1942_v62, -inf }
 0x496   : > { %1948 = vmax.xlane.f32.xlu2 %v1947_v1  ;;  %v7303_v9 = vpop.eup %6531  ;;  %v6177_v1 = vld [vmem:[%s6927_s19 + $0x28] sm:$0xff] }
 0x497   : > { %v1831_v10 = vsel %vm1570_vm1, %v7303_v9, 0.0 }
 0x49a   : > { %v1944_v5 = vpop.f32.mrf.mxu2 }
 0x49b   : > { %v1945_v6 = vadd.f32 %v1944_v5, %v7256_v63 }
 0x49d   : > { %v1950_v8 = vsel %vm1570_vm1, %v1945_v6, -inf }
 0x49e   : > { %1823 = vmax.xlane.f32.xlu2 %v1822_v7  ;;  %1951 = vmax.xlane.f32.xlu0 %v1950_v8 }
 0x4a1   : > { %6499 = vrot.lane.b32.xlu1 %v6498_v59, %s6698_s27 }
 0x4a6   : > { %1832 = vadd.xlane.f32.xlu0 %v1831_v10 }
 0x4fb   : > { %v1676_v11 = vpop.xlane.xlu1 %1675 }
 0x4fc   : > { %6533 = vrcp.f32 %v1676_v11 }
 0x502   : > { %v6534_v17 = vpop.eup %6533 }
 0x503   : > { %v1679_v63 = vpop.xlane.xlu0 %1678  ;;  %v1682_v28 = vmul.f32 %v6534_v17, %v6528_v51 }
 0x504   : > { %6535 = vrcp.f32 %v1679_v63 }
 0x509   : > { %v1949_v12 = vpop.xlane.xlu2 %1948 }
 0x50a   : > { %v1953_v13 = vsub.f32 %v1942_v62, %v1949_v12  ;;  %v6536_v18 = vpop.eup %6535  ;;  %v6179_v62 = vld [vmem:[%s6927_s19 + $0x38] sm:$0xff] }
 0x50b   : > { %v1683_v29 = vmul.f32 %v6536_v18, %v6530_v57 }
 0x50c   : > { %v1955_v14 = vmul.f32 1.442695, %v1953_v13  ;;  %v6513_v13 = vld [vmem:[%s7909_s6] ss:$0 sm:$0xff] }
 0x50e   : > { %6537 = vpow2.f32 %v1955_v14 }
 0x511   : > { %v1824_v15 = vpop.xlane.xlu2 %1823  ;;  %v1952_v16 = vpop.xlane.xlu0 %1951 }
 0x512   : > { %v1826_v55 = vsub.f32 %v1817_v4, %v1824_v15  ;;  %v1954_v56 = vsub.f32 %v1945_v6, %v1952_v16 }
 0x513   : > { %v6500_v19 = vpop.permute.xlu1 %6499 }
 0x514   : > { %v6538_v20 = vpop.eup %6537  ;;  %v1829_v21 = vmul.f32 1.442695, %v1826_v55  ;;  %v1957_v22 = vmul.f32 1.442695, %v1954_v56  ;;  %v6501_v23 = vunpack.i.l.bf16 %v6500_v19  ;;  %v6502_v26 = vunpack.i.h.bf16 %v6500_v19 }
 0x515   : > { %v1959_v25 = vsel %vm1570_vm1, %v6538_v20, 0.0 }
 0x516   : > { %6539 = vpow2.f32 %v1829_v21  ;;  %1712 = vmatpush.msrb.mxu0 %v6501_v23  ;;  %6436 = vmatpush.msrb.mxu1 %v6501_v23  ;;  %v5520_v23 = vld [vmem:[%s6934_s16 + $0x380] sm:$0xf] }
 0x517   : > { %6541 = vpow2.f32 %v1957_v22  ;;  %1960 = vadd.xlane.f32.xlu2 %v1959_v25  ;;  %v6300_v25 = vld [vmem:[%s6934_s16 + $0x3bc] sm:$0xf0] }
 0x518   : > { %1713 = vmatpush.msrb.mxu0 %v6502_v26  ;;  %6437 = vmatpush.msrb.mxu1 %v6502_v26  ;;  %v6292_v26 = vld [vmem:[%s6934_s16 + $0x384] sm:$0xf] }
 0x519   : > { %5020 = vmatmul.msk.f32.vlgmr.msrb.gmra.mxu0 %vm1570_vm1, %v1682_v28  ;;  %5021 = vmatmul.msk.f32.vlgmr.msrb.gmra.mxu1 %vm1570_vm1, %v1683_v29  ;;  %v1833_v36 = vpop.xlane.xlu0 %1832  ;;  %v5522_v28 = vld [vmem:[%s6934_s16 + $0x3c0] sm:$0xf0]  ;;  %v5528_v29 = vld [vmem:[%s6934_s16 + $0x388] sm:$0xf] }
 0x51a   : > { %1743 = vmatpush.bf16.msra.mxu1 %v6175_v34  ;;  %v5530_v34 = vld [vmem:[%s6934_s16 + $0x3c8] sm:$0xf0] }
 0x51c   : > { %v6540_v30 = vpop.eup %6539 }
 0x51d   : > { %v6542_v31 = vpop.eup %6541  ;;  %v1834_v32 = vsel %vm1570_vm1, %v6540_v30, 0.0 }
 0x51e   : > { %1835 = vadd.xlane.f32.xlu1 %v1834_v32  ;;  %v1962_v33 = vsel %vm1570_vm1, %v6542_v31, 0.0  ;;  %1744 = vmatpush.bf16.msra.mxu1 %v6174_v35  ;;  %v5456_v35 = vld [vmem:[%s6934_s16 + $0x300] sm:$0xf] }
 0x51f   : > { %1963 = vadd.xlane.f32.xlu0 %v1962_v33  ;;  %v6293_v33 = vld [vmem:[%s6934_s16 + $0x38c] sm:$0xf] }
 0x522   : > { %1898 = vmatpush.bf16.msrb.mxu1 %v6177_v1 }
 0x526   : > { %1899 = vmatpush.bf16.msrb.mxu1 %v6176_v2  ;;  %v5328_v2 = vld [vmem:[%s6934_s16 + $0x200] sm:$0xf] }
 0x52f   : > { %6504 = vrot.lane.b32.xlu2 %v6498_v59, %s6700_s1 }
 0x533   : > { %6509 = vrot.lane.b32.xlu0 %v6498_v59, %s6699_s29  ;;  %s7911_s29 = scalar_lea.vmem %s7858_s9, %s6942_s15 }
 0x58a   : > { %v1961_v37 = vpop.xlane.xlu2 %1960 }
 0x58b   : > { %6543 = vrcp.f32 %v1961_v37  ;;  %v6284_v37 = vld [vmem:[%s6934_s16 + $0x33c] sm:$0xf0] }
 0x591   : > { %v6544_v40 = vpop.eup %6543  ;;  %v1836_v50 = vpop.xlane.xlu1 %1835 }
 0x592   : > { %v6505_v38 = vpop.permute.xlu2 %6504  ;;  %v1964_v39 = vpop.xlane.xlu0 %1963  ;;  %v1967_v43 = vmul.f32 %v6544_v40, %v6538_v20  ;;  %v5457_v40 = vor.u32 %v6284_v37, %v5456_v35  ;;  %v5208_v37 = vld [vmem:[%s6934_s16 + $0x108] sm:$0xf] }
 0x593   : > { %v6506_v41 = vunpack.i.l.bf16 %v6505_v38  ;;  %v6507_v42 = vunpack.i.h.bf16 %v6505_v38  ;;  %6545 = vrcp.f32 %v1964_v39  ;;  %v6276_v38 = vld [vmem:[%s6934_s16 + $0x304] sm:$0xf] }
 0x594   : > { %6547 = vrcp.f32 %v1833_v36  ;;  %v5533_v36 = vor.u32 %v6293_v33, %v5530_v34  ;;  %v5458_v39 = vld [vmem:[%s6934_s16 + $0x340] sm:$0xf0]  ;;  %v6220_v33 = vld [vmem:[%s6934_s16 + $0x13c] sm:$0xf0] }
 0x595   : > { %1995 = vmatpush.msra.mxu3 %v6506_v41  ;;  %6549 = vrcp.f32 %v1836_v50  ;;  %v5461_v41 = vor.u32 %v6276_v38, %v5458_v39  ;;  %v6212_v34 = vld [vmem:[%s6934_s16 + $0x104] sm:$0xf]  ;;  %v6221_v38 = vld [vmem:[%s6934_s16 + $0x144] sm:$0xf0] }
 0x596   : > { %v1715_v44 = vpop.f32.mrf.mxu0  ;;  %v1718_v45 = vpop.f32.mrf.mxu1 }
 0x597   : > { %v1721_v46 = vpack.c.bf16 %v1718_v45, %v1715_v44  ;;  %1996 = vmatpush.msra.mxu3 %v6507_v42  ;;  %v5464_v42 = vld [vmem:[%s6934_s16 + $0x308] sm:$0xf]  ;;  %v6277_v44 = vld [vmem:[%s6934_s16 + $0x30c] sm:$0xf] }
 0x598   : > { %5059 = vmatmul.msk.f32.vlgmr.msra.gmra.mxu3 %vm1570_vm1, %v1967_v43  ;;  %v6285_v43 = vld [vmem:[%s6934_s16 + $0x344] sm:$0xf0] }
 0x599   : > { %5030 = vmatmul.msk.bf16.vlgmr.msra.gmra.mxu1 %vm1534_vm0, %v1721_v46  ;;  %v6546_v47 = vpop.eup %6545  ;;  %v5465_v45 = vor.u32 %v6285_v43, %v5464_v42  ;;  %v5466_v46 = vld [vmem:[%s6934_s16 + $0x348] sm:$0xf0]  ;;  %v5136_v43 = vld [vmem:[%s6934_s16 + $0x80] sm:$0xf] }
 0x59a   : > { %v1968_v49 = vmul.f32 %v6546_v47, %v6542_v31  ;;  %v6548_v52 = vpop.eup %6547  ;;  %v5525_v31 = vor.u32 %v6292_v26, %v5522_v28  ;;  %v5392_v47 = vld [vmem:[%s6934_s16 + $0x280] sm:$0xf]  ;;  %v5469_v50 = vor.u32 %v6277_v44, %v5466_v46 }
 0x59b   : > { %v1839_v58 = vmul.f32 %v6548_v52, %v7303_v9  ;;  %v6550_v60 = vpop.eup %6549  ;;  %v5394_v52 = vld [vmem:[%s6934_s16 + $0x2c0] sm:$0xf0]  ;;  %v6204_v44 = vld [vmem:[%s6934_s16 + $0xbc] sm:$0xf0] }
 0x59c   : > { %v1840_v61 = vmul.f32 %v6550_v60, %v6540_v30  ;;  %v6301_v30 = vld [vmem:[%s6934_s16 + $0x3c4] sm:$0xf0]  ;;  %2922 = vmatpush.bf16.msrb.mxu2 %v5525_v31  ;;  %v5137_v46 = vor.u32 %v6204_v44, %v5136_v43  ;;  %v6254_v43 = vld [vmem:[%s6934_s16 + $0x24c] sm:$0xf0]  ;;  %v6246_v44 = vld [vmem:[%s6934_s16 + $0x214] sm:$0xf] }
 0x59d   : > { %v5529_v32 = vor.u32 %v6301_v30, %v5528_v29  ;;  %v6269_v60 = vld [vmem:[%s6934_s16 + $0x2c4] sm:$0xf0] }
 0x59f   : > { %2936 = vmatpush.bf16.msrb.mxu3 %v5529_v32  ;;  %v5200_v32 = vld [vmem:[%s6934_s16 + $0x100] sm:$0xf] }
 0x5a0   : > { %5060 = vmatmul.msk.f32.gmra.mxu3 %vm1570_vm1, %v1968_v49  ;;  %v6268_v49 = vld [vmem:[%s6934_s16 + $0x2bc] sm:$0xf0]  ;;  %2923 = vmatpush.bf16.msrb.mxu2 %v5461_v41  ;;  %v5201_v35 = vor.u32 %v6220_v33, %v5200_v32  ;;  %v5210_v41 = vld [vmem:[%s6934_s16 + $0x148] sm:$0xf0]  ;;  %v6270_v32 = vld [vmem:[%s6934_s16 + $0x2cc] sm:$0xf0] }
 0x5a1   : > { %v6262_v33 = vld [vmem:[%s6934_s16 + $0x294] sm:$0xf] }
 0x5a3   : > { %2937 = vmatpush.bf16.msrb.mxu3 %v5465_v45  ;;  %v6196_v45 = vld [vmem:[%s6934_s16 + $0x84] sm:$0xf] }
 0x5a5   : > { %v6510_v51 = vpop.permute.xlu0 %6509 }
 0x5a6   : > { %v6511_v53 = vunpack.i.l.bf16 %v6510_v51  ;;  %v6512_v57 = vunpack.i.h.bf16 %v6510_v51  ;;  %v6260_v51 = vld [vmem:[%s6934_s16 + $0x284] sm:$0xf] }
 0x5a8   : > { %1867 = vmatpush.msra.mxu0 %v6511_v53  ;;  %v5400_v53 = vld [vmem:[%s6934_s16 + $0x288] sm:$0xf] }
 0x5a9   : > { %v5401_v1 = vor.u32 %v6269_v60, %v5400_v53  ;;  %v6197_v53 = vld [vmem:[%s6934_s16 + $0x8c] sm:$0xf]  ;;  %v5072_v60 = vld [vmem:[%s6934_s16] sm:$0xf] }
 0x5aa   : > { %1868 = vmatpush.msra.mxu0 %v6512_v57 }
 0x5ab   : > { %5044 = vmatmul.msk.f32.vlgmr.msra.gmra.mxu0 %vm1570_vm1, %v1839_v58  ;;  %v5393_v58 = vor.u32 %v6268_v49, %v5392_v47  ;;  %2938 = vmatpush.bf16.msrb.mxu3 %v5401_v1  ;;  %v5138_v47 = vld [vmem:[%s6934_s16 + $0xc0] sm:$0xf0]  ;;  %v5144_v49 = vld [vmem:[%s6934_s16 + $0x88] sm:$0xf] }
 0x5ac   : > { %2026 = vmatpush.bf16.msrb.mxu0 %v6179_v62  ;;  %v5402_v62 = vld [vmem:[%s6934_s16 + $0x2c8] sm:$0xf0]  ;;  %v5074_v1 = vld [vmem:[%s6934_s16 + $0x40] sm:$0xf0] }
 0x5b0   : > { %2027 = vmatpush.bf16.msrb.mxu0 %v6178_v0  ;;  %v5397_v0 = vor.u32 %v6260_v51, %v5394_v52  ;;  %v5141_v51 = vor.u32 %v6196_v45, %v5138_v47  ;;  %v5352_v47 = vld [vmem:[%s6934_s16 + $0x218] sm:$0xf] }
 0x5b2   : > { %2924 = vmatpush.bf16.msrb.mxu2 %v5397_v0 }
 0x5b3   : > { %5045 = vmatmul.msk.f32.gmra.mxu0 %vm1570_vm1, %v1840_v61  ;;  %v6261_v61 = vld [vmem:[%s6934_s16 + $0x28c] sm:$0xf] }
 0x5b4   : > { %2950 = vmatpush.bf16.msra.mxu0 %v5533_v36  ;;  %v5202_v36 = vld [vmem:[%s6934_s16 + $0x140] sm:$0xf0] }
 0x5b5   : > { %v5205_v39 = vor.u32 %v6212_v34, %v5202_v36  ;;  %v5416_v36 = vld [vmem:[%s6934_s16 + $0x298] sm:$0xf] }
 0x5b8   : > { %2951 = vmatpush.bf16.msra.mxu0 %v5469_v50  ;;  %v6205_v50 = vld [vmem:[%s6934_s16 + $0xc4] sm:$0xf0] }
 0x5b9   : > { %v5145_v52 = vor.u32 %v6205_v50, %v5144_v49  ;;  %v6255_v49 = vld [vmem:[%s6934_s16 + $0x254] sm:$0xf0] }
 0x616   : > { %v1746_v59 = vpop.f32.mrf.mxu1 }
 0x617   : > { %v1776_v10 = vadd.f32 %v7288_v48, %v1746_v59  ;;  %v6245_v59 = vld [vmem:[%s6934_s16 + $0x20c] sm:$0xf] }
 0x61b   : > { %v1998_v3 = vpop.f32.mrf.mxu3 }
 0x61e   : > { %v1748_v9 = vpop.f32.mrf.mxu1 }
 0x61f   : > { %v1778_v16 = vadd.f32 %v7291_v54, %v1748_v9  ;;  %v5338_v9 = vld [vmem:[%s6934_s16 + $0x248] sm:$0xf0] }
 0x623   : > { %v2001_v4 = vpop.f32.mrf.mxu3 }
 0x624   : > { %v2004_v5 = vpack.c.bf16 %v2001_v4, %v1998_v3  ;;  %v6252_v3 = vld [vmem:[%s6934_s16 + $0x23c] sm:$0xf0]  ;;  %v6244_v4 = vld [vmem:[%s6934_s16 + $0x204] sm:$0xf] }
 0x626   : > { %5069 = vmatmul.msk.bf16.vlgmr.msrb.gmra.mxu0 %vm1534_vm0, %v2004_v5  ;;  %v5405_v5 = vor.u32 %v6261_v61, %v5402_v62  ;;  %v6188_v61 = vld [vmem:[%s6934_s16 + $0x3c] sm:$0xf0]  ;;  %v6180_v62 = vld [vmem:[%s6934_s16 + $0x4] sm:$0xf] }
 0x627   : > { %v5073_v0 = vor.u32 %v6188_v61, %v5072_v60  ;;  %v6238_v60 = vld [vmem:[%s6934_s16 + $0x1cc] sm:$0xf0]  ;;  %v6230_v61 = vld [vmem:[%s6934_s16 + $0x194] sm:$0xf] }
 0x628   : > { %v1870_v6 = vpop.f32.mrf.mxu0  ;;  %2952 = vmatpush.bf16.msra.mxu0 %v5405_v5 }
 0x630   : > { %v1873_v7 = vpop.f32.mrf.mxu0 }
 0x631   : > { %v1876_v8 = vpack.c.bf16 %v1873_v7, %v1870_v6  ;;  %v5330_v6 = vld [vmem:[%s6934_s16 + $0x240] sm:$0xf0]  ;;  %v5336_v7 = vld [vmem:[%s6934_s16 + $0x208] sm:$0xf] }
 0x633   : > { %5054 = vmatmul.msk.bf16.vlgmr.msrb.gmra.mxu1 %vm1534_vm0, %v1876_v8  ;;  %v6253_v8 = vld [vmem:[%s6934_s16 + $0x244] sm:$0xf0] }
 0x6a3   : > { %v2029_v11 = vpop.f32.mrf.mxu0 }
 0x6ab   : > { %v2031_v56 = vpop.f32.mrf.mxu0 }
 0x6b0   : > { %v1901_v63 = vpop.f32.mrf.mxu1 }
 0x6b1   : > { %v1906_v12 = vadd.f32 %v1901_v63, %v1776_v10  ;;  %v5333_v63 = vor.u32 %v6244_v4, %v5330_v6  ;;  %v5077_v4 = vor.u32 %v6180_v62, %v5074_v1  ;;  %v6181_v6 = vld [vmem:[%s6934_s16 + $0xc] sm:$0xf]  ;;  %v5288_v1 = vld [vmem:[%s6934_s16 + $0x198] sm:$0xf] }
 0x6b3   : > { %v2034_v14 = vadd.f32 %v2029_v11, %v1906_v12  ;;  %v5329_v11 = vor.u32 %v6252_v3, %v5328_v2  ;;  %v5337_v12 = vor.u32 %v6253_v8, %v5336_v7  ;;  %2925 = vmatpush.bf16.msrb.mxu2 %v5333_v63  ;;  %v5080_v2 = vld [vmem:[%s6934_s16 + $0x8] sm:$0xf]  ;;  %v5082_v7 = vld [vmem:[%s6934_s16 + $0x48] sm:$0xf0]  ;;  %v5536_v8 = vld [vmem:[%s6934_s16 + $0x390] sm:$0xf] }
 0x6b4   : > { %v6189_v3 = vld [vmem:[%s6934_s16 + $0x44] sm:$0xf0] }
 0x6b5   : > { %v2040_v15 = vadd.f32 %v6513_v13, %v2034_v14  ;;  %v6236_v14 = vld [vmem:[%s6934_s16 + $0x1bc] sm:$0xf0]  ;;  %2939 = vmatpush.bf16.msrb.mxu3 %v5337_v12  ;;  %v5081_v5 = vor.u32 %v6189_v3, %v5080_v2  ;;  %v6239_v2 = vld [vmem:[%s6934_s16 + $0x1d4] sm:$0xf0] }
 0x6b7   : > { %v7336_v17 = vadd.f32 %v2040_v15, %v7214_v24  ;;  %v6701_v24 = vmov 128.0   ;;  %v6228_v15 = vld [vmem:[%s6934_s16 + $0x184] sm:$0xf] }
 0x6b8   : > { %v1903_v55 = vpop.f32.mrf.mxu1  ;;  %6551 = vrcp.f32 %v6701_v24 }
 0x6b9   : > { %v1907_v48 = vadd.f32 %v1903_v55, %v1778_v16  ;;  %2046 = vadd.xlane.f32.xlu2 %v7336_v17  ;;  %v5341_v16 = vor.u32 %v6245_v59, %v5338_v9  ;;  %v5266_v55 = vld [vmem:[%s6934_s16 + $0x1c0] sm:$0xf0]  ;;  %v5085_v59 = vor.u32 %v6181_v6, %v5082_v7  ;;  %v6302_v9 = vld [vmem:[%s6934_s16 + $0x3cc] sm:$0xf0]  ;;  %v5290_v6 = vld [vmem:[%s6934_s16 + $0x1d8] sm:$0xf0] }
 0x6ba   : > { %v5537_v63 = vor.u32 %v6302_v9, %v5536_v8  ;;  %v5216_v8 = vld [vmem:[%s6934_s16 + $0x110] sm:$0xf]  ;;  %v6214_v9 = vld [vmem:[%s6934_s16 + $0x114] sm:$0xf] }
 0x6bb   : > { %v2035_v18 = vadd.f32 %v2031_v56, %v1907_v48  ;;  %v5272_v48 = vld [vmem:[%s6934_s16 + $0x188] sm:$0xf]  ;;  %2953 = vmatpush.bf16.msra.mxu0 %v5341_v16 }
 0x6bc   : > { %v6237_v56 = vld [vmem:[%s6934_s16 + $0x1c4] sm:$0xf0] }
 0x6bd   : > { %v2041_v19 = vadd.f32 %v6513_v13, %v2035_v18  ;;  %v5264_v13 = vld [vmem:[%s6934_s16 + $0x180] sm:$0xf]  ;;  %v6229_v18 = vld [vmem:[%s6934_s16 + $0x18c] sm:$0xf] }
 0x6be   : > { %v7343_v54 = vpop.eup %6551 }
 0x6bf   : > { %v7340_v20 = vadd.f32 %v2041_v19, %v7216_v27  ;;  %v2051_v21 = vmul.f32 128.0, %v7343_v54  ;;  %v5521_v27 = vor.u32 %v6300_v25, %v5520_v23  ;;  %vm2055_vm2 = vweird.f32 %v7343_v54  ;;  %v5274_v19 = vld [vmem:[%s6934_s16 + $0x1c8] sm:$0xf0] }
 0x6c0   : > { %v5273_v23 = vor.u32 %v6237_v56, %v5272_v48  ;;  %v5277_v26 = vor.u32 %v6229_v18, %v5274_v19  ;;  %v5472_v48 = vld [vmem:[%s6934_s16 + $0x310] sm:$0xf] }
 0x6c1   : > { %2048 = vadd.xlane.f32.xlu0 %v7340_v20  ;;  %v2052_v22 = vsub.f32 1.0, %v2051_v21  ;;  %2908 = vmatpush.bf16.msra.mxu1 %v5521_v27  ;;  %v5265_v21 = vor.u32 %v6236_v14, %v5264_v13  ;;  %v5544_v13 = vld [vmem:[%s6934_s16 + $0x398] sm:$0xf]  ;;  %v6286_v56 = vld [vmem:[%s6934_s16 + $0x34c] sm:$0xf0] }
 0x6c2   : > { %2940 = vmatpush.bf16.msrb.mxu3 %v5273_v23  ;;  %2954 = vmatpush.bf16.msra.mxu0 %v5277_v26  ;;  %v6303_v14 = vld [vmem:[%s6934_s16 + $0x3d4] sm:$0xf0]  ;;  %v5473_v19 = vor.u32 %v6286_v56, %v5472_v48  ;;  %v5152_v48 = vld [vmem:[%s6934_s16 + $0x90] sm:$0xf] }
 0x6c3   : > { %v2053_v57 = vmul.f32 %v7343_v54, %v2052_v22  ;;  %v5269_v22 = vor.u32 %v6228_v15, %v5266_v55  ;;  %v6295_v15 = vld [vmem:[%s6934_s16 + $0x39c] sm:$0xf]  ;;  %v5545_v16 = vor.u32 %v6303_v14, %v5544_v13  ;;  %v5480_v23 = vld [vmem:[%s6934_s16 + $0x318] sm:$0xf]  ;;  %v6206_v56 = vld [vmem:[%s6934_s16 + $0xcc] sm:$0xf0] }
 0x6c4   : > { %v5546_v55 = vld [vmem:[%s6934_s16 + $0x3d8] sm:$0xf0]  ;;  %v6287_v26 = vld [vmem:[%s6934_s16 + $0x354] sm:$0xf0] }
 0x6c5   : > { %2909 = vmatpush.bf16.msra.mxu1 %v5457_v40  ;;  %v2054_v10 = vadd.f32 %v7343_v54, %v2053_v57  ;;  %2926 = vmatpush.bf16.msrb.mxu2 %v5269_v22  ;;  %v6213_v40 = vld [vmem:[%s6934_s16 + $0x10c] sm:$0xf]  ;;  %v5549_v18 = vor.u32 %v6295_v15, %v5546_v55  ;;  %v5474_v22 = vld [vmem:[%s6934_s16 + $0x350] sm:$0xf0]  ;;  %v6215_v15 = vld [vmem:[%s6934_s16 + $0x11c] sm:$0xf] }
 0x6c6   : > { %v5213_v42 = vor.u32 %v6213_v40, %v5210_v41  ;;  %v5146_v57 = vld [vmem:[%s6934_s16 + $0xc8] sm:$0xf0]  ;;  %v5418_v40 = vld [vmem:[%s6934_s16 + $0x2d8] sm:$0xf0] }
 0x6c7   : > { %v7390_v24 = vsel %vm2055_vm2, %v7343_v54, %v2054_v10  ;;  %v6294_v10 = vld [vmem:[%s6934_s16 + $0x394] sm:$0xf] }
 0x6c8   : > { %2955 = vmatpush.bf16.msra.mxu0 %v5213_v42  ;;  %v5344_v42 = vld [vmem:[%s6934_s16 + $0x210] sm:$0xf] }
 0x6c9   : > { %2910 = vmatpush.bf16.msra.mxu1 %v5393_v58  ;;  %2927 = vmatpush.bf16.msrb.mxu2 %v5205_v39  ;;  %v5149_v58 = vor.u32 %v6197_v53, %v5146_v57  ;;  %v5345_v45 = vor.u32 %v6254_v43, %v5344_v42  ;;  %v5354_v53 = vld [vmem:[%s6934_s16 + $0x258] sm:$0xf0] }
 0x6cc   : > { %2956 = vmatpush.bf16.msra.mxu0 %v5149_v58  ;;  %v5280_v58 = vld [vmem:[%s6934_s16 + $0x190] sm:$0xf] }
 0x6cd   : > { %2911 = vmatpush.bf16.msra.mxu1 %v5329_v11  ;;  %2928 = vmatpush.bf16.msrb.mxu2 %v5141_v51  ;;  %v5538_v11 = vld [vmem:[%s6934_s16 + $0x3d0] sm:$0xf0]  ;;  %v5353_v51 = vor.u32 %v6255_v49, %v5352_v47  ;;  %v5281_v62 = vor.u32 %v6238_v60, %v5280_v58 }
 0x6ce   : > { %v5541_v12 = vor.u32 %v6294_v10, %v5538_v11  ;;  %v5218_v11 = vld [vmem:[%s6934_s16 + $0x150] sm:$0xf0] }
 0x6cf   : > { %v5221_v13 = vor.u32 %v6214_v9, %v5218_v11  ;;  %v6296_v9 = vld [vmem:[%s6934_s16 + $0x3a4] sm:$0xf]  ;;  %v5560_v11 = vld [vmem:[%s6934_s16 + $0x3a8] sm:$0xf] }
 0x6d0   : > { %2957 = vmatpush.bf16.msra.mxu0 %v5085_v59  ;;  %v6222_v59 = vld [vmem:[%s6934_s16 + $0x14c] sm:$0xf0] }
 0x6d1   : > { %2912 = vmatpush.bf16.msra.mxu1 %v5265_v21  ;;  %2929 = vmatpush.bf16.msrb.mxu2 %v5077_v4  ;;  %v6278_v21 = vld [vmem:[%s6934_s16 + $0x314] sm:$0xf]  ;;  %v5289_v4 = vor.u32 %v6239_v2, %v5288_v1  ;;  %v5217_v10 = vor.u32 %v6222_v59, %v5216_v8  ;;  %v6514_v1 = vld [vmem:[%s7910_s10] ss:$0 sm:$0xff]  ;;  %v5552_v59 = vld [vmem:[%s6934_s16 + $0x3a0] sm:$0xf] }
 0x6d4   : > { %3006 = vmatpush.bf16.msrb.mxu0 %v5549_v18  ;;  %v6198_v18 = vld [vmem:[%s6934_s16 + $0x94] sm:$0xf] }
 0x6d5   : > { %2913 = vmatpush.bf16.msra.mxu1 %v5201_v35  ;;  %2978 = vmatpush.bf16.msra.mxu2 %v5541_v12  ;;  %v5410_v35 = vld [vmem:[%s6934_s16 + $0x2d0] sm:$0xf0]  ;;  %v6223_v12 = vld [vmem:[%s6934_s16 + $0x154] sm:$0xf0] }
 0x6d9   : > { %2914 = vmatpush.bf16.msra.mxu1 %v5137_v46  ;;  %v5346_v46 = vld [vmem:[%s6934_s16 + $0x250] sm:$0xf0] }
 0x6da   : > { %v5349_v50 = vor.u32 %v6246_v44, %v5346_v46 }
 0x6dd   : > { %2915 = vmatpush.bf16.msra.mxu1 %v5073_v0  ;;  %v5282_v0 = vld [vmem:[%s6934_s16 + $0x1d0] sm:$0xf0] }
 0x6de   : > { %v5285_v3 = vor.u32 %v6230_v61, %v5282_v0 }
 0x6e1   : > { %2964 = vmatpush.bf16.msrb.mxu1 %v5537_v63  ;;  %v5224_v63 = vld [vmem:[%s6934_s16 + $0x118] sm:$0xf] }
 0x6e2   : > { %v5225_v14 = vor.u32 %v6223_v12, %v5224_v63 }
 0x6e5   : > { %2965 = vmatpush.bf16.msrb.mxu1 %v5473_v19 }
 0x72c   : > { %v2047_v25 = vpop.xlane.xlu2 %2046 }
 0x72d   : > { %v2057_v27 = vmul.f32 %v7390_v24, %v2047_v25  ;;  %v5477_v25 = vor.u32 %v6278_v21, %v5474_v22  ;;  %v5153_v21 = vor.u32 %v6206_v56, %v5152_v48  ;;  %v5154_v22 = vld [vmem:[%s6934_s16 + $0xd0] sm:$0xf0]  ;;  %v5488_v48 = vld [vmem:[%s6934_s16 + $0x320] sm:$0xf] }
 0x72e   : > { %v6288_v56 = vld [vmem:[%s6934_s16 + $0x35c] sm:$0xf0] }
 0x72f   : > { %v7394_v28 = vsub.f32 %v7336_v17, %v2057_v27  ;;  %v6279_v27 = vld [vmem:[%s6934_s16 + $0x31c] sm:$0xf]  ;;  %2979 = vmatpush.bf16.msra.mxu2 %v5477_v25  ;;  %v6207_v25 = vld [vmem:[%s6934_s16 + $0xd4] sm:$0xf0] }
 0x731   : > { %v2061_v54 = vmul.f32 %v7394_v28, %v7394_v28 }
 0x733   : > { %2063 = vadd.xlane.f32.xlu1 %v2061_v54  ;;  %v5482_v54 = vld [vmem:[%s6934_s16 + $0x358] sm:$0xf0] }
 0x734   : > { %v2049_v29 = vpop.xlane.xlu0 %2048 }
 0x735   : > { %v2058_v30 = vmul.f32 %v7390_v24, %v2049_v29  ;;  %v5481_v29 = vor.u32 %v6287_v26, %v5480_v23  ;;  %v5160_v23 = vld [vmem:[%s6934_s16 + $0x98] sm:$0xf] }
 0x737   : > { %v7400_v31 = vsub.f32 %v7340_v20, %v2058_v30  ;;  %v5209_v20 = vor.u32 %v6221_v38, %v5208_v37  ;;  %v5485_v30 = vor.u32 %v6279_v27, %v5482_v54  ;;  %v6271_v37 = vld [vmem:[%s6934_s16 + $0x2d4] sm:$0xf0]  ;;  %v5413_v38 = vor.u32 %v6262_v33, %v5410_v35  ;;  %v5088_v33 = vld [vmem:[%s6934_s16 + $0x10] sm:$0xf] }
 0x738   : > { %v5417_v39 = vor.u32 %v6271_v37, %v5416_v36  ;;  %v5157_v27 = vor.u32 %v6198_v18, %v5154_v22  ;;  %v5161_v54 = vor.u32 %v6207_v25, %v5160_v23  ;;  %v6182_v36 = vld [vmem:[%s6934_s16 + $0x14] sm:$0xf]  ;;  %v5490_v22 = vld [vmem:[%s6934_s16 + $0x360] sm:$0xf0]  ;;  %v5496_v23 = vld [vmem:[%s6934_s16 + $0x328] sm:$0xf] }
 0x739   : > { %v2062_v17 = vmul.f32 %v7400_v31, %v7400_v31  ;;  %2941 = vmatpush.bf16.msrb.mxu3 %v5209_v20  ;;  %v6263_v20 = vld [vmem:[%s6934_s16 + $0x29c] sm:$0xf]  ;;  %3007 = vmatpush.bf16.msrb.mxu0 %v5485_v30  ;;  %v5090_v37 = vld [vmem:[%s6934_s16 + $0x50] sm:$0xf0]  ;;  %v6289_v25 = vld [vmem:[%s6934_s16 + $0x364] sm:$0xf0] }
 0x73a   : > { %v5421_v41 = vor.u32 %v6263_v20, %v5418_v40  ;;  %2980 = vmatpush.bf16.msra.mxu2 %v5413_v38  ;;  %v5162_v30 = vld [vmem:[%s6934_s16 + $0xd8] sm:$0xf0]  ;;  %v5096_v38 = vld [vmem:[%s6934_s16 + $0x18] sm:$0xf] }
 0x73b   : > { %2065 = vadd.xlane.f32.xlu2 %v2062_v17  ;;  %v5408_v17 = vld [vmem:[%s6934_s16 + $0x290] sm:$0xf]  ;;  %v6191_v20 = vld [vmem:[%s6934_s16 + $0x54] sm:$0xf0]  ;;  %v6183_v40 = vld [vmem:[%s6934_s16 + $0x1c] sm:$0xf] }
 0x73c   : > { %v5409_v34 = vor.u32 %v6270_v32, %v5408_v17  ;;  %v5097_v42 = vor.u32 %v6191_v20, %v5096_v38  ;;  %v6265_v38 = vld [vmem:[%s6934_s16 + $0x2ac] sm:$0xf] }
 0x73d   : > { %2942 = vmatpush.bf16.msrb.mxu3 %v5145_v52  ;;  %v6247_v52 = vld [vmem:[%s6934_s16 + $0x21c] sm:$0xf]  ;;  %3008 = vmatpush.bf16.msrb.mxu0 %v5421_v41 }
 0x73e   : > { %2966 = vmatpush.bf16.msrb.mxu1 %v5409_v34  ;;  %v5357_v57 = vor.u32 %v6247_v52, %v5354_v53  ;;  %2981 = vmatpush.bf16.msra.mxu2 %v5349_v50  ;;  %v6190_v34 = vld [vmem:[%s6934_s16 + $0x4c] sm:$0xf0]  ;;  %v5098_v41 = vld [vmem:[%s6934_s16 + $0x58] sm:$0xf0] }
 0x73f   : > { %v5089_v35 = vor.u32 %v6190_v34, %v5088_v33  ;;  %v5101_v43 = vor.u32 %v6183_v40, %v5098_v41  ;;  %v6264_v34 = vld [vmem:[%s6934_s16 + $0x2a4] sm:$0xf]  ;;  %v5360_v41 = vld [vmem:[%s6934_s16 + $0x220] sm:$0xf] }
 0x741   : > { %2943 = vmatpush.bf16.msrb.mxu3 %v5081_v5  ;;  %v6231_v5 = vld [vmem:[%s6934_s16 + $0x19c] sm:$0xf]  ;;  %3009 = vmatpush.bf16.msrb.mxu0 %v5357_v57 }
 0x742   : > { %2967 = vmatpush.bf16.msrb.mxu1 %v5345_v45  ;;  %v5293_v7 = vor.u32 %v6231_v5, %v5290_v6  ;;  %2982 = vmatpush.bf16.msra.mxu2 %v5285_v3  ;;  %v6515_v5 = vld [vmem:[%s7911_s29] ss:$0 sm:$0xff] }
 0x745   : > { %2992 = vmatpush.bf16.msra.mxu3 %v5545_v16  ;;  %v5226_v16 = vld [vmem:[%s6934_s16 + $0x158] sm:$0xf0]  ;;  %3010 = vmatpush.bf16.msrb.mxu0 %v5293_v7 }
 0x746   : > { %2968 = vmatpush.bf16.msrb.mxu1 %v5281_v62  ;;  %v5229_v55 = vor.u32 %v6215_v15, %v5226_v16  ;;  %2983 = vmatpush.bf16.msra.mxu2 %v5221_v13  ;;  %v6305_v13 = vld [vmem:[%s6934_s16 + $0x3e4] sm:$0xf0] }
 0x747   : > { %v5561_v18 = vor.u32 %v6305_v13, %v5560_v11  ;;  %v5240_v11 = vld [vmem:[%s6934_s16 + $0x128] sm:$0xf] }
 0x748   : > { %v6225_v13 = vld [vmem:[%s6934_s16 + $0x164] sm:$0xf0] }
 0x749   : > { %2993 = vmatpush.bf16.msra.mxu3 %v5481_v29  ;;  %v6199_v29 = vld [vmem:[%s6934_s16 + $0x9c] sm:$0xf]  ;;  %3011 = vmatpush.bf16.msrb.mxu0 %v5229_v55 }
 0x74a   : > { %2969 = vmatpush.bf16.msrb.mxu1 %v5217_v10  ;;  %v5165_v17 = vor.u32 %v6199_v29, %v5162_v30  ;;  %2984 = vmatpush.bf16.msra.mxu2 %v5157_v27  ;;  %v5554_v10 = vld [vmem:[%s6934_s16 + $0x3e0] sm:$0xf0]  ;;  %v5498_v27 = vld [vmem:[%s6934_s16 + $0x368] sm:$0xf0]  ;;  %v5424_v30 = vld [vmem:[%s6934_s16 + $0x2a0] sm:$0xf] }
 0x74b   : > { %v5557_v55 = vor.u32 %v6296_v9, %v5554_v10  ;;  %v6216_v9 = vld [vmem:[%s6934_s16 + $0x124] sm:$0xf] }
 0x74c   : > { %v5234_v10 = vld [vmem:[%s6934_s16 + $0x160] sm:$0xf0] }
 0x74d   : > { %2994 = vmatpush.bf16.msra.mxu3 %v5417_v39  ;;  %v5093_v39 = vor.u32 %v6182_v36, %v5090_v37  ;;  %3012 = vmatpush.bf16.msrb.mxu0 %v5165_v17  ;;  %v6272_v17 = vld [vmem:[%s6934_s16 + $0x2dc] sm:$0xf0]  ;;  %v5432_v36 = vld [vmem:[%s6934_s16 + $0x2a8] sm:$0xf] }
 0x74e   : > { %2970 = vmatpush.bf16.msrb.mxu1 %v5153_v21  ;;  %v6280_v21 = vld [vmem:[%s6934_s16 + $0x324] sm:$0xf]  ;;  %v6273_v37 = vld [vmem:[%s6934_s16 + $0x2e4] sm:$0xf0]  ;;  %v5425_v20 = vor.u32 %v6272_v17, %v5424_v30  ;;  %v6192_v17 = vld [vmem:[%s6934_s16 + $0x5c] sm:$0xf0] }
 0x74f   : > { %2985 = vmatpush.bf16.msra.mxu2 %v5093_v39  ;;  %v5493_v29 = vor.u32 %v6280_v21, %v5490_v22  ;;  %v5434_v39 = vld [vmem:[%s6934_s16 + $0x2e8] sm:$0xf0]  ;;  %v6200_v21 = vld [vmem:[%s6934_s16 + $0xa4] sm:$0xf] }
 0x750   : > { %v5170_v22 = vld [vmem:[%s6934_s16 + $0xe0] sm:$0xf0] }
 0x751   : > { %2995 = vmatpush.bf16.msra.mxu3 %v5353_v51  ;;  %3013 = vmatpush.bf16.msrb.mxu0 %v5101_v43  ;;  %v5433_v43 = vor.u32 %v6273_v37, %v5432_v36  ;;  %v5173_v30 = vor.u32 %v6200_v21, %v5170_v22  ;;  %v5112_v36 = vld [vmem:[%s6934_s16 + $0x28] sm:$0xf]  ;;  %v6250_v21 = vld [vmem:[%s6934_s16 + $0x234] sm:$0xf] }
 0x752   : > { %2971 = vmatpush.bf16.msrb.mxu1 %v5089_v35  ;;  %v5426_v35 = vld [vmem:[%s6934_s16 + $0x2e0] sm:$0xf0]  ;;  %v6193_v37 = vld [vmem:[%s6934_s16 + $0x64] sm:$0xf0]  ;;  %v5378_v22 = vld [vmem:[%s6934_s16 + $0x270] sm:$0xf0] }
 0x753   : > { %v5429_v40 = vor.u32 %v6264_v34, %v5426_v35 }
 0x755   : > { %2996 = vmatpush.bf16.msra.mxu3 %v5289_v4 }
 0x759   : > { %2997 = vmatpush.bf16.msra.mxu3 %v5225_v14  ;;  %v6297_v14 = vld [vmem:[%s6934_s16 + $0x3ac] sm:$0xf] }
 0x75d   : > { %2998 = vmatpush.bf16.msra.mxu3 %v5161_v54  ;;  %v5489_v54 = vor.u32 %v6288_v56, %v5488_v48  ;;  %v5168_v48 = vld [vmem:[%s6934_s16 + $0xa0] sm:$0xf] }
 0x75e   : > { %v6208_v56 = vld [vmem:[%s6934_s16 + $0xdc] sm:$0xf0] }
 0x761   : > { %2999 = vmatpush.bf16.msra.mxu3 %v5097_v42  ;;  %v6256_v42 = vld [vmem:[%s6934_s16 + $0x25c] sm:$0xf0] }
 0x7a6   : > { %v2064_v19 = vpop.xlane.xlu1 %2063 }
 0x7a7   : > { %v2067_v26 = vmul.f32 %v2064_v19, %v7390_v24 }
 0x7a9   : > { %v2069_v32 = vadd.f32 1e-05, %v2067_v26  ;;  %v6281_v26 = vld [vmem:[%s6934_s16 + $0x32c] sm:$0xf] }
 0x7aa   : > { %v5501_v33 = vor.u32 %v6281_v26, %v5498_v27  ;;  %v6201_v26 = vld [vmem:[%s6934_s16 + $0xac] sm:$0xf] }
 0x7ab   : > { %6553 = vrsqrt.f32 %v2069_v32  ;;  %vm2077_vm4 = vweird.f32 %v2069_v32  ;;  %v5178_v27 = vld [vmem:[%s6934_s16 + $0xe8] sm:$0xf0] }
 0x7ac   : > { %v5181_v35 = vor.u32 %v6201_v26, %v5178_v27  ;;  %v6251_v26 = vld [vmem:[%s6934_s16 + $0x23c] sm:$0xf] }
 0x7ad   : > { %v5386_v27 = vld [vmem:[%s6934_s16 + $0x278] sm:$0xf0] }
 0x7ae   : > { %v2066_v44 = vpop.xlane.xlu2 %2065 }
 0x7af   : > { %v2068_v45 = vmul.f32 %v2066_v44, %v7390_v24  ;;  %v5437_v44 = vor.u32 %v6265_v38, %v5434_v39  ;;  %v6185_v38 = vld [vmem:[%s6934_s16 + $0x2c] sm:$0xf] }
 0x7b0   : > { %v5114_v39 = vld [vmem:[%s6934_s16 + $0x68] sm:$0xf0] }
 0x7b1   : > { %v6554_v46 = vpop.eup %6553  ;;  %v2070_v47 = vadd.f32 1e-05, %v2068_v45  ;;  %v6248_v45 = vld [vmem:[%s6934_s16 + $0x224] sm:$0xf] }
 0x7b2   : > { %v2072_v49 = vmul.f32 %v6554_v46, %v2069_v32  ;;  %vm2078_vm3 = vweird.f32 %v6554_v46  ;;  %v5497_v32 = vor.u32 %v6289_v25, %v5496_v23  ;;  %v5176_v23 = vld [vmem:[%s6934_s16 + $0xa8] sm:$0xf] }
 0x7b3   : > { %6555 = vrsqrt.f32 %v2070_v47  ;;  %vm2079_vm5 = vmor %vm2077_vm4, %vm2078_vm3  ;;  %vm2087_vm7 = vweird.f32 %v2070_v47  ;;  %v6209_v25 = vld [vmem:[%s6934_s16 + $0xe4] sm:$0xf0] }
 0x7b4   : > { %v2073_v50 = vmul.f32 %v6554_v46, %v2072_v49  ;;  %v6257_v49 = vld [vmem:[%s6934_s16 + $0x264] sm:$0xf0]  ;;  %v5177_v34 = vor.u32 %v6209_v25, %v5176_v23  ;;  %v5384_v23 = vld [vmem:[%s6934_s16 + $0x238] sm:$0xf] }
 0x7b5   : > { %v6259_v25 = vld [vmem:[%s6934_s16 + $0x274] sm:$0xf0] }
 0x7b6   : > { %v2074_v51 = vmul.f32 0.5, %v2073_v50  ;;  %v6249_v50 = vld [vmem:[%s6934_s16 + $0x22c] sm:$0xf] }
 0x7b8   : > { %v2075_v52 = vsub.f32 1.5, %v2074_v51  ;;  %v5370_v51 = vld [vmem:[%s6934_s16 + $0x268] sm:$0xf0] }
 0x7b9   : > { %v6556_v53 = vpop.eup %6555 }
 0x7ba   : > { %v2076_v57 = vmul.f32 %v6554_v46, %v2075_v52  ;;  %v2082_v58 = vmul.f32 %v6556_v53, %v2070_v47  ;;  %vm2088_vm6 = vweird.f32 %v6556_v53  ;;  %v5368_v47 = vld [vmem:[%s6934_s16 + $0x228] sm:$0xf]  ;;  %v5361_v52 = vor.u32 %v6256_v42, %v5360_v41  ;;  %v6298_v41 = vld [vmem:[%s6934_s16 + $0x3b4] sm:$0xf] }
 0x7bb   : > { %vm2089_vm8 = vmor %vm2087_vm7, %vm2088_vm6  ;;  %v5570_v42 = vld [vmem:[%s6934_s16 + $0x3f0] sm:$0xf0] }
 0x7bc   : > { %v2083_v60 = vmul.f32 %v6556_v53, %v2082_v58  ;;  %v2080_v61 = vsel %vm2079_vm5, %v6554_v46, %v2076_v57  ;;  %v5362_v46 = vld [vmem:[%s6934_s16 + $0x260] sm:$0xf0]  ;;  %v5296_v57 = vld [vmem:[%s6934_s16 + $0x1a0] sm:$0xf] }
 0x7bd   : > { %v2091_v2 = vmul.f32 %v2080_v61, %v7394_v28  ;;  %v6304_v28 = vld [vmem:[%s6934_s16 + $0x3dc] sm:$0xf0]  ;;  %v5373_v61 = vor.u32 %v6249_v50, %v5370_v51  ;;  %v5113_v50 = vor.u32 %v6193_v37, %v5112_v36  ;;  %v5117_v51 = vor.u32 %v6185_v38, %v5114_v39  ;;  %v5320_v36 = vld [vmem:[%s6934_s16 + $0x1b8] sm:$0xf]  ;;  %v6235_v38 = vld [vmem:[%s6934_s16 + $0x1bc] sm:$0xf] }
 0x7be   : > { %v2084_v62 = vmul.f32 0.5, %v2083_v60  ;;  %v5553_v16 = vor.u32 %v6304_v28, %v5552_v59  ;;  %v6240_v58 = vld [vmem:[%s6934_s16 + $0x1dc] sm:$0xf0]  ;;  %v5369_v60 = vor.u32 %v6257_v49, %v5368_v47  ;;  %v6299_v47 = vld [vmem:[%s6934_s16 + $0x3bc] sm:$0xf] }
 0x7bf   : > { %v2096_v6 = vmul.f32 %v6514_v1, %v2091_v2  ;;  %v6241_v2 = vld [vmem:[%s6934_s16 + $0x1e4] sm:$0xf0]  ;;  %v5578_v49 = vld [vmem:[%s6934_s16 + $0x3f8] sm:$0xf0]  ;;  %v6243_v37 = vld [vmem:[%s6934_s16 + $0x1f4] sm:$0xf0] }
 0x7c0   : > { %v2085_v0 = vsub.f32 1.5, %v2084_v62  ;;  %v6232_v62 = vld [vmem:[%s6934_s16 + $0x1a4] sm:$0xf]  ;;  %v5322_v39 = vld [vmem:[%s6934_s16 + $0x1f8] sm:$0xf0] }
 0x7c1   : > { %v7511_v63 = vadd.f32 %v6515_v5, %v2096_v6 }
 0x7c2   : > { %v2086_v3 = vmul.f32 %v6556_v53, %v2085_v0  ;;  %v5298_v0 = vld [vmem:[%s6934_s16 + $0x1e0] sm:$0xf0] }
 0x7c3   : > { %v5301_v6 = vor.u32 %v6232_v62, %v5298_v0  ;;  %v6282_v62 = vld [vmem:[%s6934_s16 + $0x334] sm:$0xf] }
 0x7c4   : > { %v2090_v4 = vsel %vm2089_vm8, %v6556_v53, %v2086_v3  ;;  %v5365_v53 = vor.u32 %v6248_v45, %v5362_v46  ;;  %v6233_v3 = vld [vmem:[%s6934_s16 + $0x1ac] sm:$0xf]  ;;  %v6307_v46 = vld [vmem:[%s6934_s16 + $0x3f4] sm:$0xf0]  ;;  %v5506_v0 = vld [vmem:[%s6934_s16 + $0x370] sm:$0xf0] }
 0x7c5   : > { %v2092_v7 = vmul.f32 %v2090_v4, %v7400_v31  ;;  %v5562_v31 = vld [vmem:[%s6934_s16 + $0x3e8] sm:$0xf0] }
 0x7c6   : > { %v5565_v19 = vor.u32 %v6297_v14, %v5562_v31  ;;  %v5306_v4 = vld [vmem:[%s6934_s16 + $0x1e8] sm:$0xf0] }
 0x7c7   : > { %v2097_v8 = vmul.f32 %v6514_v1, %v2092_v7  ;;  %v5304_v1 = vld [vmem:[%s6934_s16 + $0x1a8] sm:$0xf]  ;;  %v5232_v7 = vld [vmem:[%s6934_s16 + $0x120] sm:$0xf]  ;;  %v5309_v28 = vor.u32 %v6233_v3, %v5306_v4  ;;  %v6217_v14 = vld [vmem:[%s6934_s16 + $0x12c] sm:$0xf] }
 0x7c8   : > { %v5305_v59 = vor.u32 %v6241_v2, %v5304_v1  ;;  %v5242_v31 = vld [vmem:[%s6934_s16 + $0x168] sm:$0xf0]  ;;  %v5512_v1 = vld [vmem:[%s6934_s16 + $0x338] sm:$0xf]  ;;  %v6283_v3 = vld [vmem:[%s6934_s16 + $0x33c] sm:$0xf] }
 0x7c9   : > { %v7513_v12 = vadd.f32 %v6515_v5, %v2097_v8  ;;  %v5297_v5 = vor.u32 %v6240_v58, %v5296_v57  ;;  %v6224_v8 = vld [vmem:[%s6934_s16 + $0x15c] sm:$0xf0]  ;;  %v5504_v57 = vld [vmem:[%s6934_s16 + $0x330] sm:$0xf]  ;;  %v6291_v2 = vld [vmem:[%s6934_s16 + $0x374] sm:$0xf0] }
 0x7ca   : > { %v6290_v58 = vld [vmem:[%s6934_s16 + $0x36c] sm:$0xf0]  ;;  %v5514_v4 = vld [vmem:[%s6934_s16 + $0x378] sm:$0xf0] }
 0x7cb   : > { %v7520_v15 = vpack.c.bf16 %v7513_v12, %v7511_v63 }
 0x7cd   : > { %2916 = vmatmul.bf16.vlgmr.msra.gmra.mxu1 %v7520_v15  ;;  %2930 = vmatmul.bf16.vlgmr.msrb.gmra.mxu2 %v7520_v15 }
 0x7ce   : > { %2944 = vmatmul.bf16.vlgmr.msrb.gmra.mxu3 %v7520_v15  ;;  %2958 = vmatmul.bf16.vlgmr.msra.gmra.mxu0 %v7520_v15 }
 0x7cf   : > { %3020 = vmatpush.bf16.msra.mxu1 %v5553_v16  ;;  %3034 = vmatpush.bf16.msrb.mxu2 %v5557_v55  ;;  %v5233_v16 = vor.u32 %v6224_v8, %v5232_v7  ;;  %v5237_v55 = vor.u32 %v6216_v9, %v5234_v10  ;;  %v5440_v7 = vld [vmem:[%s6934_s16 + $0x2b0] sm:$0xf]  ;;  %v6266_v9 = vld [vmem:[%s6934_s16 + $0x2b4] sm:$0xf] }
 0x7d0   : > { %3048 = vmatpush.bf16.msrb.mxu3 %v5561_v18  ;;  %3062 = vmatpush.bf16.msra.mxu0 %v5565_v19  ;;  %v5241_v18 = vor.u32 %v6225_v13, %v5240_v11  ;;  %v5245_v19 = vor.u32 %v6217_v14, %v5242_v31  ;;  %v6274_v8 = vld [vmem:[%s6934_s16 + $0x2ec] sm:$0xf0]  ;;  %v5442_v10 = vld [vmem:[%s6934_s16 + $0x2f0] sm:$0xf0]  ;;  %v5448_v11 = vld [vmem:[%s6934_s16 + $0x2b8] sm:$0xf] }
 0x7d1   : > { %v6275_v13 = vld [vmem:[%s6934_s16 + $0x2f4] sm:$0xf0]  ;;  %v6267_v14 = vld [vmem:[%s6934_s16 + $0x2bc] sm:$0xf] }
 0x7d2   : > { %v5450_v31 = vld [vmem:[%s6934_s16 + $0x2f8] sm:$0xf0] }
 0x7d3   : > { %3021 = vmatpush.bf16.msra.mxu1 %v5489_v54  ;;  %3035 = vmatpush.bf16.msrb.mxu2 %v5493_v29  ;;  %v5104_v54 = vld [vmem:[%s6934_s16 + $0x20] sm:$0xf]  ;;  %v5169_v29 = vor.u32 %v6208_v56, %v5168_v48  ;;  %v5376_v48 = vld [vmem:[%s6934_s16 + $0x230] sm:$0xf] }
 0x7d4   : > { %3049 = vmatpush.bf16.msrb.mxu3 %v5497_v32  ;;  %3063 = vmatpush.bf16.msra.mxu0 %v5501_v33  ;;  %v6184_v32 = vld [vmem:[%s6934_s16 + $0x24] sm:$0xf]  ;;  %v6258_v56 = vld [vmem:[%s6934_s16 + $0x26c] sm:$0xf0] }
 0x7d5   : > { %v5106_v33 = vld [vmem:[%s6934_s16 + $0x60] sm:$0xf0] }
 0x7d6   : > { %v5109_v45 = vor.u32 %v6184_v32, %v5106_v33  ;;  %v5385_v32 = vor.u32 %v6259_v25, %v5384_v23  ;;  %v5389_v33 = vor.u32 %v6251_v26, %v5386_v27  ;;  %v6314_v23 = vld [vmem:[%s6986_s0 + $0x30] sm:$0xff] }
 0x7d7   : > { %3022 = vmatpush.bf16.msra.mxu1 %v5425_v20  ;;  %3036 = vmatpush.bf16.msrb.mxu2 %v5429_v40  ;;  %v5568_v20 = vld [vmem:[%s6934_s16 + $0x3b0] sm:$0xf] }
 0x7d8   : > { %3050 = vmatpush.bf16.msrb.mxu3 %v5433_v43  ;;  %3064 = vmatpush.bf16.msra.mxu0 %v5437_v44  ;;  %v6306_v40 = vld [vmem:[%s6934_s16 + $0x3ec] sm:$0xf0]  ;;  %v5576_v43 = vld [vmem:[%s6934_s16 + $0x3b8] sm:$0xf]  ;;  %v5105_v44 = vor.u32 %v6192_v17, %v5104_v54  ;;  %v5377_v54 = vor.u32 %v6258_v56, %v5376_v48 }
 0x7d9   : > { %v6242_v17 = vld [vmem:[%s6934_s16 + $0x1ec] sm:$0xf0] }
 0x7da   : > { %v6338_v25 = vld [vmem:[%s6986_s0 + $0xf0] sm:$0xff] }
 0x7db   : > { %3023 = vmatpush.bf16.msra.mxu1 %v5361_v52  ;;  %3037 = vmatpush.bf16.msrb.mxu2 %v5365_v53  ;;  %v5569_v52 = vor.u32 %v6306_v40, %v5568_v20  ;;  %v5573_v53 = vor.u32 %v6298_v41, %v5570_v42  ;;  %v5248_v41 = vld [vmem:[%s6934_s16 + $0x130] sm:$0xf] }
 0x7dc   : > { %3051 = vmatpush.bf16.msrb.mxu3 %v5369_v60  ;;  %3065 = vmatpush.bf16.msra.mxu0 %v5373_v61  ;;  %v5577_v60 = vor.u32 %v6307_v46, %v5576_v43  ;;  %v5581_v61 = vor.u32 %v6299_v47, %v5578_v49  ;;  %v6226_v42 = vld [vmem:[%s6934_s16 + $0x16c] sm:$0xf0]  ;;  %v5321_v43 = vor.u32 %v6243_v37, %v5320_v36  ;;  %v5250_v46 = vld [vmem:[%s6934_s16 + $0x170] sm:$0xf0]  ;;  %v5256_v47 = vld [vmem:[%s6934_s16 + $0x138] sm:$0xf] }
 0x7dd   : > { %2972 = vmatmul.bf16.vlgmr.msrb.gmra.mxu1 %v7520_v15  ;;  %2986 = vmatmul.bf16.vlgmr.msra.gmra.mxu2 %v7520_v15  ;;  %v6227_v49 = vld [vmem:[%s6934_s16 + $0x174] sm:$0xf0]  ;;  %v6322_v26 = vld [vmem:[%s6986_s0 + $0x70] sm:$0xff] }
 0x7de   : > { %3000 = vmatmul.bf16.vlgmr.msra.gmra.mxu3 %v7520_v15  ;;  %3014 = vmatmul.bf16.vlgmr.msrb.gmra.mxu0 %v7520_v15  ;;  %v6330_v27 = vld [vmem:[%s6986_s0 + $0xb0] sm:$0xff]  ;;  %v6335_v36 = vld [vmem:[%s6986_s0 + $0xd8] sm:$0xff] }
 0x7df   : > { %3024 = vmatpush.bf16.msra.mxu1 %v5297_v5  ;;  %3038 = vmatpush.bf16.msrb.mxu2 %v5301_v6  ;;  %v5505_v5 = vor.u32 %v6290_v58, %v5504_v57  ;;  %v5509_v6 = vor.u32 %v6282_v62, %v5506_v0  ;;  %v5184_v57 = vld [vmem:[%s6934_s16 + $0xb0] sm:$0xf]  ;;  %v6202_v62 = vld [vmem:[%s6934_s16 + $0xb4] sm:$0xf]  ;;  %v6319_v37 = vld [vmem:[%s6986_s0 + $0x58] sm:$0xff] }
 0x7e0   : > { %3052 = vmatpush.bf16.msrb.mxu3 %v5305_v59  ;;  %3066 = vmatpush.bf16.msra.mxu0 %v5309_v28  ;;  %v5513_v59 = vor.u32 %v6291_v2, %v5512_v1  ;;  %v5517_v28 = vor.u32 %v6283_v3, %v5514_v4  ;;  %v6210_v58 = vld [vmem:[%s6934_s16 + $0xec] sm:$0xf0]  ;;  %v5186_v0 = vld [vmem:[%s6934_s16 + $0xf0] sm:$0xf0]  ;;  %v5192_v1 = vld [vmem:[%s6934_s16 + $0xb8] sm:$0xf] }
 0x7e1   : > { %v6211_v2 = vld [vmem:[%s6934_s16 + $0xf4] sm:$0xf0]  ;;  %v6203_v3 = vld [vmem:[%s6934_s16 + $0xbc] sm:$0xf] }
 0x7e2   : > { %v5194_v4 = vld [vmem:[%s6934_s16 + $0xf8] sm:$0xf0] }
 0x7e3   : > { %3025 = vmatpush.bf16.msra.mxu1 %v5233_v16  ;;  %3039 = vmatpush.bf16.msrb.mxu2 %v5237_v55  ;;  %v5441_v16 = vor.u32 %v6274_v8, %v5440_v7  ;;  %v5445_v55 = vor.u32 %v6266_v9, %v5442_v10  ;;  %v5120_v7 = vld [vmem:[%s6934_s16 + $0x30] sm:$0xf]  ;;  %v6186_v9 = vld [vmem:[%s6934_s16 + $0x34] sm:$0xf] }
 0x7e4   : > { %3053 = vmatpush.bf16.msrb.mxu3 %v5241_v18  ;;  %3067 = vmatpush.bf16.msra.mxu0 %v5245_v19  ;;  %v5449_v18 = vor.u32 %v6275_v13, %v5448_v11  ;;  %v5453_v19 = vor.u32 %v6267_v14, %v5450_v31  ;;  %v6194_v8 = vld [vmem:[%s6934_s16 + $0x6c] sm:$0xf0]  ;;  %v5122_v10 = vld [vmem:[%s6934_s16 + $0x70] sm:$0xf0]  ;;  %v5128_v11 = vld [vmem:[%s6934_s16 + $0x38] sm:$0xf] }
 0x7e5   : > { %v6195_v13 = vld [vmem:[%s6934_s16 + $0x74] sm:$0xf0]  ;;  %v6187_v14 = vld [vmem:[%s6934_s16 + $0x3c] sm:$0xf] }
 0x7e6   : > { %v5130_v31 = vld [vmem:[%s6934_s16 + $0x78] sm:$0xf0]  ;;  %v5129_v48 = vor.u32 %v6195_v13, %v5128_v11  ;;  %v6366_v11 = vld [vmem:[%s6986_s0 + $0x1d0] sm:$0xff] }
 0x7e7   : > { %3026 = vmatpush.bf16.msra.mxu1 %v5169_v29  ;;  %3040 = vmatpush.bf16.msrb.mxu2 %v5173_v30  ;;  %v5381_v29 = vor.u32 %v6250_v21, %v5378_v22  ;;  %v5312_v30 = vld [vmem:[%s6934_s16 + $0x1b0] sm:$0xf]  ;;  %v5133_v56 = vor.u32 %v6187_v14, %v5130_v31  ;;  %v6323_v21 = vld [vmem:[%s6986_s0 + $0x78] sm:$0xff]  ;;  %v6341_v31 = vld [vmem:[%s6986_s0 + $0x108] sm:$0xff] }
 0x7e8   : > { %3054 = vmatpush.bf16.msrb.mxu3 %v5177_v34  ;;  %3068 = vmatpush.bf16.msra.mxu0 %v5181_v35  ;;  %v6234_v34 = vld [vmem:[%s6934_s16 + $0x1b4] sm:$0xf]  ;;  %v5313_v20 = vor.u32 %v6242_v17, %v5312_v30  ;;  %v6331_v22 = vld [vmem:[%s6986_s0 + $0xb8] sm:$0xff]  ;;  %v6321_v30 = vld [vmem:[%s6986_s0 + $0x68] sm:$0xff] }
 0x7e9   : > { %v5314_v35 = vld [vmem:[%s6934_s16 + $0x1f0] sm:$0xf0]  ;;  %v6329_v17 = vld [vmem:[%s6986_s0 + $0xa8] sm:$0xff] }
 0x7ea   : > { %v5317_v40 = vor.u32 %v6234_v34, %v5314_v35  ;;  %v6328_v34 = vld [vmem:[%s6986_s0 + $0xa0] sm:$0xff]  ;;  %v6311_v35 = vld [vmem:[%s6986_s0 + $0x18] sm:$0xff]  ;;  %v6350_v13 = vld [vmem:[%s6986_s0 + $0x150] sm:$0xff] }
 0x7eb   : > { %3027 = vmatpush.bf16.msra.mxu1 %v5105_v44  ;;  %3041 = vmatpush.bf16.msrb.mxu2 %v5109_v45  ;;  %v5325_v44 = vor.u32 %v6235_v38, %v5322_v39  ;;  %v6218_v45 = vld [vmem:[%s6934_s16 + $0x134] sm:$0xf]  ;;  %v6327_v38 = vld [vmem:[%s6986_s0 + $0x98] sm:$0xff] }
 0x7ec   : > { %3055 = vmatpush.bf16.msrb.mxu3 %v5113_v50  ;;  %3069 = vmatpush.bf16.msra.mxu0 %v5117_v51  ;;  %v6219_v50 = vld [vmem:[%s6934_s16 + $0x13c] sm:$0xf]  ;;  %v6310_v39 = vld [vmem:[%s6986_s0 + $0x10] sm:$0xff] }
 0x7ed   : > { %v5258_v51 = vld [vmem:[%s6934_s16 + $0x178] sm:$0xf0]  ;;  %v6358_v14 = vld [vmem:[%s6986_s0 + $0x190] sm:$0xff] }
 0x7ee   : > { %3028 = vmatmul.bf16.vlgmr.msra.gmra.mxu1 %v7520_v15  ;;  %3042 = vmatmul.bf16.vlgmr.msrb.gmra.mxu2 %v7520_v15 }
 0x7ef   : > { %3076 = vmatpush.bf16.msrb.mxu1 %v5569_v52  ;;  %3090 = vmatpush.bf16.msra.mxu2 %v5573_v53  ;;  %v5249_v52 = vor.u32 %v6226_v42, %v5248_v41  ;;  %v5253_v53 = vor.u32 %v6218_v45, %v5250_v46  ;;  %v6326_v41 = vld [vmem:[%s6986_s0 + $0x90] sm:$0xff]  ;;  %v6309_v42 = vld [vmem:[%s6986_s0 + $0x8] sm:$0xff]  ;;  %v6308_v46 = vld [vmem:[%s6986_s0] sm:$0xff] }
 0x7f0   : > { %3104 = vmatpush.bf16.msra.mxu3 %v5577_v60  ;;  %3118 = vmatpush.bf16.msrb.mxu0 %v5581_v61  ;;  %v5257_v60 = vor.u32 %v6227_v49, %v5256_v47  ;;  %v5261_v61 = vor.u32 %v6219_v50, %v5258_v51  ;;  %v6325_v45 = vld [vmem:[%s6986_s0 + $0x88] sm:$0xff]  ;;  %v6332_v47 = vld [vmem:[%s6986_s0 + $0xc0] sm:$0xff]  ;;  %v6347_v49 = vld [vmem:[%s6986_s0 + $0x138] sm:$0xff] }
 0x7f1   : > { %3056 = vmatmul.bf16.vlgmr.msrb.gmra.mxu3 %v7520_v15  ;;  %3070 = vmatmul.bf16.vlgmr.msra.gmra.mxu0 %v7520_v15  ;;  %v6371_v50 = vld [vmem:[%s6986_s0 + $0x1f8] sm:$0xff]  ;;  %v6316_v51 = vld [vmem:[%s6986_s0 + $0x40] sm:$0xff] }
 0x7f3   : > { %3077 = vmatpush.bf16.msrb.mxu1 %v5505_v5  ;;  %3091 = vmatpush.bf16.msra.mxu2 %v5509_v6  ;;  %v5185_v5 = vor.u32 %v6210_v58, %v5184_v57  ;;  %v5189_v6 = vor.u32 %v6202_v62, %v5186_v0  ;;  %v6363_v57 = vld [vmem:[%s6986_s0 + $0x1b8] sm:$0xff]  ;;  %v6346_v58 = vld [vmem:[%s6986_s0 + $0x130] sm:$0xff]  ;;  %v6345_v0 = vld [vmem:[%s6986_s0 + $0x128] sm:$0xff] }
 0x7f4   : > { %3105 = vmatpush.bf16.msra.mxu3 %v5513_v59  ;;  %3119 = vmatpush.bf16.msrb.mxu0 %v5517_v28  ;;  %v5193_v59 = vor.u32 %v6211_v2, %v5192_v1  ;;  %v5197_v28 = vor.u32 %v6203_v3, %v5194_v4  ;;  %v6362_v62 = vld [vmem:[%s6986_s0 + $0x1b0] sm:$0xff]  ;;  %v6369_v1 = vld [vmem:[%s6986_s0 + $0x1e8] sm:$0xff]  ;;  %v6344_v4 = vld [vmem:[%s6986_s0 + $0x120] sm:$0xff] }
 0x7f5   : > { %v6353_v2 = vld [vmem:[%s6986_s0 + $0x168] sm:$0xff] }
 0x7f6   : > { %v6361_v3 = vld [vmem:[%s6986_s0 + $0x1a8] sm:$0xff] }
 0x7f7   : > { %3078 = vmatpush.bf16.msrb.mxu1 %v5441_v16  ;;  %3092 = vmatpush.bf16.msra.mxu2 %v5445_v55  ;;  %v5121_v16 = vor.u32 %v6194_v8, %v5120_v7  ;;  %v5125_v55 = vor.u32 %v6186_v9, %v5122_v10  ;;  %v6360_v7 = vld [vmem:[%s6986_s0 + $0x1a0] sm:$0xff]  ;;  %v6343_v8 = vld [vmem:[%s6986_s0 + $0x118] sm:$0xff]  ;;  %v6342_v10 = vld [vmem:[%s6986_s0 + $0x110] sm:$0xff] }
 0x7f8   : > { %3106 = vmatpush.bf16.msra.mxu3 %v5449_v18  ;;  %3120 = vmatpush.bf16.msrb.mxu0 %v5453_v19  ;;  %v6315_v18 = vld [vmem:[%s6986_s0 + $0x38] sm:$0xff] }
 0x7f9   : > { %v6339_v19 = vld [vmem:[%s6986_s0 + $0xf8] sm:$0xff] }
 0x7fa   : > { %v6359_v9 = vld [vmem:[%s6986_s0 + $0x198] sm:$0xff] }
 0x7fb   : > { %3079 = vmatpush.bf16.msrb.mxu1 %v5377_v54  ;;  %3093 = vmatpush.bf16.msra.mxu2 %v5381_v29  ;;  %v6313_v54 = vld [vmem:[%s6986_s0 + $0x28] sm:$0xff] }
 0x7fc   : > { %3107 = vmatpush.bf16.msra.mxu3 %v5385_v32  ;;  %3121 = vmatpush.bf16.msrb.mxu0 %v5389_v33  ;;  %v6337_v29 = vld [vmem:[%s6986_s0 + $0xe8] sm:$0xff]  ;;  %v6336_v32 = vld [vmem:[%s6986_s0 + $0xe0] sm:$0xff] }
 0x7fd   : > { %v6320_v33 = vld [vmem:[%s6986_s0 + $0x60] sm:$0xff] }
 0x7ff   : > { %3080 = vmatpush.bf16.msrb.mxu1 %v5313_v20  ;;  %3094 = vmatpush.bf16.msra.mxu2 %v5317_v40  ;;  %v6334_v20 = vld [vmem:[%s6986_s0 + $0xd0] sm:$0xff] }
 0x800   : > { %3108 = vmatpush.bf16.msra.mxu3 %v5321_v43  ;;  %3122 = vmatpush.bf16.msrb.mxu0 %v5325_v44  ;;  %v6318_v40 = vld [vmem:[%s6986_s0 + $0x50] sm:$0xff]  ;;  %v6333_v43 = vld [vmem:[%s6986_s0 + $0xc8] sm:$0xff] }
 0x801   : > { %v6317_v44 = vld [vmem:[%s6986_s0 + $0x48] sm:$0xff] }
 0x803   : > { %3081 = vmatpush.bf16.msrb.mxu1 %v5249_v52  ;;  %3095 = vmatpush.bf16.msra.mxu2 %v5253_v53  ;;  %v6324_v52 = vld [vmem:[%s6986_s0 + $0x80] sm:$0xff]  ;;  %v6355_v53 = vld [vmem:[%s6986_s0 + $0x178] sm:$0xff] }
 0x804   : > { %3109 = vmatpush.bf16.msra.mxu3 %v5257_v60  ;;  %3123 = vmatpush.bf16.msrb.mxu0 %v5261_v61  ;;  %v6370_v60 = vld [vmem:[%s6986_s0 + $0x1f0] sm:$0xff] }
 0x805   : > { %v6354_v61 = vld [vmem:[%s6986_s0 + $0x170] sm:$0xff] }
 0x807   : > { %3082 = vmatpush.bf16.msrb.mxu1 %v5185_v5  ;;  %3096 = vmatpush.bf16.msra.mxu2 %v5189_v6  ;;  %v6368_v5 = vld [vmem:[%s6986_s0 + $0x1e0] sm:$0xff] }
 0x808   : > { %3110 = vmatpush.bf16.msra.mxu3 %v5193_v59  ;;  %3124 = vmatpush.bf16.msrb.mxu0 %v5197_v28  ;;  %v6352_v6 = vld [vmem:[%s6986_s0 + $0x160] sm:$0xff]  ;;  %v6367_v59 = vld [vmem:[%s6986_s0 + $0x1d8] sm:$0xff] }
 0x809   : > { %v6351_v28 = vld [vmem:[%s6986_s0 + $0x158] sm:$0xff] }
 0x80b   : > { %3083 = vmatpush.bf16.msrb.mxu1 %v5121_v16  ;;  %3097 = vmatpush.bf16.msra.mxu2 %v5125_v55  ;;  %v6365_v16 = vld [vmem:[%s6986_s0 + $0x1c8] sm:$0xff] }
 0x80c   : > { %3111 = vmatpush.bf16.msra.mxu3 %v5129_v48  ;;  %3125 = vmatpush.bf16.msrb.mxu0 %v5133_v56  ;;  %v6349_v55 = vld [vmem:[%s6986_s0 + $0x148] sm:$0xff]  ;;  %v6340_v56 = vld [vmem:[%s6986_s0 + $0x100] sm:$0xff] }
 0x80d   : > { %v6357_v48 = vld [vmem:[%s6986_s0 + $0x188] sm:$0xff] }
 0x80e   : > { %3084 = vmatmul.bf16.vlgmr.msrb.gmra.mxu1 %v7520_v15  ;;  %3098 = vmatmul.bf16.vlgmr.msra.gmra.mxu2 %v7520_v15 }
 0x80f   : > { %4208 = vmatpush.bf16.msra.mxu1 %v6315_v18  ;;  %3112 = vmatmul.bf16.vlgmr.msra.gmra.mxu3 %v7520_v15  ;;  %v6364_v18 = vld [vmem:[%s6986_s0 + $0x1c0] sm:$0xff] }
 0x810   : > { %4250 = vmatpush.bf16.msra.mxu0 %v6339_v19  ;;  %4222 = vmatpush.bf16.msrb.mxu2 %v6323_v21  ;;  %v6348_v19 = vld [vmem:[%s6986_s0 + $0x140] sm:$0xff] }
 0x811   : > { %3126 = vmatmul.bf16.vlgmr.msrb.gmra.mxu0 %v7520_v15  ;;  %4236 = vmatpush.bf16.msrb.mxu3 %v6331_v22  ;;  %v6312_v15 = vld [vmem:[%s6986_s0 + $0x20] sm:$0xff]  ;;  %v7723_v22 = vld [vmem:[%s6972_s25] sm:$0xff] }
 0x812   : > { %v6356_v21 = vld [vmem:[%s6986_s0 + $0x180] sm:$0xff] }
 0x813   : > { %4209 = vmatpush.bf16.msra.mxu1 %v6314_v23 }
 0x814   : > { %4251 = vmatpush.bf16.msra.mxu0 %v6338_v25  ;;  %4223 = vmatpush.bf16.msrb.mxu2 %v6322_v26  ;;  %v2236_v26 = vperm.slane %v7723_v22, 0 }
 0x815   : > { %4237 = vmatpush.bf16.msrb.mxu3 %v6330_v27  ;;  %v2239_v27 = vperm.slane %v7723_v22, 3 }
 0x817   : > { %4210 = vmatpush.bf16.msra.mxu1 %v6313_v54 }
 0x818   : > { %4252 = vmatpush.bf16.msra.mxu0 %v6337_v29  ;;  %4224 = vmatpush.bf16.msrb.mxu2 %v6321_v30 }
 0x819   : > { %4238 = vmatpush.bf16.msrb.mxu3 %v6329_v17 }
 0x81b   : > { %4211 = vmatpush.bf16.msra.mxu1 %v6312_v15 }
 0x81c   : > { %4253 = vmatpush.bf16.msra.mxu0 %v6336_v32  ;;  %4225 = vmatpush.bf16.msrb.mxu2 %v6320_v33  ;;  %v2237_v32 = vperm.slane %v7723_v22, 1 }
 0x81d   : > { %4239 = vmatpush.bf16.msrb.mxu3 %v6328_v34 }
 0x81f   : > { %4212 = vmatpush.bf16.msra.mxu1 %v6311_v35  ;;  %v2238_v35 = vperm.slane %v7723_v22, 2 }
 0x820   : > { %4254 = vmatpush.bf16.msra.mxu0 %v6335_v36  ;;  %4226 = vmatpush.bf16.msrb.mxu2 %v6319_v37 }
 0x821   : > { %4240 = vmatpush.bf16.msrb.mxu3 %v6327_v38 }
 0x823   : > { %4213 = vmatpush.bf16.msra.mxu1 %v6310_v39 }
 0x824   : > { %4255 = vmatpush.bf16.msra.mxu0 %v6334_v20  ;;  %4227 = vmatpush.bf16.msrb.mxu2 %v6318_v40  ;;  %v6379_v40 = vld [vmem:[%s6986_s0 + $0x238] sm:$0xff] }
 0x825   : > { %4241 = vmatpush.bf16.msrb.mxu3 %v6326_v41 }
 0x827   : > { %4214 = vmatpush.bf16.msra.mxu1 %v6309_v42 }
 0x828   : > { %4256 = vmatpush.bf16.msra.mxu0 %v6333_v43  ;;  %4228 = vmatpush.bf16.msrb.mxu2 %v6317_v44  ;;  %v6403_v43 = vld [vmem:[%s6986_s0 + $0x2f8] sm:$0xff] }
 0x829   : > { %4242 = vmatpush.bf16.msrb.mxu3 %v6325_v45 }
 0x82b   : > { %4215 = vmatpush.bf16.msra.mxu1 %v6308_v46 }
 0x82c   : > { %4257 = vmatpush.bf16.msra.mxu0 %v6332_v47  ;;  %4229 = vmatpush.bf16.msrb.mxu2 %v6316_v51 }
 0x82d   : > { %4243 = vmatpush.bf16.msrb.mxu3 %v6324_v52  ;;  %v6378_v52 = vld [vmem:[%s6986_s0 + $0x230] sm:$0xff] }
 0x82f   : > { %4264 = vmatpush.bf16.msrb.mxu1 %v6347_v49 }
 0x830   : > { %4306 = vmatpush.bf16.msrb.mxu0 %v6371_v50  ;;  %4278 = vmatpush.bf16.msra.mxu2 %v6355_v53 }
 0x831   : > { %4292 = vmatpush.bf16.msra.mxu3 %v6363_v57 }
 0x833   : > { %4265 = vmatpush.bf16.msrb.mxu1 %v6346_v58 }
 0x834   : > { %4307 = vmatpush.bf16.msrb.mxu0 %v6370_v60  ;;  %4279 = vmatpush.bf16.msra.mxu2 %v6354_v61  ;;  %v6402_v60 = vld [vmem:[%s6986_s0 + $0x2f0] sm:$0xff] }
 0x835   : > { %4293 = vmatpush.bf16.msra.mxu3 %v6362_v62 }
 0x837   : > { %4266 = vmatpush.bf16.msrb.mxu1 %v6345_v0  ;;  %v6387_v0 = vld [vmem:[%s6986_s0 + $0x278] sm:$0xff] }
 0x838   : > { %4308 = vmatpush.bf16.msrb.mxu0 %v6369_v1  ;;  %4280 = vmatpush.bf16.msra.mxu2 %v6353_v2  ;;  %v2240_v2 = vperm.slane %v7723_v22, 4 }
 0x839   : > { %4294 = vmatpush.bf16.msra.mxu3 %v6361_v3  ;;  %v6395_v3 = vld [vmem:[%s6986_s0 + $0x2b8] sm:$0xff] }
 0x83b   : > { %4267 = vmatpush.bf16.msrb.mxu1 %v6344_v4 }
 0x83c   : > { %4309 = vmatpush.bf16.msrb.mxu0 %v6368_v5  ;;  %4281 = vmatpush.bf16.msra.mxu2 %v6352_v6  ;;  %v2243_v5 = vperm.slane %v7723_v22, 7  ;;  %v6377_v6 = vld [vmem:[%s6986_s0 + $0x228] sm:$0xff] }
 0x83d   : > { %4295 = vmatpush.bf16.msra.mxu3 %v6360_v7  ;;  %v6401_v7 = vld [vmem:[%s6986_s0 + $0x2e8] sm:$0xff] }
 0x83f   : > { %4268 = vmatpush.bf16.msrb.mxu1 %v6343_v8 }
 0x840   : > { %4310 = vmatpush.bf16.msrb.mxu0 %v6367_v59  ;;  %4282 = vmatpush.bf16.msra.mxu2 %v6351_v28  ;;  %v6386_v59 = vld [vmem:[%s6986_s0 + $0x270] sm:$0xff] }
 0x841   : > { %4296 = vmatpush.bf16.msra.mxu3 %v6359_v9 }
 0x843   : > { %4269 = vmatpush.bf16.msrb.mxu1 %v6342_v10  ;;  %v6394_v10 = vld [vmem:[%s6986_s0 + $0x2b0] sm:$0xff] }
 0x844   : > { %4311 = vmatpush.bf16.msrb.mxu0 %v6366_v11  ;;  %4283 = vmatpush.bf16.msra.mxu2 %v6350_v13 }
 0x845   : > { %4297 = vmatpush.bf16.msra.mxu3 %v6358_v14  ;;  %v6376_v14 = vld [vmem:[%s6986_s0 + $0x220] sm:$0xff] }
 0x847   : > { %4270 = vmatpush.bf16.msrb.mxu1 %v6341_v31  ;;  %v2241_v31 = vperm.slane %v7723_v22, 5 }
 0x848   : > { %4312 = vmatpush.bf16.msrb.mxu0 %v6365_v16  ;;  %4284 = vmatpush.bf16.msra.mxu2 %v6349_v55 }
 0x849   : > { %4298 = vmatpush.bf16.msra.mxu3 %v6357_v48  ;;  %v6400_v48 = vld [vmem:[%s6986_s0 + $0x2e0] sm:$0xff] }
 0x84a   : > { %v2917_v23 = vpop.f32.mrf.mxu1 }
 0x84b   : > { %4271 = vmatpush.bf16.msrb.mxu1 %v6340_v56  ;;  %v2959_v25 = vpop.f32.mrf.mxu0  ;;  %v2918_v29 = vadd.f32 %v2917_v23, %v2236_v26  ;;  %v2242_v56 = vperm.slane %v7723_v22, 6 }
 0x84c   : > { %4313 = vmatpush.bf16.msrb.mxu0 %v6364_v18  ;;  %4285 = vmatpush.bf16.msra.mxu2 %v6348_v19  ;;  %v2960_v17 = vadd.f32 %v2959_v25, %v2239_v27  ;;  %v6385_v19 = vld [vmem:[%s6986_s0 + $0x268] sm:$0xff] }
 0x84d   : > { %4299 = vmatpush.bf16.msra.mxu3 %v6356_v21  ;;  %v3132_v37 = vmax.f32 %v2918_v29, 0.0  ;;  %v6393_v25 = vld [vmem:[%s6986_s0 + $0x2a8] sm:$0xff] }
 0x84e   : > { %v3135_v39 = vmax.f32 %v2960_v17, 0.0  ;;  %v6399_v17 = vld [vmem:[%s6986_s0 + $0x2d8] sm:$0xff] }
 0x850   : > { %v2931_v54 = vpop.f32.mrf.mxu2 }
 0x851   : > { %v2945_v30 = vpop.f32.mrf.mxu3  ;;  %v2932_v41 = vadd.f32 %v2931_v54, %v2237_v32  ;;  %v6375_v54 = vld [vmem:[%s6986_s0 + $0x218] sm:$0xff] }
 0x852   : > { %v2919_v15 = vpop.f32.mrf.mxu1  ;;  %v2946_v44 = vadd.f32 %v2945_v30, %v2238_v35 }
 0x853   : > { %v2920_v33 = vadd.f32 %v2919_v15, %v2236_v26  ;;  %v2961_v34 = vpop.f32.mrf.mxu0  ;;  %v3133_v53 = vmax.f32 %v2932_v41, 0.0 }
 0x854   : > { %v2962_v36 = vadd.f32 %v2961_v34, %v2239_v27  ;;  %v3134_v61 = vmax.f32 %v2946_v44, 0.0 }
 0x855   : > { %v3148_v38 = vmax.f32 %v2920_v33, 0.0  ;;  %v6384_v33 = vld [vmem:[%s6986_s0 + $0x260] sm:$0xff] }
 0x856   : > { %v3151_v20 = vmax.f32 %v2962_v36, 0.0  ;;  %v6392_v36 = vld [vmem:[%s6986_s0 + $0x2a0] sm:$0xff] }
 0x857   : > { %v3164_v42 = vpack.c.bf16 %v3148_v38, %v3132_v37  ;;  %v6374_v38 = vld [vmem:[%s6986_s0 + $0x210] sm:$0xff] }
 0x858   : > { %v3167_v45 = vpack.c.bf16 %v3151_v20, %v3135_v39  ;;  %v2933_v46 = vpop.f32.mrf.mxu2 }
 0x859   : > { %v2934_v47 = vadd.f32 %v2933_v46, %v2237_v32  ;;  %v2947_v49 = vpop.f32.mrf.mxu3  ;;  %4216 = vmatmul.bf16.vlgmr.msra.gmra.mxu1 %v3164_v42 }
 0x85a   : > { %v2948_v50 = vadd.f32 %v2947_v49, %v2238_v35  ;;  %4258 = vmatmul.bf16.vlgmr.msra.gmra.mxu0 %v3167_v45  ;;  %4320 = vmatpush.bf16.msra.mxu1 %v6379_v40  ;;  %v2973_v51 = vpop.f32.mrf.mxu1  ;;  %v6398_v40 = vld [vmem:[%s6986_s0 + $0x2d0] sm:$0xff]  ;;  %v6383_v45 = vld [vmem:[%s6986_s0 + $0x258] sm:$0xff] }
 0x85b   : > { %v3149_v57 = vmax.f32 %v2934_v47, 0.0  ;;  %4362 = vmatpush.bf16.msra.mxu0 %v6403_v43  ;;  %v3015_v58 = vpop.f32.mrf.mxu0  ;;  %v2974_v28 = vadd.f32 %v2973_v51, %v2240_v2  ;;  %v7754_v43 = vld [vmem:[%s6972_s25 + $0x8] sm:$0xff]  ;;  %v6373_v51 = vld [vmem:[%s6986_s0 + $0x208] sm:$0xff] }
 0x85c   : > { %v3150_v62 = vmax.f32 %v2948_v50, 0.0  ;;  %v3016_v11 = vadd.f32 %v3015_v58, %v2243_v5  ;;  %v6391_v49 = vld [vmem:[%s6986_s0 + $0x298] sm:$0xff]  ;;  %v6382_v58 = vld [vmem:[%s6986_s0 + $0x250] sm:$0xff] }
 0x85d   : > { %v3165_v1 = vpack.c.bf16 %v3149_v57, %v3133_v53  ;;  %v3136_v21 = vmax.f32 %v2974_v28, 0.0  ;;  %v6397_v53 = vld [vmem:[%s6986_s0 + $0x2c8] sm:$0xff]  ;;  %v2247_v57 = vperm.slane %v7754_v43, 3 }
 0x85e   : > { %v3166_v4 = vpack.c.bf16 %v3150_v62, %v3134_v61  ;;  %4321 = vmatpush.bf16.msra.mxu1 %v6378_v52  ;;  %v3139_v26 = vmax.f32 %v3016_v11, 0.0  ;;  %v2244_v52 = vperm.slane %v7754_v43, 0  ;;  %v6372_v62 = vld [vmem:[%s6986_s0 + $0x200] sm:$0xff] }
 0x85f   : > { %4363 = vmatpush.bf16.msra.mxu0 %v6402_v60  ;;  %4230 = vmatmul.bf16.vlgmr.msrb.gmra.mxu2 %v3165_v1  ;;  %v6390_v60 = vld [vmem:[%s6986_s0 + $0x290] sm:$0xff] }
 0x860   : > { %4244 = vmatmul.bf16.vlgmr.msrb.gmra.mxu3 %v3166_v4  ;;  %4334 = vmatpush.bf16.msrb.mxu2 %v6387_v0  ;;  %v2987_v8 = vpop.f32.mrf.mxu2 }
 0x861   : > { %4348 = vmatpush.bf16.msrb.mxu3 %v6395_v3  ;;  %v3001_v9 = vpop.f32.mrf.mxu3  ;;  %v2988_v29 = vadd.f32 %v2987_v8, %v2241_v31  ;;  %v6411_v3 = vld [vmem:[%s6986_s0 + $0x338] sm:$0xff]  ;;  %v2245_v8 = vperm.slane %v7754_v43, 1 }
 0x862   : > { %4322 = vmatpush.bf16.msra.mxu1 %v6377_v6  ;;  %v2975_v13 = vpop.f32.mrf.mxu1  ;;  %v3002_v15 = vadd.f32 %v3001_v9, %v2242_v56  ;;  %v6435_v6 = vld [vmem:[%s6986_s0 + $0x3f8] sm:$0xff]  ;;  %v6389_v9 = vld [vmem:[%s6986_s0 + $0x288] sm:$0xff] }
 0x863   : > { %4364 = vmatpush.bf16.msra.mxu0 %v6401_v7  ;;  %v2976_v16 = vadd.f32 %v2975_v13, %v2240_v2  ;;  %v3017_v55 = vpop.f32.mrf.mxu0  ;;  %v3137_v39 = vmax.f32 %v2988_v29, 0.0  ;;  %v6396_v2 = vld [vmem:[%s6986_s0 + $0x2c0] sm:$0xff]  ;;  %v6381_v7 = vld [vmem:[%s6986_s0 + $0x248] sm:$0xff] }
 0x864   : > { %v3018_v18 = vadd.f32 %v3017_v55, %v2243_v5  ;;  %4335 = vmatpush.bf16.msrb.mxu2 %v6386_v59  ;;  %v3138_v41 = vmax.f32 %v3002_v15, 0.0  ;;  %v6410_v55 = vld [vmem:[%s6986_s0 + $0x330] sm:$0xff]  ;;  %v6409_v15 = vld [vmem:[%s6986_s0 + $0x328] sm:$0xff] }
 0x865   : > { %v3152_v23 = vmax.f32 %v2976_v16, 0.0  ;;  %4349 = vmatpush.bf16.msrb.mxu3 %v6394_v10  ;;  %v2246_v10 = vperm.slane %v7754_v43, 2 }
 0x866   : > { %v3155_v27 = vmax.f32 %v3018_v18, 0.0  ;;  %4323 = vmatpush.bf16.msra.mxu1 %v6376_v14  ;;  %v6434_v18 = vld [vmem:[%s6986_s0 + $0x3f0] sm:$0xff] }
 0x867   : > { %v3168_v30 = vpack.c.bf16 %v3152_v23, %v3136_v21  ;;  %4365 = vmatpush.bf16.msra.mxu0 %v6400_v48 }
 0x868   : > { %v3171_v22 = vpack.c.bf16 %v3155_v27, %v3139_v26  ;;  %4336 = vmatpush.bf16.msrb.mxu2 %v6385_v19  ;;  %v2989_v32 = vpop.f32.mrf.mxu2  ;;  %v6380_v19 = vld [vmem:[%s6986_s0 + $0x240] sm:$0xff]  ;;  %v6419_v27 = vld [vmem:[%s6986_s0 + $0x378] sm:$0xff] }
 0x869   : > { %4350 = vmatpush.bf16.msrb.mxu3 %v6393_v25  ;;  %v2990_v34 = vadd.f32 %v2989_v32, %v2241_v31  ;;  %v3003_v35 = vpop.f32.mrf.mxu3  ;;  %4272 = vmatmul.bf16.vlgmr.msrb.gmra.mxu1 %v3168_v30  ;;  %v6388_v26 = vld [vmem:[%s6986_s0 + $0x280] sm:$0xff]  ;;  %v6427_v30 = vld [vmem:[%s6986_s0 + $0x3b8] sm:$0xff] }
 0x86a   : > { %v3004_v37 = vadd.f32 %v3003_v35, %v2242_v56  ;;  %4314 = vmatmul.bf16.vlgmr.msrb.gmra.mxu0 %v3171_v22  ;;  %4324 = vmatpush.bf16.msra.mxu1 %v6375_v54 }
 0x86b   : > { %v3153_v20 = vmax.f32 %v2990_v34, 0.0  ;;  %4366 = vmatpush.bf16.msra.mxu0 %v6399_v17  ;;  %v3029_v44 = vpop.f32.mrf.mxu1 }
 0x86c   : > { %v3154_v42 = vmax.f32 %v3004_v37, 0.0  ;;  %4337 = vmatpush.bf16.msrb.mxu2 %v6384_v33  ;;  %v3030_v0 = vadd.f32 %v3029_v44, %v2244_v52  ;;  %v6433_v33 = vld [vmem:[%s6986_s0 + $0x3e8] sm:$0xff]  ;;  %v6407_v44 = vld [vmem:[%s6986_s0 + $0x318] sm:$0xff] }
 0x86d   : > { %v3169_v46 = vpack.c.bf16 %v3153_v20, %v3137_v39  ;;  %4351 = vmatpush.bf16.msrb.mxu3 %v6392_v36  ;;  %v6418_v36 = vld [vmem:[%s6986_s0 + $0x370] sm:$0xff]  ;;  %v6408_v20 = vld [vmem:[%s6986_s0 + $0x320] sm:$0xff] }
 0x86e   : > { %v3071_v47 = vpop.f32.mrf.mxu0  ;;  %v3170_v50 = vpack.c.bf16 %v3154_v42, %v3138_v41  ;;  %4325 = vmatpush.bf16.msra.mxu1 %v6374_v38  ;;  %v3140_v13 = vmax.f32 %v3030_v0, 0.0  ;;  %v6426_v38 = vld [vmem:[%s6986_s0 + $0x3b0] sm:$0xff]  ;;  %v6417_v41 = vld [vmem:[%s6986_s0 + $0x368] sm:$0xff] }
 0x86f   : > { %4367 = vmatpush.bf16.msra.mxu0 %v6398_v40  ;;  %4286 = vmatmul.bf16.vlgmr.msra.gmra.mxu2 %v3169_v46  ;;  %v3072_v4 = vadd.f32 %v3071_v47, %v2247_v57  ;;  %v6432_v40 = vld [vmem:[%s6986_s0 + $0x3e0] sm:$0xff]  ;;  %v6425_v42 = vld [vmem:[%s6986_s0 + $0x3a8] sm:$0xff]  ;;  %v6414_v0 = vld [vmem:[%s6986_s0 + $0x350] sm:$0xff] }
 0x870   : > { %4300 = vmatmul.bf16.vlgmr.msra.gmra.mxu3 %v3170_v50  ;;  %4338 = vmatpush.bf16.msrb.mxu2 %v6383_v45  ;;  %v6431_v45 = vld [vmem:[%s6986_s0 + $0x3d8] sm:$0xff]  ;;  %v6416_v46 = vld [vmem:[%s6986_s0 + $0x360] sm:$0xff] }
 0x871   : > { %4352 = vmatpush.bf16.msrb.mxu3 %v6391_v49  ;;  %v3043_v61 = vpop.f32.mrf.mxu2  ;;  %v3143_v31 = vmax.f32 %v3072_v4, 0.0  ;;  %v6424_v47 = vld [vmem:[%s6986_s0 + $0x3a0] sm:$0xff]  ;;  %v6406_v49 = vld [vmem:[%s6986_s0 + $0x310] sm:$0xff] }
 0x872   : > { %4326 = vmatpush.bf16.msra.mxu1 %v6373_v51  ;;  %v3044_v48 = vadd.f32 %v3043_v61, %v2245_v8  ;;  %v6430_v51 = vld [vmem:[%s6986_s0 + $0x3d0] sm:$0xff]  ;;  %v2251_v61 = vperm.slane %v7754_v43, 7 }
 0x873   : > { %4368 = vmatpush.bf16.msra.mxu0 %v6397_v53  ;;  %v3031_v5 = vpop.f32.mrf.mxu1  ;;  %v6415_v53 = vld [vmem:[%s6986_s0 + $0x358] sm:$0xff] }
 0x874   : > { %v3057_v1 = vpop.f32.mrf.mxu3  ;;  %4339 = vmatpush.bf16.msrb.mxu2 %v6382_v58  ;;  %v3032_v59 = vadd.f32 %v3031_v5, %v2244_v52  ;;  %v3141_v22 = vmax.f32 %v3044_v48, 0.0  ;;  %v2248_v58 = vperm.slane %v7754_v43, 4  ;;  %v6404_v5 = vld [vmem:[%s6986_s0 + $0x300] sm:$0xff] }
 0x875   : > { %4353 = vmatpush.bf16.msrb.mxu3 %v6390_v60  ;;  %v3058_v21 = vadd.f32 %v3057_v1, %v2246_v10  ;;  %v6405_v60 = vld [vmem:[%s6986_s0 + $0x308] sm:$0xff] }
 0x876   : > { %v3073_v28 = vpop.f32.mrf.mxu0  ;;  %4327 = vmatpush.bf16.msra.mxu1 %v6372_v62  ;;  %v3156_v14 = vmax.f32 %v3032_v59, 0.0  ;;  %v6429_v62 = vld [vmem:[%s6986_s0 + $0x3c8] sm:$0xff]  ;;  %v2249_v59 = vperm.slane %v7754_v43, 5 }
 0x877   : > { %v3074_v11 = vadd.f32 %v3073_v28, %v2247_v57  ;;  %4369 = vmatpush.bf16.msra.mxu0 %v6396_v2  ;;  %v3142_v34 = vmax.f32 %v3058_v21, 0.0  ;;  %v6423_v57 = vld [vmem:[%s6986_s0 + $0x398] sm:$0xff]  ;;  %v6422_v2 = vld [vmem:[%s6986_s0 + $0x390] sm:$0xff] }
 0x878   : > { %4340 = vmatpush.bf16.msrb.mxu2 %v6381_v7  ;;  %v3172_v56 = vpack.c.bf16 %v3156_v14, %v3140_v13  ;;  %v6421_v14 = vld [vmem:[%s6986_s0 + $0x388] sm:$0xff] }
 0x879   : > { %v3159_v16 = vmax.f32 %v3074_v11, 0.0  ;;  %4354 = vmatpush.bf16.msrb.mxu3 %v6389_v9  ;;  %v3045_v25 = vpop.f32.mrf.mxu2  ;;  %v2250_v11 = vperm.slane %v7754_v43, 6 }
 0x87a   : > { %4376 = vmatpush.bf16.msrb.mxu1 %v6411_v3  ;;  %v3046_v54 = vadd.f32 %v3045_v25, %v2245_v8  ;;  %v6428_v8 = vld [vmem:[%s6986_s0 + $0x3c0] sm:$0xff] }
 0x87b   : > { %4418 = vmatpush.bf16.msrb.mxu0 %v6435_v6  ;;  %v3175_v23 = vpack.c.bf16 %v3159_v16, %v3143_v31  ;;  %4328 = vmatmul.bf16.vlgmr.msra.gmra.mxu1 %v3172_v56 }
 0x87c   : > { %v3059_v29 = vpop.f32.mrf.mxu3  ;;  %v3157_v32 = vmax.f32 %v3046_v54, 0.0  ;;  %4341 = vmatpush.bf16.msrb.mxu2 %v6380_v19  ;;  %v6412_v19 = vld [vmem:[%s6986_s0 + $0x340] sm:$0xff] }
 0x87d   : > { %v3060_v17 = vadd.f32 %v3059_v29, %v2246_v10  ;;  %4370 = vmatmul.bf16.vlgmr.msra.gmra.mxu0 %v3175_v23  ;;  %4355 = vmatpush.bf16.msrb.mxu3 %v6388_v26  ;;  %v6413_v10 = vld [vmem:[%s6986_s0 + $0x348] sm:$0xff]  ;;  %v6420_v26 = vld [vmem:[%s6986_s0 + $0x380] sm:$0xff] }
 0x87e   : > { %4377 = vmatpush.bf16.msrb.mxu1 %v6410_v55  ;;  %v3173_v37 = vpack.c.bf16 %v3157_v32, %v3141_v22 }
 0x87f   : > { %4419 = vmatpush.bf16.msrb.mxu0 %v6434_v18  ;;  %v3158_v35 = vmax.f32 %v3060_v17, 0.0 }
 0x880   : > { %4390 = vmatpush.bf16.msra.mxu2 %v6419_v27 }
 0x881   : > { %4404 = vmatpush.bf16.msra.mxu3 %v6427_v30  ;;  %v3174_v39 = vpack.c.bf16 %v3158_v35, %v3142_v34  ;;  %4342 = vmatmul.bf16.vlgmr.msrb.gmra.mxu2 %v3173_v37 }
 0x882   : > { %4378 = vmatpush.bf16.msrb.mxu1 %v6409_v15 }
 0x883   : > { %4420 = vmatpush.bf16.msrb.mxu0 %v6433_v33  ;;  %4356 = vmatmul.bf16.vlgmr.msrb.gmra.mxu3 %v3174_v39 }
 0x884   : > { %4391 = vmatpush.bf16.msra.mxu2 %v6418_v36 }
 0x885   : > { %4405 = vmatpush.bf16.msra.mxu3 %v6426_v38 }
 0x886   : > { %4379 = vmatpush.bf16.msrb.mxu1 %v6408_v20 }
 0x887   : > { %4421 = vmatpush.bf16.msrb.mxu0 %v6432_v40  ;;  %v6516_v40 = vld [vmem:[%s797_s20] ss:$0 sm:$0xff] }
 0x888   : > { %4392 = vmatpush.bf16.msra.mxu2 %v6417_v41 }
 0x889   : > { %4406 = vmatpush.bf16.msra.mxu3 %v6425_v42 }
 0x88a   : > { %4380 = vmatpush.bf16.msrb.mxu1 %v6407_v44 }
 0x88b   : > { %v3085_v50 = vpop.f32.mrf.mxu1  ;;  %4422 = vmatpush.bf16.msrb.mxu0 %v6431_v45 }
 0x88c   : > { %4393 = vmatpush.bf16.msra.mxu2 %v6416_v46  ;;  %v3086_v3 = vadd.f32 %v3085_v50, %v2248_v58 }
 0x88d   : > { %4407 = vmatpush.bf16.msra.mxu3 %v6424_v47 }
 0x88e   : > { %v3127_v52 = vpop.f32.mrf.mxu0  ;;  %4381 = vmatpush.bf16.msrb.mxu1 %v6406_v49  ;;  %v3144_v31 = vmax.f32 %v3086_v3, 0.0 }
 0x88f   : > { %4423 = vmatpush.bf16.msrb.mxu0 %v6430_v51  ;;  %v3128_v6 = vadd.f32 %v3127_v52, %v2251_v61 }
 0x890   : > { %4394 = vmatpush.bf16.msra.mxu2 %v6415_v53 }
 0x891   : > { %v3099_v1 = vpop.f32.mrf.mxu2  ;;  %4408 = vmatpush.bf16.msra.mxu3 %v6423_v57  ;;  %v3147_v55 = vmax.f32 %v3128_v6, 0.0 }
 0x892   : > { %v3113_v4 = vpop.f32.mrf.mxu3  ;;  %4382 = vmatpush.bf16.msrb.mxu1 %v6405_v60  ;;  %v3100_v56 = vadd.f32 %v3099_v1, %v2249_v59 }
 0x893   : > { %v3087_v7 = vpop.f32.mrf.mxu1  ;;  %4424 = vmatpush.bf16.msrb.mxu0 %v6429_v62  ;;  %v3114_v21 = vadd.f32 %v3113_v4, %v2250_v11 }
 0x894   : > { %v3088_v28 = vadd.f32 %v3087_v7, %v2248_v58  ;;  %4395 = vmatpush.bf16.msra.mxu2 %v6414_v0  ;;  %v3145_v29 = vmax.f32 %v3100_v56, 0.0 }
 0x895   : > { %4409 = vmatpush.bf16.msra.mxu3 %v6422_v2  ;;  %v3146_v17 = vmax.f32 %v3114_v21, 0.0 }
 0x896   : > { %v3129_v9 = vpop.f32.mrf.mxu0  ;;  %v3160_v16 = vmax.f32 %v3088_v28, 0.0  ;;  %4383 = vmatpush.bf16.msrb.mxu1 %v6404_v5 }
 0x897   : > { %v3130_v13 = vadd.f32 %v3129_v9, %v2251_v61  ;;  %4425 = vmatpush.bf16.msrb.mxu0 %v6428_v8 }
 0x898   : > { %v3176_v18 = vpack.c.bf16 %v3160_v16, %v3144_v31  ;;  %4396 = vmatpush.bf16.msra.mxu2 %v6413_v10 }
 0x899   : > { %v3163_v48 = vmax.f32 %v3130_v13, 0.0  ;;  %v3101_v25 = vpop.f32.mrf.mxu2  ;;  %4410 = vmatpush.bf16.msra.mxu3 %v6421_v14 }
 0x89a   : > { %v3102_v43 = vadd.f32 %v3101_v25, %v2249_v59  ;;  %v3115_v27 = vpop.f32.mrf.mxu3  ;;  %4384 = vmatmul.bf16.vlgmr.msrb.gmra.mxu1 %v3176_v18 }
 0x89b   : > { %v3179_v23 = vpack.c.bf16 %v3163_v48, %v3147_v55  ;;  %v3116_v54 = vadd.f32 %v3115_v27, %v2250_v11 }
 0x89c   : > { %v3161_v30 = vmax.f32 %v3102_v43, 0.0  ;;  %4397 = vmatpush.bf16.msra.mxu2 %v6412_v19 }
 0x89d   : > { %4426 = vmatmul.bf16.vlgmr.msrb.gmra.mxu0 %v3179_v23  ;;  %v3162_v15 = vmax.f32 %v3116_v54, 0.0  ;;  %4411 = vmatpush.bf16.msra.mxu3 %v6420_v26 }
 0x89e   : > { %v3177_v22 = vpack.c.bf16 %v3161_v30, %v3145_v29 }
 0x89f   : > { %v3178_v32 = vpack.c.bf16 %v3162_v15, %v3146_v17 }
 0x8a0   : > { %4398 = vmatmul.bf16.vlgmr.msra.gmra.mxu2 %v3177_v22 }
 0x8a1   : > { %4412 = vmatmul.bf16.vlgmr.msra.gmra.mxu3 %v3178_v32 }
 0x8d6   : > { %v4217_v33 = vpop.f32.mrf.mxu1 }
 0x8d7   : > { %v4259_v36 = vpop.f32.mrf.mxu0  ;;  %v4218_v42 = vadd.f32 %v6516_v40, %v4217_v33 }
 0x8de   : > { %v4219_v37 = vpop.f32.mrf.mxu1 }
 0x8df   : > { %v4261_v20 = vpop.f32.mrf.mxu0  ;;  %v4220_v51 = vadd.f32 %v6516_v40, %v4219_v37 }
 0x8e2   : > { %v4231_v34 = vpop.f32.mrf.mxu2 }
 0x8e3   : > { %v4245_v35 = vpop.f32.mrf.mxu3  ;;  %v4232_v44 = vadd.f32 %v4231_v34, %v4218_v42 }
 0x8e5   : > { %v4246_v49 = vadd.f32 %v4245_v35, %v4232_v44 }
 0x8e6   : > { %v4273_v41 = vpop.f32.mrf.mxu1 }
 0x8e7   : > { %v4315_v47 = vpop.f32.mrf.mxu0  ;;  %v4260_v52 = vadd.f32 %v4259_v36, %v4246_v49 }
 0x8e9   : > { %v4274_v58 = vadd.f32 %v4273_v41, %v4260_v52 }
 0x8ea   : > { %v4233_v38 = vpop.f32.mrf.mxu2 }
 0x8eb   : > { %v4247_v39 = vpop.f32.mrf.mxu3  ;;  %v4234_v53 = vadd.f32 %v4233_v38, %v4220_v51 }
 0x8ed   : > { %v4248_v60 = vadd.f32 %v4247_v39, %v4234_v53 }
 0x8ee   : > { %v4275_v50 = vpop.f32.mrf.mxu1 }
 0x8ef   : > { %v4317_v62 = vpop.f32.mrf.mxu0  ;;  %v4262_v2 = vadd.f32 %v4261_v20, %v4248_v60 }
 0x8f1   : > { %v4276_v4 = vadd.f32 %v4275_v50, %v4262_v2 }
 0x8f2   : > { %v4287_v45 = vpop.f32.mrf.mxu2 }
 0x8f3   : > { %v4301_v46 = vpop.f32.mrf.mxu3  ;;  %v4288_v0 = vadd.f32 %v4287_v45, %v4274_v58 }
 0x8f5   : > { %v4302_v3 = vadd.f32 %v4301_v46, %v4288_v0 }
 0x8f7   : > { %v4316_v6 = vadd.f32 %v4315_v47, %v4302_v3  ;;  %v6518_v3 = vld [vmem:[%s803_s26] ss:$0 sm:$0xff] }
 0x8f8   : > { %v4329_v1 = vpop.f32.mrf.mxu1 }
 0x8f9   : > { %v4330_v9 = vadd.f32 %v4329_v1, %v4316_v6  ;;  %v6517_v1 = vld [vmem:[%s800_s21] ss:$0 sm:$0xff]  ;;  %s7915_s21 = sld [smem:[#allocation25_spill]] (!%p6094_p10) }
 0x8fa   : > { %v4289_v57 = vpop.f32.mrf.mxu2  ;;  %v4371_v59 = vpop.f32.mrf.mxu0 }
 0x8fb   : > { %v4303_v61 = vpop.f32.mrf.mxu3  ;;  %v4290_v7 = vadd.f32 %v4289_v57, %v4276_v4 }
 0x8fd   : > { %v4304_v10 = vadd.f32 %v4303_v61, %v4290_v7 }
 0x8ff   : > { %v4318_v13 = vadd.f32 %v4317_v62, %v4304_v10 }
 0x900   : > { %v4331_v28 = vpop.f32.mrf.mxu1 }
 0x901   : > { %v4332_v56 = vadd.f32 %v4331_v28, %v4318_v13 }
 0x902   : > { %v4373_v55 = vpop.f32.mrf.mxu0 }
 0x904   : > { %v4343_v5 = vpop.f32.mrf.mxu2 }
 0x905   : > { %v4344_v11 = vadd.f32 %v4343_v5, %v4330_v9 }
 0x906   : > { %v4357_v8 = vpop.f32.mrf.mxu3 }
 0x907   : > { %v4358_v31 = vadd.f32 %v4357_v8, %v4344_v11 }
 0x909   : > { %v4372_v19 = vadd.f32 %v4371_v59, %v4358_v31 }
 0x90c   : > { %v4345_v14 = vpop.f32.mrf.mxu2 }
 0x90d   : > { %v4346_v18 = vadd.f32 %v4345_v14, %v4332_v56 }
 0x90e   : > { %v4359_v16 = vpop.f32.mrf.mxu3 }
 0x90f   : > { %v4360_v25 = vadd.f32 %v4359_v16, %v4346_v18 }
 0x911   : > { %v4374_v30 = vadd.f32 %v4373_v55, %v4360_v25 }
 0x917   : > { %v4385_v48 = vpop.f32.mrf.mxu1 }
 0x918   : > { %v4386_v21 = vadd.f32 %v4385_v48, %v4372_v19 }
 0x91a   : > { %v4427_v27 = vpop.f32.mrf.mxu0 }
 0x91f   : > { %v4387_v29 = vpop.f32.mrf.mxu1 }
 0x920   : > { %v4388_v15 = vadd.f32 %v4387_v29, %v4374_v30 }
 0x922   : > { %v4429_v36 = vpop.f32.mrf.mxu0 }
 0x923   : > { %v4399_v23 = vpop.f32.mrf.mxu2 }
 0x924   : > { %v4400_v26 = vadd.f32 %v4399_v23, %v4386_v21  ;;  %v4413_v43 = vpop.f32.mrf.mxu3 }
 0x926   : > { %v4414_v54 = vadd.f32 %v4413_v43, %v4400_v26 }
 0x928   : > { %v4428_v17 = vadd.f32 %v4427_v27, %v4414_v54 }
 0x92a   : > { %v4432_v22 = vadd.f32 %v4428_v17, %v7511_v63 }
 0x92b   : > { %v4401_v32 = vpop.f32.mrf.mxu2 }
 0x92c   : > { %v4402_v33 = vadd.f32 %v4401_v32, %v4388_v15  ;;  %4436 = vadd.xlane.f32.xlu1 %v4432_v22  ;;  %v4415_v34 = vpop.f32.mrf.mxu3 }
 0x92e   : > { %v4416_v35 = vadd.f32 %v4415_v34, %v4402_v33 }
 0x930   : > { %v4430_v37 = vadd.f32 %v4429_v36, %v4416_v35 }
 0x932   : > { %v4433_v38 = vadd.f32 %v4430_v37, %v7513_v12 }
 0x934   : > { %4438 = vadd.xlane.f32.xlu2 %v4433_v38 }
 0x99f   : > { %v4437_v39 = vpop.xlane.xlu1 %4436 }
 0x9a0   : > { %v4440_v20 = vmul.f32 %v4437_v39, %v7390_v24 }
 0x9a2   : > { %v4442_v40 = vsub.f32 %v4432_v22, %v4440_v20 }
 0x9a4   : > { %v4444_v41 = vmul.f32 %v4442_v40, %v4442_v40 }
 0x9a6   : > { %4446 = vadd.xlane.f32.xlu0 %v4444_v41 }
 0x9a7   : > { %v4439_v42 = vpop.xlane.xlu2 %4438 }
 0x9a8   : > { %v4441_v44 = vmul.f32 %v4439_v42, %v7390_v24 }
 0x9aa   : > { %v4443_v63 = vsub.f32 %v4433_v38, %v4441_v44 }
 0x9ac   : > { %v4445_v45 = vmul.f32 %v4443_v63, %v4443_v63 }
 0x9ae   : > { %4448 = vadd.xlane.f32.xlu1 %v4445_v45 }
 0xa19   : > { %v4447_v46 = vpop.xlane.xlu0 %4446 }
 0xa1a   : > { %v4450_v47 = vmul.f32 %v4447_v46, %v7390_v24 }
 0xa1c   : > { %v4452_v49 = vadd.f32 1e-05, %v4450_v47 }
 0xa1e   : > { %6557 = vrsqrt.f32 %v4452_v49  ;;  %vm4460_vm10 = vweird.f32 %v4452_v49 }
 0xa21   : > { %v4449_v12 = vpop.xlane.xlu1 %4448 }
 0xa22   : > { %v4451_v50 = vmul.f32 %v4449_v12, %v7390_v24 }
 0xa24   : > { %v6558_v51 = vpop.eup %6557  ;;  %v4453_v52 = vadd.f32 1e-05, %v4451_v50 }
 0xa25   : > { %v4455_v53 = vmul.f32 %v6558_v51, %v4452_v49  ;;  %vm4461_vm9 = vweird.f32 %v6558_v51 }
 0xa26   : > { %6559 = vrsqrt.f32 %v4453_v52  ;;  %vm4462_vm11 = vmor %vm4460_vm10, %vm4461_vm9  ;;  %vm4470_vm13 = vweird.f32 %v4453_v52 }
 0xa27   : > { %v4456_v57 = vmul.f32 %v6558_v51, %v4455_v53 }
 0xa29   : > { %v4457_v58 = vmul.f32 0.5, %v4456_v57 }
 0xa2b   : > { %v4458_v60 = vsub.f32 1.5, %v4457_v58 }
 0xa2c   : > { %v6560_v61 = vpop.eup %6559 }
 0xa2d   : > { %v4459_v62 = vmul.f32 %v6558_v51, %v4458_v60  ;;  %v4465_v0 = vmul.f32 %v6560_v61, %v4453_v52  ;;  %vm4471_vm12 = vweird.f32 %v6560_v61 }
 0xa2e   : > { %vm4472_vm14 = vmor %vm4470_vm13, %vm4471_vm12 }
 0xa2f   : > { %v4463_v24 = vsel %vm4462_vm11, %v6558_v51, %v4459_v62  ;;  %v4466_v2 = vmul.f32 %v6560_v61, %v4465_v0 }
 0xa30   : > { %v4474_v4 = vmul.f32 %v4463_v24, %v4442_v40 }
 0xa31   : > { %v4467_v5 = vmul.f32 0.5, %v4466_v2 }
 0xa32   : > { %v4479_v6 = vmul.f32 %v6517_v1, %v4474_v4 }
 0xa33   : > { %v4468_v7 = vsub.f32 1.5, %v4467_v5 }
 0xa34   : > { %v4484_v8 = vadd.f32 %v6518_v3, %v4479_v6 }
 0xa35   : > { %v4469_v59 = vmul.f32 %v6560_v61, %v4468_v7 }
 0xa36   : > { %4486 = vst [vmem:[#allocation2] sm:$0xff] %v4484_v8 }
 0xa37   : > { %v4473_v28 = vsel %vm4472_vm14, %v6560_v61, %v4469_v59 }
 0xa38   : > { %v4475_v9 = vmul.f32 %v4473_v28, %v4443_v63 }
 0xa3a   : > { %v4480_v10 = vmul.f32 %v6517_v1, %v4475_v9  ;;  %4491 = sbr.rel (%p6094_p10) target bundleno = 2765 (0xacd), region = 112 }
 0xa3c   : > { %v4485_v11 = vadd.f32 %v6518_v3, %v4480_v10 }
 0xa3e   : > { %4487 = vst [vmem:[#allocation2 + $0x8] sm:$0xff] %v4485_v11 }
 0xa3f   : > { %v4492_v13 = vrot.slane %v4484_v8, 4  ;;  %v4506_v14 = vrot.slane %v4485_v11, 4  ;;  %v6702_v31 = vmov 8.0   ;;  %vm4513_vm0 = vcmask 1040384   ;;  %v6561_v15 = vld [vmem:[%s7915_s21] ss:$0 sm:$0xff] }
 0xa40   : > { %6563 = vrcp.f32 %v6702_v31  ;;  %vm4520_vm1 = vcmask 1041408   ;;  %v6562_v36 = vld [vmem:[#allocation3] ss:$0 sm:$0xff]  ;;  %vm4529_vm2 = vcmask 1024  }
 0xa41   : > { %v4493_v16 = vadd.f32 %v4492_v13, %v4484_v8  ;;  %v4507_v55 = vadd.f32 %v4506_v14, %v4485_v11 }
 0xa43   : > { %v4494_v48 = vrot.slane %v4493_v16, 2  ;;  %v4508_v56 = vrot.slane %v4507_v55, 2 }
 0xa45   : > { %v4495_v18 = vadd.f32 %v4494_v48, %v4493_v16  ;;  %v4509_v19 = vadd.f32 %v4508_v56, %v4507_v55 }
 0xa46   : > { %v6564_v21 = vpop.eup %6563 }
 0xa47   : > { %v4499_v23 = vmul.f32 8.0, %v6564_v21  ;;  %v4496_v25 = vrot.slane %v4495_v18, 1  ;;  %v4510_v26 = vrot.slane %v4509_v19, 1  ;;  %vm4503_vm15 = vweird.f32 %v6564_v21 }
 0xa49   : > { %v4500_v43 = vsub.f32 1.0, %v4499_v23  ;;  %v4497_v54 = vadd.f32 %v4496_v25, %v4495_v18  ;;  %v4511_v29 = vadd.f32 %v4510_v26, %v4509_v19 }
 0xa4b   : > { %v4501_v27 = vmul.f32 %v6564_v21, %v4500_v43 }
 0xa4d   : > { %v4502_v30 = vadd.f32 %v6564_v21, %v4501_v27 }
 0xa4f   : > { %v4504_v17 = vsel %vm4503_vm15, %v6564_v21, %v4502_v30 }
 0xa50   : > { %v4505_v22 = vmul.f32 %v4504_v17, %v4497_v54  ;;  %v4512_v32 = vmul.f32 %v4511_v29, %v4504_v17 }
 0xa52   : > { %v4514_v33 = vsel %vm4513_vm0, %v4505_v22, %v4512_v32 }
 0xa53   : > { %v4519_v34 = vmul.f32 %v6561_v15, %v4514_v33 }
 0xa55   : > { %v4521_v35 = vsel %vm4520_vm1, %v4519_v34, 0.0 }
 0xa56   : > { %4522 = vadd.xlane.f32.xlu0 %v4521_v35 }
 0xac9   : > { %v4523_v37 = vpop.xlane.xlu0 %4522 }
 0xaca   : > { %v4528_v38 = vadd.f32 %v6562_v36, %v4523_v37 }
 0xacc   : > { %4530 = vst.msk [vmem:[%s7916_s4] sm:$0x3] %vm4529_vm2, %v4528_v38 }
 0xacd PF: > { %s7917_s19 = sld [smem:[#allocation12_spill]]  ;;  %s7920_s29 = smov %s6685_s30 }
 0xace   : > { %s7918_s6 = sld [smem:[#allocation11_spill]] }
 0xacf   : > { %s7919_s0 = sld [smem:[#allocation13_spill]] }
 0xad3   : > { %p33_p5 = scmp.ge.s32.totalorder %s7917_s19, 4  }
 0xad4   : > { %s7921_s30 = smov %s7918_s6 }
 0xad5   :  { %35 = sbr.rel (!%p33_p5) target bundleno = 19 (0x13), region = 187 }
 0xada   :  { %4542 = vsyncpa [#allocation5], 1 }
 0xadb   :  { %4544 = vsyncpa [#allocation5 + $0x1], 1 }
 0xadc   :  { %4545 = vsyncpa [#allocation7], 1 }
 0xadd   :  { %4547 = vsyncpa [#allocation7 + $0x1], 1 }

</bundles_post_ra>
